<compile_context>
chip_gen: v6e
topology: v6e:2x2x1
jax: 0.10.0
libtpu: 0.0.40
codegen_flags: <defaults>
</compile_context>

<pallas_src>
import functools

import jax
import jax.numpy as jnp
import numpy as np
from jax.experimental import pallas as pl
from jax.experimental.pallas import tpu as pltpu


def _attn_pool_kernel(x_ref, pos_ref, w_ref, b_ref, o_ref, *,
                      num_heads, use_bf16_matmul):
    """One block of Bb batch elements per grid step.

    x_ref  : (Bb, M, N, C)   raw input block
    pos_ref: (N, C)          positional embedding
    w_ref  : (C, 4*C)        packed [Wq^T*scale | Wk^T | Wv^T | Wo^T]
    b_ref  : (1, 4*C)        packed [bq*scale | bk | bv | bo]  (f32)
    o_ref  : (1, Bb*N, C)    pooled output rows for this block
    """
    Bb, M, N, C = x_ref.shape
    L = (M + 1) * N
    H = num_heads
    Dh = C // H
    mxt = jnp.bfloat16 if use_bf16_matmul else jnp.float32   # MXU operand dtype

    x = x_ref[...].astype(jnp.float32)         # (Bb, M, N, C)
    pos = pos_ref[...].astype(jnp.float32)     # (N, C)

    # ---- fused glue: avg token, concat, +pos, '(m n)' flatten (m-major) ----
    # TODO(synk): feed x lane-dense as (Bb, M, N*C) once Mosaic reliably lowers
    # the in-kernel minor-dim-splitting reshape back to (rows, C); at
    # production C >= 128 this layout is already lane-dense, only small-C toys
    # pay VMEM padding.
    avg = jnp.mean(x, axis=1, keepdims=True)                      # (Bb, 1, N, C)
    xcat = jnp.concatenate([avg, x], axis=1) + pos[None, None]    # (Bb, M+1, N, C)
    kv2 = xcat.reshape(Bb * L, C)                                 # leading-dim merge only

    # ---- one fused projection matmul over the lane-dense (C, 4C) weight ----
    w = w_ref[...].astype(mxt)                                    # (C, 4C)
    b_all = b_ref[...]                                            # (1, 4C) f32
    qkv = jnp.dot(kv2.astype(mxt), w,
                  preferred_element_type=jnp.float32) + b_all     # (Bb*L, 4C)
    qkv3 = qkv.reshape(Bb, L, 4 * C)                              # leading-dim split

    q3 = qkv3[:, :N, 0:C]            # (Bb, N, C)  m == 0 rows are the query tokens
    k3 = qkv3[:, :, C:2 * C]         # (Bb, L, C)
    v3 = qkv3[:, :, 2 * C:3 * C]     # (Bb, L, C)
    wo = w[:, 3 * C:4 * C]           # (C, C)   output projection (transposed)
    bo = b_all[:, 3 * C:4 * C]       # (1, C)

    # ---- per-head attention, batched over Bb; accumulate the output
    #      projection per head instead of concatenating head outputs ----
    # TODO(synk): hoist the head split into one reshape + (Bb*H, ., Dh) batched
    # layout once Mosaic supports non-minormost rank-4 transposes; until then
    # keep the (proven-to-lower) static per-head lane slices.
    out = jnp.zeros((Bb * N, C), jnp.float32)
    for h in range(H):                                            # static unroll, H small
        lo, hi = h * Dh, (h + 1) * Dh
        qh = q3[:, :, lo:hi]                                      # (Bb, N, Dh) (pre-scaled)
        kh = k3[:, :, lo:hi]                                      # (Bb, L, Dh)
        vh = v3[:, :, lo:hi]                                      # (Bb, L, Dh)

        s = jnp.einsum('bnd,bld->bnl', qh.astype(mxt), kh.astype(mxt),
                       preferred_element_type=jnp.float32)        # (Bb, N, L)
        s = s - jnp.max(s, axis=-1, keepdims=True)
        p = jnp.exp(s)
        denom = jnp.sum(p, axis=-1, keepdims=True)                # (Bb, N, 1) f32
        oh = jnp.einsum('bnl,bld->bnd', p.astype(mxt), vh.astype(mxt),
                        preferred_element_type=jnp.float32)       # (Bb, N, Dh)
        # Fold 1/denom into the p@v result; approx reciprocal uses the EUP slot.
        oh = oh * pl.reciprocal(denom, approx=True)

        out = out + jnp.dot(oh.reshape(Bb * N, Dh).astype(mxt),
                            wo[lo:hi, :],
                            preferred_element_type=jnp.float32)   # (Bb*N, C)
    out = out + bo                                                # (Bb*N, C)

    # ---- single unsliced block store (no per-n slices / minor-axis concat) ----
    # TODO(synk): emit a lane-dense (Bb, N*C) row via reshape once minor-dim
    # merging shape-casts are reliably supported; at production C >= 128 this
    # store is already lane-dense.
    o_ref[0] = out.astype(o_ref.dtype)


def _num_tensorcores_per_chip():
    """Best-effort TensorCore-per-chip count: v7x has 2, v5e/v6e have 1."""
    try:
        kind = jax.devices()[0].device_kind.lower()
    except Exception:
        return 1
    return 2 if "v7" in kind else 1


def _pick_block_b(B, M, N, C, *, target, min_steps, vmem_budget_bytes=8 << 20):
    """Largest divisor of B that (a) is <= target, (b) keeps >= min_steps grid
    steps when possible (so both v7x TensorCores get work; min_steps=1 on
    single-TC v5e/v6e so the whole batch is one block), and (c) keeps the rough
    per-block f32 working set under vmem_budget_bytes."""
    L = (M + 1) * N
    per_b = 4 * (M * N * C           # x block
                 + (M + 1) * N * C   # avg/concat/+pos intermediate
                 + L * 4 * C         # fused qkv result
                 + 3 * L * C         # q/k/v column slices
                 + 2 * N * L         # one head's scores / probs in flight
                 + 2 * N * C)        # output accumulator (+ store copy)
    cap = max(1, vmem_budget_bytes // max(per_b, 1))
    divisors = [d for d in range(1, B + 1) if B % d == 0]
    ok = [d for d in divisors if d <= target and d <= cap and B // d >= min_steps]
    if not ok:
        ok = [d for d in divisors if d <= target and d <= cap] or [1]
    return max(ok)


def attention_pooling_1d(x, params, num_heads, *, block_b=64,
                         use_bf16_matmul=True, single_buffer_params=False):
    """x: (B, M, N, C) float32  ->  (B, N, C) float32."""
    B, M, N, C = x.shape
    assert C % num_heads == 0
    head_dim = C // num_heads
    scale = head_dim ** -0.5
    L = (M + 1) * N

    min_steps = _num_tensorcores_per_chip()        # 2 on v7x, 1 on v5e / v6e
    Bb = _pick_block_b(B, M, N, C, target=block_b, min_steps=min_steps)
    G = B // Bb

    # PyTorch Linear computes x @ W.T + b; pre-transpose, fold the 1/sqrt(Dh)
    # query scale into Wq^T / bq, and pack everything lane-dense as (C, 4C).
    w_dtype = jnp.bfloat16 if use_bf16_matmul else jnp.float32
    w_packed = jnp.concatenate(
        [params["wq"].T * scale, params["wk"].T, params["wv"].T, params["wo"].T],
        axis=1).astype(w_dtype)                                         # (C, 4C)
    b_packed = jnp.concatenate(
        [params["bq"] * scale, params["bk"], params["bv"], params["bo"]],
        axis=0).reshape(1, 4 * C).astype(jnp.float32)                   # (1, 4C)
    pos = params["pos_embedding"].astype(jnp.float32)                   # (N, C)

    kernel = functools.partial(_attn_pool_kernel, num_heads=num_heads,
                               use_bf16_matmul=use_bf16_matmul)

    # Constant-index parameter streams: their index map never changes, so they
    # can be single-buffered on VMEM-tight chips.
    # TODO(synk): enable single_buffer_params on v7x (64 MiB VMEM) at production C.
    def const_spec(shape):
        if single_buffer_params:
            return pl.BlockSpec(shape, lambda *_: (0,) * len(shape),
                                pipeline_mode=pl.Buffered(1))
        return pl.BlockSpec(shape, lambda *_: (0,) * len(shape))

    # Scoped-VMEM limit sized to the block footprint (with margin), clamped
    # well under v7x's 64 MiB physical VMEM.
    elt = 2 if use_bf16_matmul else 4
    block_bytes = (2 * Bb * M * N * C * 4                 # double-buffered x blocks
                   + 2 * Bb * N * C * 4                   # double-buffered out blocks
                   + 2 * (C * 4 * C * elt + 4 * 4 * C + N * C * 4)   # params
                   + Bb * 4 * ((M + 1) * N * C + L * 4 * C + 3 * L * C
                               + 2 * N * L + 2 * N * C))  # live f32 temporaries
    vmem_limit = int(min(max(4 * block_bytes, 32 << 20), 48 << 20))

    out = pl.pallas_call(
        kernel,
        out_shape=jax.ShapeDtypeStruct((G, Bb * N, C), x.dtype),
        grid=(G,),
        in_specs=[
            pl.BlockSpec((Bb, M, N, C), lambda i: (i, 0, 0, 0)),   # x block
            const_spec((N, C)),                                    # pos embedding
            const_spec((C, 4 * C)),                                # packed W^T
            const_spec((1, 4 * C)),                                # packed biases
        ],
        out_specs=pl.BlockSpec((1, Bb * N, C), lambda i: (i, 0, 0)),
        compiler_params=pltpu.CompilerParams(
            dimension_semantics=("parallel",),
            vmem_limit_bytes=vmem_limit),
    )(x, pos, w_packed, b_packed)
    return out.reshape(B, N, C)


def _reference(x, params, num_heads):
    """Pure-JAX reference mirroring F.multi_head_attention_forward semantics."""
    B, M, N, C = x.shape
    head_dim = C // num_heads
    avg = jnp.mean(x, axis=1, keepdims=True)
    xcat = jnp.concatenate([avg, x], axis=1) + params["pos_embedding"][None, None]
    kv = xcat.reshape(B, (M + 1) * N, C)
    q_tok = xcat[:, 0]

    q = q_tok @ params["wq"].T + params["bq"]
    k = kv @ params["wk"].T + params["bk"]
    v = kv @ params["wv"].T + params["bv"]

    def split_heads(t):
        b, l, c = t.shape
        return t.reshape(b, l, num_heads, head_dim).transpose(0, 2, 1, 3)

    qh = split_heads(q) * (head_dim ** -0.5)
    kh = split_heads(k)
    vh = split_heads(v)
    s = jnp.einsum("bhnd,bhld->bhnl", qh, kh)
    p = jax.nn.softmax(s, axis=-1)
    o = jnp.einsum("bhnl,bhld->bhnd", p, vh)
    o = o.transpose(0, 2, 1, 3).reshape(B, N, C)
    return o @ params["wo"].T + params["bo"]


if __name__ == "__main__":
    # x: (B*T, M, N, C); sequence_length == N, dim == C
    B, M, N, C = 8, 4, 8, 32
    NUM_HEADS = 4

    key = jax.random.PRNGKey(0)
    ks = jax.random.split(key, 10)

    params = {
        "pos_embedding": jax.random.normal(ks[0], (N, C), jnp.float32) / (C ** 0.5),
        "wq": jax.random.normal(ks[1], (C, C), jnp.float32) * (1.0 / C ** 0.5),
        "wk": jax.random.normal(ks[2], (C, C), jnp.float32) * (1.0 / C ** 0.5),
        "wv": jax.random.normal(ks[3], (C, C), jnp.float32) * (1.0 / C ** 0.5),
        "wo": jax.random.normal(ks[4], (C, C), jnp.float32) * (1.0 / C ** 0.5),
        "bq": jax.random.normal(ks[5], (C,), jnp.float32) * 0.1,
        "bk": jax.random.normal(ks[6], (C,), jnp.float32) * 0.1,
        "bv": jax.random.normal(ks[7], (C,), jnp.float32) * 0.1,
        "bo": jax.random.normal(ks[8], (C,), jnp.float32) * 0.1,
    }
    x = jax.random.normal(ks[9], (B, M, N, C), jnp.float32)

    ref = _reference(x, params, NUM_HEADS)

    # Default path: bf16 MXU operands, f32 accumulation / softmax stats.
    out_bf16 = jax.block_until_ready(attention_pooling_1d(x, params, NUM_HEADS))
    assert out_bf16.shape == (B, N, C)
    np.testing.assert_allclose(np.asarray(out_bf16), np.asarray(ref),
                               rtol=5e-2, atol=5e-2)

    # Full-f32 path (only approx-reciprocal error, ~1e-4 relative).
    out_f32 = jax.block_until_ready(
        attention_pooling_1d(x, params, NUM_HEADS, use_bf16_matmul=False))
    np.testing.assert_allclose(np.asarray(out_f32), np.asarray(ref),
                               rtol=2e-3, atol=2e-3)

    print("KERNEL_OK")
</pallas_src>

<mosaic_0001>
module attributes {stable_mosaic.version = 11 : i64} {
  func.func @_attn_pool_kernel(%arg0: i32, %arg1: memref<8x4x8x32xf32, #tpu.memory_space<vmem>>, %arg2: memref<8x32xf32, #tpu.memory_space<vmem>>, %arg3: memref<32x128xbf16, #tpu.memory_space<vmem>>, %arg4: memref<1x128xf32, #tpu.memory_space<vmem>>, %arg5: memref<1x64x32xf32, #tpu.memory_space<vmem>>) attributes {dimension_semantics = [#tpu.dimension_semantics<parallel>], iteration_bounds = array<i64: 1>, scalar_prefetch = 0 : i64, scratch_operands = 0 : i64, tpu.core_type = #tpu.core_type<tc>, window_params = [{transform_indices = @transform_0, window_bounds = array<i64: 8, 4, 8, 32>}, {pipeline_mode = #tpu.pipeline_mode<synchronous>, transform_indices = @transform_1, window_bounds = array<i64: 8, 32>}, {pipeline_mode = #tpu.pipeline_mode<synchronous>, transform_indices = @transform_2, window_bounds = array<i64: 32, 128>}, {pipeline_mode = #tpu.pipeline_mode<synchronous>, transform_indices = @transform_3, window_bounds = array<i64: 1, 128>}, {transform_indices = @transform_4, window_bounds = array<i64: 1, 64, 32>}]} {
    %c0 = arith.constant 0 : index
    %c0_0 = arith.constant 0 : index
    %c0_1 = arith.constant 0 : index
    %c0_2 = arith.constant 0 : index
    %0 = vector.load %arg1[%c0, %c0_0, %c0_1, %c0_2] : memref<8x4x8x32xf32, #tpu.memory_space<vmem>>, vector<8x4x8x32xf32>
    %c0_3 = arith.constant 0 : index
    %c0_4 = arith.constant 0 : index
    %1 = vector.load %arg2[%c0_3, %c0_4] : memref<8x32xf32, #tpu.memory_space<vmem>>, vector<8x32xf32>
    %cst = arith.constant dense<0.000000e+00> : vector<8x8x32xf32>
    %2 = vector.multi_reduction <add>, %0, %cst [1] : vector<8x4x8x32xf32> to vector<8x8x32xf32>
    %3 = vector.shape_cast %2 : vector<8x8x32xf32> to vector<8x1x8x32xf32>
    %cst_5 = arith.constant 4.000000e+00 : f32
    %4 = vector.broadcast %cst_5 : f32 to vector<8x1x8x32xf32>
    %5 = arith.divf %3, %4 : vector<8x1x8x32xf32>
    %6 = tpu.concatenate %5, %0 in 1 : vector<8x1x8x32xf32>, vector<8x4x8x32xf32> -> vector<8x5x8x32xf32>
    %7 = vector.shape_cast %1 : vector<8x32xf32> to vector<1x1x8x32xf32>
    %8 = vector.broadcast %7 : vector<1x1x8x32xf32> to vector<8x5x8x32xf32>
    %9 = arith.addf %6, %8 : vector<8x5x8x32xf32>
    %10 = vector.shape_cast %9 : vector<8x5x8x32xf32> to vector<320x32xf32>
    %c0_6 = arith.constant 0 : index
    %c0_7 = arith.constant 0 : index
    %11 = vector.load %arg3[%c0_6, %c0_7] : memref<32x128xbf16, #tpu.memory_space<vmem>>, vector<32x128xbf16>
    %c0_8 = arith.constant 0 : index
    %c0_9 = arith.constant 0 : index
    %12 = vector.load %arg4[%c0_8, %c0_9] : memref<1x128xf32, #tpu.memory_space<vmem>>, vector<1x128xf32>
    %13 = arith.truncf %10 : vector<320x32xf32> to vector<320x32xbf16>
    %cst_10 = arith.constant dense<0.000000e+00> : vector<320x128xf32>
    %14 = tpu.matmul %13, %11, %cst_10 {dimension_numbers = #tpu.dot_dimension_numbers<[1], [0], [0], [1], [0, 0, 1, 1], [], []>} : vector<320x32xbf16>, vector<32x128xbf16>, vector<320x128xf32> -> vector<320x128xf32>
    %15 = vector.broadcast %12 : vector<1x128xf32> to vector<320x128xf32>
    %16 = arith.addf %14, %15 : vector<320x128xf32>
    %17 = vector.shape_cast %16 : vector<320x128xf32> to vector<8x40x128xf32>
    %18 = vector.extract_strided_slice %17 {offsets = [0, 0, 0], sizes = [8, 8, 32], strides = [1, 1, 1]} : vector<8x40x128xf32> to vector<8x8x32xf32>
    %19 = vector.extract_strided_slice %17 {offsets = [0, 0, 32], sizes = [8, 40, 32], strides = [1, 1, 1]} : vector<8x40x128xf32> to vector<8x40x32xf32>
    %20 = vector.extract_strided_slice %17 {offsets = [0, 0, 64], sizes = [8, 40, 32], strides = [1, 1, 1]} : vector<8x40x128xf32> to vector<8x40x32xf32>
    %21 = vector.extract_strided_slice %11 {offsets = [0, 96], sizes = [32, 32], strides = [1, 1]} : vector<32x128xbf16> to vector<32x32xbf16>
    %22 = vector.extract_strided_slice %12 {offsets = [0, 96], sizes = [1, 32], strides = [1, 1]} : vector<1x128xf32> to vector<1x32xf32>
    %cst_11 = arith.constant 0.000000e+00 : f32
    %23 = vector.broadcast %cst_11 : f32 to vector<64x32xf32>
    %24 = vector.extract_strided_slice %18 {offsets = [0, 0, 0], sizes = [8, 8, 8], strides = [1, 1, 1]} : vector<8x8x32xf32> to vector<8x8x8xf32>
    %25 = vector.extract_strided_slice %19 {offsets = [0, 0, 0], sizes = [8, 40, 8], strides = [1, 1, 1]} : vector<8x40x32xf32> to vector<8x40x8xf32>
    %26 = vector.extract_strided_slice %20 {offsets = [0, 0, 0], sizes = [8, 40, 8], strides = [1, 1, 1]} : vector<8x40x32xf32> to vector<8x40x8xf32>
    %27 = arith.truncf %24 : vector<8x8x8xf32> to vector<8x8x8xbf16>
    %28 = arith.truncf %25 : vector<8x40x8xf32> to vector<8x40x8xbf16>
    "tpu.trace_start"() <{level = 10 : i32, message = "bnd,bld->bnl"}> : () -> ()
    %cst_12 = arith.constant dense<0.000000e+00> : vector<8x8x40xf32>
    %29 = tpu.matmul %27, %28, %cst_12 {dimension_numbers = #tpu.dot_dimension_numbers<[2], [2], [1], [1], [0, 0, 0, 1, 1, 1], [0], [0]>} : vector<8x8x8xbf16>, vector<8x40x8xbf16>, vector<8x8x40xf32> -> vector<8x8x40xf32>
    "tpu.trace_stop"() : () -> ()
    %cst_13 = arith.constant dense<0xFF800000> : vector<8x8xf32>
    %30 = vector.multi_reduction <maximumf>, %29, %cst_13 [2] : vector<8x8x40xf32> to vector<8x8xf32>
    %31 = vector.shape_cast %30 : vector<8x8xf32> to vector<8x8x1xf32>
    %32 = vector.broadcast %31 : vector<8x8x1xf32> to vector<8x8x40xf32>
    %33 = arith.subf %29, %32 : vector<8x8x40xf32>
    %34 = math.exp %33 : vector<8x8x40xf32>
    %cst_14 = arith.constant dense<0.000000e+00> : vector<8x8xf32>
    %35 = vector.multi_reduction <add>, %34, %cst_14 [2] : vector<8x8x40xf32> to vector<8x8xf32>
    %36 = vector.shape_cast %35 : vector<8x8xf32> to vector<8x8x1xf32>
    %37 = arith.truncf %34 : vector<8x8x40xf32> to vector<8x8x40xbf16>
    %38 = arith.truncf %26 : vector<8x40x8xf32> to vector<8x40x8xbf16>
    "tpu.trace_start"() <{level = 10 : i32, message = "bnl,bld->bnd"}> : () -> ()
    %cst_15 = arith.constant dense<0.000000e+00> : vector<8x8x8xf32>
    %39 = tpu.matmul %37, %38, %cst_15 {dimension_numbers = #tpu.dot_dimension_numbers<[2], [1], [1], [2], [0, 0, 0, 1, 1, 2], [0], [0]>} : vector<8x8x40xbf16>, vector<8x40x8xbf16>, vector<8x8x8xf32> -> vector<8x8x8xf32>
    "tpu.trace_stop"() : () -> ()
    %40 = tpu.reciprocal %36 {approx = true} : vector<8x8x1xf32> -> vector<8x8x1xf32>
    %41 = vector.broadcast %40 : vector<8x8x1xf32> to vector<8x8x8xf32>
    %42 = arith.mulf %39, %41 : vector<8x8x8xf32>
    %43 = vector.shape_cast %42 : vector<8x8x8xf32> to vector<64x8xf32>
    %44 = arith.truncf %43 : vector<64x8xf32> to vector<64x8xbf16>
    %45 = vector.extract_strided_slice %21 {offsets = [0, 0], sizes = [8, 32], strides = [1, 1]} : vector<32x32xbf16> to vector<8x32xbf16>
    %cst_16 = arith.constant dense<0.000000e+00> : vector<64x32xf32>
    %46 = tpu.matmul %44, %45, %cst_16 {dimension_numbers = #tpu.dot_dimension_numbers<[1], [0], [0], [1], [0, 0, 1, 1], [], []>} : vector<64x8xbf16>, vector<8x32xbf16>, vector<64x32xf32> -> vector<64x32xf32>
    %47 = arith.addf %23, %46 : vector<64x32xf32>
    %48 = vector.extract_strided_slice %18 {offsets = [0, 0, 8], sizes = [8, 8, 8], strides = [1, 1, 1]} : vector<8x8x32xf32> to vector<8x8x8xf32>
    %49 = vector.extract_strided_slice %19 {offsets = [0, 0, 8], sizes = [8, 40, 8], strides = [1, 1, 1]} : vector<8x40x32xf32> to vector<8x40x8xf32>
    %50 = vector.extract_strided_slice %20 {offsets = [0, 0, 8], sizes = [8, 40, 8], strides = [1, 1, 1]} : vector<8x40x32xf32> to vector<8x40x8xf32>
    %51 = arith.truncf %48 : vector<8x8x8xf32> to vector<8x8x8xbf16>
    %52 = arith.truncf %49 : vector<8x40x8xf32> to vector<8x40x8xbf16>
    "tpu.trace_start"() <{level = 10 : i32, message = "bnd,bld->bnl"}> : () -> ()
    %cst_17 = arith.constant dense<0.000000e+00> : vector<8x8x40xf32>
    %53 = tpu.matmul %51, %52, %cst_17 {dimension_numbers = #tpu.dot_dimension_numbers<[2], [2], [1], [1], [0, 0, 0, 1, 1, 1], [0], [0]>} : vector<8x8x8xbf16>, vector<8x40x8xbf16>, vector<8x8x40xf32> -> vector<8x8x40xf32>
    "tpu.trace_stop"() : () -> ()
    %cst_18 = arith.constant dense<0xFF800000> : vector<8x8xf32>
    %54 = vector.multi_reduction <maximumf>, %53, %cst_18 [2] : vector<8x8x40xf32> to vector<8x8xf32>
    %55 = vector.shape_cast %54 : vector<8x8xf32> to vector<8x8x1xf32>
    %56 = vector.broadcast %55 : vector<8x8x1xf32> to vector<8x8x40xf32>
    %57 = arith.subf %53, %56 : vector<8x8x40xf32>
    %58 = math.exp %57 : vector<8x8x40xf32>
    %cst_19 = arith.constant dense<0.000000e+00> : vector<8x8xf32>
    %59 = vector.multi_reduction <add>, %58, %cst_19 [2] : vector<8x8x40xf32> to vector<8x8xf32>
    %60 = vector.shape_cast %59 : vector<8x8xf32> to vector<8x8x1xf32>
    %61 = arith.truncf %58 : vector<8x8x40xf32> to vector<8x8x40xbf16>
    %62 = arith.truncf %50 : vector<8x40x8xf32> to vector<8x40x8xbf16>
    "tpu.trace_start"() <{level = 10 : i32, message = "bnl,bld->bnd"}> : () -> ()
    %cst_20 = arith.constant dense<0.000000e+00> : vector<8x8x8xf32>
    %63 = tpu.matmul %61, %62, %cst_20 {dimension_numbers = #tpu.dot_dimension_numbers<[2], [1], [1], [2], [0, 0, 0, 1, 1, 2], [0], [0]>} : vector<8x8x40xbf16>, vector<8x40x8xbf16>, vector<8x8x8xf32> -> vector<8x8x8xf32>
    "tpu.trace_stop"() : () -> ()
    %64 = tpu.reciprocal %60 {approx = true} : vector<8x8x1xf32> -> vector<8x8x1xf32>
    %65 = vector.broadcast %64 : vector<8x8x1xf32> to vector<8x8x8xf32>
    %66 = arith.mulf %63, %65 : vector<8x8x8xf32>
    %67 = vector.shape_cast %66 : vector<8x8x8xf32> to vector<64x8xf32>
    %68 = arith.truncf %67 : vector<64x8xf32> to vector<64x8xbf16>
    %69 = vector.extract_strided_slice %21 {offsets = [8, 0], sizes = [8, 32], strides = [1, 1]} : vector<32x32xbf16> to vector<8x32xbf16>
    %cst_21 = arith.constant dense<0.000000e+00> : vector<64x32xf32>
    %70 = tpu.matmul %68, %69, %cst_21 {dimension_numbers = #tpu.dot_dimension_numbers<[1], [0], [0], [1], [0, 0, 1, 1], [], []>} : vector<64x8xbf16>, vector<8x32xbf16>, vector<64x32xf32> -> vector<64x32xf32>
    %71 = arith.addf %47, %70 : vector<64x32xf32>
    %72 = vector.extract_strided_slice %18 {offsets = [0, 0, 16], sizes = [8, 8, 8], strides = [1, 1, 1]} : vector<8x8x32xf32> to vector<8x8x8xf32>
    %73 = vector.extract_strided_slice %19 {offsets = [0, 0, 16], sizes = [8, 40, 8], strides = [1, 1, 1]} : vector<8x40x32xf32> to vector<8x40x8xf32>
    %74 = vector.extract_strided_slice %20 {offsets = [0, 0, 16], sizes = [8, 40, 8], strides = [1, 1, 1]} : vector<8x40x32xf32> to vector<8x40x8xf32>
    %75 = arith.truncf %72 : vector<8x8x8xf32> to vector<8x8x8xbf16>
    %76 = arith.truncf %73 : vector<8x40x8xf32> to vector<8x40x8xbf16>
    "tpu.trace_start"() <{level = 10 : i32, message = "bnd,bld->bnl"}> : () -> ()
    %cst_22 = arith.constant dense<0.000000e+00> : vector<8x8x40xf32>
    %77 = tpu.matmul %75, %76, %cst_22 {dimension_numbers = #tpu.dot_dimension_numbers<[2], [2], [1], [1], [0, 0, 0, 1, 1, 1], [0], [0]>} : vector<8x8x8xbf16>, vector<8x40x8xbf16>, vector<8x8x40xf32> -> vector<8x8x40xf32>
    "tpu.trace_stop"() : () -> ()
    %cst_23 = arith.constant dense<0xFF800000> : vector<8x8xf32>
    %78 = vector.multi_reduction <maximumf>, %77, %cst_23 [2] : vector<8x8x40xf32> to vector<8x8xf32>
    %79 = vector.shape_cast %78 : vector<8x8xf32> to vector<8x8x1xf32>
    %80 = vector.broadcast %79 : vector<8x8x1xf32> to vector<8x8x40xf32>
    %81 = arith.subf %77, %80 : vector<8x8x40xf32>
    %82 = math.exp %81 : vector<8x8x40xf32>
    %cst_24 = arith.constant dense<0.000000e+00> : vector<8x8xf32>
    %83 = vector.multi_reduction <add>, %82, %cst_24 [2] : vector<8x8x40xf32> to vector<8x8xf32>
    %84 = vector.shape_cast %83 : vector<8x8xf32> to vector<8x8x1xf32>
    %85 = arith.truncf %82 : vector<8x8x40xf32> to vector<8x8x40xbf16>
    %86 = arith.truncf %74 : vector<8x40x8xf32> to vector<8x40x8xbf16>
    "tpu.trace_start"() <{level = 10 : i32, message = "bnl,bld->bnd"}> : () -> ()
    %cst_25 = arith.constant dense<0.000000e+00> : vector<8x8x8xf32>
    %87 = tpu.matmul %85, %86, %cst_25 {dimension_numbers = #tpu.dot_dimension_numbers<[2], [1], [1], [2], [0, 0, 0, 1, 1, 2], [0], [0]>} : vector<8x8x40xbf16>, vector<8x40x8xbf16>, vector<8x8x8xf32> -> vector<8x8x8xf32>
    "tpu.trace_stop"() : () -> ()
    %88 = tpu.reciprocal %84 {approx = true} : vector<8x8x1xf32> -> vector<8x8x1xf32>
    %89 = vector.broadcast %88 : vector<8x8x1xf32> to vector<8x8x8xf32>
    %90 = arith.mulf %87, %89 : vector<8x8x8xf32>
    %91 = vector.shape_cast %90 : vector<8x8x8xf32> to vector<64x8xf32>
    %92 = arith.truncf %91 : vector<64x8xf32> to vector<64x8xbf16>
    %93 = vector.extract_strided_slice %21 {offsets = [16, 0], sizes = [8, 32], strides = [1, 1]} : vector<32x32xbf16> to vector<8x32xbf16>
    %cst_26 = arith.constant dense<0.000000e+00> : vector<64x32xf32>
    %94 = tpu.matmul %92, %93, %cst_26 {dimension_numbers = #tpu.dot_dimension_numbers<[1], [0], [0], [1], [0, 0, 1, 1], [], []>} : vector<64x8xbf16>, vector<8x32xbf16>, vector<64x32xf32> -> vector<64x32xf32>
    %95 = arith.addf %71, %94 : vector<64x32xf32>
    %96 = vector.extract_strided_slice %18 {offsets = [0, 0, 24], sizes = [8, 8, 8], strides = [1, 1, 1]} : vector<8x8x32xf32> to vector<8x8x8xf32>
    %97 = vector.extract_strided_slice %19 {offsets = [0, 0, 24], sizes = [8, 40, 8], strides = [1, 1, 1]} : vector<8x40x32xf32> to vector<8x40x8xf32>
    %98 = vector.extract_strided_slice %20 {offsets = [0, 0, 24], sizes = [8, 40, 8], strides = [1, 1, 1]} : vector<8x40x32xf32> to vector<8x40x8xf32>
    %99 = arith.truncf %96 : vector<8x8x8xf32> to vector<8x8x8xbf16>
    %100 = arith.truncf %97 : vector<8x40x8xf32> to vector<8x40x8xbf16>
    "tpu.trace_start"() <{level = 10 : i32, message = "bnd,bld->bnl"}> : () -> ()
    %cst_27 = arith.constant dense<0.000000e+00> : vector<8x8x40xf32>
    %101 = tpu.matmul %99, %100, %cst_27 {dimension_numbers = #tpu.dot_dimension_numbers<[2], [2], [1], [1], [0, 0, 0, 1, 1, 1], [0], [0]>} : vector<8x8x8xbf16>, vector<8x40x8xbf16>, vector<8x8x40xf32> -> vector<8x8x40xf32>
    "tpu.trace_stop"() : () -> ()
    %cst_28 = arith.constant dense<0xFF800000> : vector<8x8xf32>
    %102 = vector.multi_reduction <maximumf>, %101, %cst_28 [2] : vector<8x8x40xf32> to vector<8x8xf32>
    %103 = vector.shape_cast %102 : vector<8x8xf32> to vector<8x8x1xf32>
    %104 = vector.broadcast %103 : vector<8x8x1xf32> to vector<8x8x40xf32>
    %105 = arith.subf %101, %104 : vector<8x8x40xf32>
    %106 = math.exp %105 : vector<8x8x40xf32>
    %cst_29 = arith.constant dense<0.000000e+00> : vector<8x8xf32>
    %107 = vector.multi_reduction <add>, %106, %cst_29 [2] : vector<8x8x40xf32> to vector<8x8xf32>
    %108 = vector.shape_cast %107 : vector<8x8xf32> to vector<8x8x1xf32>
    %109 = arith.truncf %106 : vector<8x8x40xf32> to vector<8x8x40xbf16>
    %110 = arith.truncf %98 : vector<8x40x8xf32> to vector<8x40x8xbf16>
    "tpu.trace_start"() <{level = 10 : i32, message = "bnl,bld->bnd"}> : () -> ()
    %cst_30 = arith.constant dense<0.000000e+00> : vector<8x8x8xf32>
    %111 = tpu.matmul %109, %110, %cst_30 {dimension_numbers = #tpu.dot_dimension_numbers<[2], [1], [1], [2], [0, 0, 0, 1, 1, 2], [0], [0]>} : vector<8x8x40xbf16>, vector<8x40x8xbf16>, vector<8x8x8xf32> -> vector<8x8x8xf32>
    "tpu.trace_stop"() : () -> ()
    %112 = tpu.reciprocal %108 {approx = true} : vector<8x8x1xf32> -> vector<8x8x1xf32>
    %113 = vector.broadcast %112 : vector<8x8x1xf32> to vector<8x8x8xf32>
    %114 = arith.mulf %111, %113 : vector<8x8x8xf32>
    %115 = vector.shape_cast %114 : vector<8x8x8xf32> to vector<64x8xf32>
    %116 = arith.truncf %115 : vector<64x8xf32> to vector<64x8xbf16>
    %117 = vector.extract_strided_slice %21 {offsets = [24, 0], sizes = [8, 32], strides = [1, 1]} : vector<32x32xbf16> to vector<8x32xbf16>
    %cst_31 = arith.constant dense<0.000000e+00> : vector<64x32xf32>
    %118 = tpu.matmul %116, %117, %cst_31 {dimension_numbers = #tpu.dot_dimension_numbers<[1], [0], [0], [1], [0, 0, 1, 1], [], []>} : vector<64x8xbf16>, vector<8x32xbf16>, vector<64x32xf32> -> vector<64x32xf32>
    %119 = arith.addf %95, %118 : vector<64x32xf32>
    %120 = vector.broadcast %22 : vector<1x32xf32> to vector<64x32xf32>
    %121 = arith.addf %119, %120 : vector<64x32xf32>
    %c0_32 = arith.constant 0 : index
    %c0_33 = arith.constant 0 : index
    %c0_34 = arith.constant 0 : index
    %122 = vector.load %arg5[%c0_32, %c0_33, %c0_34] : memref<1x64x32xf32, #tpu.memory_space<vmem>>, vector<1x64x32xf32>
    %123 = vector.shape_cast %122 : vector<1x64x32xf32> to vector<64x32xf32>
    %124 = vector.shape_cast %121 : vector<64x32xf32> to vector<1x64x32xf32>
    tpu.vector_store %arg5[%c0_32, %c0_33, %c0_34], %124 {strides = array<i32>} : memref<1x64x32xf32, #tpu.memory_space<vmem>>, vector<1x64x32xf32>,
    return
  }
  func.func @transform_0(%arg0: i32) -> (i32, i32, i32, i32) {
    %c0_i32 = arith.constant 0 : i32
    %c0_i32_0 = arith.constant 0 : i32
    %c0_i32_1 = arith.constant 0 : i32
    %c0_i32_2 = arith.constant 0 : i32
    return %arg0, %c0_i32, %c0_i32_0, %c0_i32_1 : i32, i32, i32, i32
  }
  func.func @transform_1(%arg0: i32) -> (i32, i32) {
    %c0_i32 = arith.constant 0 : i32
    %c0_i32_0 = arith.constant 0 : i32
    %c0_i32_1 = arith.constant 0 : i32
    return %c0_i32, %c0_i32_0 : i32, i32
  }
  func.func @transform_2(%arg0: i32) -> (i32, i32) {
    %c0_i32 = arith.constant 0 : i32
    %c0_i32_0 = arith.constant 0 : i32
    %c0_i32_1 = arith.constant 0 : i32
    return %c0_i32, %c0_i32_0 : i32, i32
  }
  func.func @transform_3(%arg0: i32) -> (i32, i32) {
    %c0_i32 = arith.constant 0 : i32
    %c0_i32_0 = arith.constant 0 : i32
    %c0_i32_1 = arith.constant 0 : i32
    return %c0_i32, %c0_i32_0 : i32, i32
  }
  func.func @transform_4(%arg0: i32) -> (i32, i32, i32) {
    %c0_i32 = arith.constant 0 : i32
    %c0_i32_0 = arith.constant 0 : i32
    %c0_i32_1 = arith.constant 0 : i32
    return %arg0, %c0_i32, %c0_i32_0 : i32, i32, i32
  }
}

</mosaic_0001>

<bundles_post_ra>
// kernel: tpu_custom_call.1
= control target key start
LH: loop header
LB: loop body
LE: loop exit
PB: predicated region body
PF: predicated region fallthrough
CT: control target
= control target key end

     0   :  { %9 = vsyncpa [#allocation3], 0  ;;  %s8127_s0 = inlined_call_operand.hbm [shape: f32[8,4,8,32], index: 0, kind: input, shape index: {}]   ;;  %s8128_s1 = inlined_call_operand.hbm [shape: f32[8,32], index: 1, kind: input, shape index: {}]   ;;  %s8129_s2 = inlined_call_operand.hbm [shape: bf16[32,128], index: 2, kind: input, shape index: {}]   ;;  %s8130_s3 = inlined_call_operand.vmem [shape: f32[1,128], index: 3, kind: input, shape index: {}]   ;;  %s8131_s4 = inlined_call_operand.vmem [shape: f32[1,64,32], index: 4, kind: output, shape index: {}]  }
   0x1   :  { %10 = vsyncpa [#allocation5], 0  ;;  %s6320_s15 = smov [#allocation4]   ;;  %s6321_s17 = smov [#allocation2]  }
   0x2   :  { %s29_s16 = sshll.u32 %s6320_s15, 4  ;;  %s16_s18 = sshll.u32 %s6321_s17, 4  ;;  %s30_s16 = int_to_ptr.vmem [resolvable:$true] %s29_s16  ;;  %s17_s18 = int_to_ptr.vmem [resolvable:$true] %s16_s18 }
   0x3   :  { %s6264_s19 = scalar_lea.vmem %s30_s16, 128  ;;  %p6269_p1 = scmp.lt.s32.totalorder %s30_s16, %s30_s16 }
   0x4   :  { %p6265_p0 = scmp.ne.s32.totalorder %s30_s16, %s6264_s19  ;;  %p6270_p2 = scmp.lt.s32.totalorder %s6264_s19, %s6264_s19 }
   0x6   :  { %p6271_p3 = por %p6270_p2, %p6269_p1 }
   0x8   :  { %p6272_p4 = pnand %p6271_p3, %p6265_p0 }
   0xa   :  { %6275 = shalt.err (!%p6272_p4)
}
   0xb   :  { %32 = dma.hbm_to_vmem [thread:$0]  %s8128_s1, 128, %s30_s16, [#allocation5]  }
   0xc   :  { %s6284_s22 = scalar_lea.vmem %s17_s18, 4096  ;;  %p6289_p6 = scmp.lt.s32.totalorder %s17_s18, %s17_s18 }
   0xd   :  { %p6285_p5 = scmp.ne.s32.totalorder %s17_s18, %s6284_s22  ;;  %p6290_p7 = scmp.lt.s32.totalorder %s6284_s22, %s6284_s22 }
   0xf   :  { %p6291_p8 = por %p6290_p7, %p6289_p6 }
  0x11   :  { %p6292_p9 = pnand %p6291_p8, %p6285_p5 }
  0x13   :  { %6295 = shalt.err (!%p6292_p9)
}
  0x14   :  { %s6322_s23 = smov 128   ;;  %s6323_s24 = smov 8  }
  0x15   :  { %22 = dma.hbm_to_vmem [thread:$0]  %s8127_s0, 4096, %s17_s18, [#allocation3], %s6322_s23, %s6322_s23, %s6323_s24  }
  0x16   :  { %s6324_s27 = smov [#allocation6]  }
  0x17   :  { %s38_s28 = sshll.u32 %s6324_s27, 4  ;;  %s39_s28 = int_to_ptr.vmem [resolvable:$true] %s38_s28 }
  0x18   :  { %s6304_s29 = scalar_lea.vmem %s39_s28, 256  ;;  %p6309_p11 = scmp.lt.s32.totalorder %s39_s28, %s39_s28 }
  0x19   :  { %p6305_p10 = scmp.ne.s32.totalorder %s39_s28, %s6304_s29  ;;  %p6310_p12 = scmp.lt.s32.totalorder %s6304_s29, %s6304_s29 }
  0x1b   :  { %p6311_p13 = por %p6310_p12, %p6309_p11 }
  0x1d   :  { %p6312_p0 = pnand %p6311_p13, %p6305_p10 }
  0x1f   :  { %6315 = shalt.err (!%p6312_p0)
}
  0x20   :  { %s6325_s1 = smov 64   ;;  %s6326_s30 = smov 4  }
  0x21   :  { %44 = dma.hbm_to_vmem [thread:$0]  %s8129_s2, 256, %s39_s28, [#allocation5], %s6325_s1, %s6325_s1, %s6326_s30  }
  0x22   :  { %6316 = dma.done.wait [#allocation3], 4096  }
  0x23   :  { %6317 = vsyncadd [#allocation3], 4294963200 }
  0x24   :  { %6318 = dma.done.wait [#allocation5], 384  }
  0x25   :  { %6319 = vsyncadd [#allocation5], 4294966912  ;;  %vm90_vm0 = vcmask 261120   ;;  %v198_v0 = vld [vmem:[#allocation6 + $0x8] sm:$0xf]  ;;  %v57_v5 = vld [vmem:[#allocation2] sm:$0xff] }
  0x26   :  { %v199_v1 = vld [vmem:[#allocation6 + $0xc] sm:$0xf]  ;;  %v196_v2 = vld [vmem:[#allocation6] sm:$0xf]  ;;  %v197_v4 = vld [vmem:[#allocation6 + $0x4] sm:$0xf] }
  0x27   :  { %v4966_v3 = vcombine.low %v198_v0, %v199_v1  ;;  %v58_v6 = vld [vmem:[#allocation2 + $0x8] sm:$0xff]  ;;  %v4965_v7 = vcombine.low %v196_v2, %v197_v4  ;;  %v59_v8 = vld [vmem:[#allocation2 + $0x10] sm:$0xff]  ;;  %v60_v9 = vld [vmem:[#allocation2 + $0x18] sm:$0xff]  ;;  %v91_v10 = vsel %vm90_vm0, %v57_v5, 0.0  ;;  %s6328_s7 = smov 96   ;;  %vm6329_vm1 = vmmov 0  }
  0x28   :  { %v92_v11 = vsel %vm90_vm0, %v58_v6, 0.0  ;;  %v94_v13 = vsel %vm90_vm0, %v59_v8, 0.0  ;;  %v61_v14 = vld [vmem:[#allocation2 + $0x20] sm:$0xff]  ;;  %v62_v15 = vld [vmem:[#allocation2 + $0x28] sm:$0xff]  ;;  %v63_v16 = vld [vmem:[#allocation2 + $0x30] sm:$0xff]  ;;  %v96_v17 = vsel %vm90_vm0, %v60_v9, 0.0 }
  0x29   :  { %5369 = vmatprep.subr.bf16.mxu0 %v4966_v3  ;;  %v93_v12 = vadd.f32 %v92_v11, %v91_v10  ;;  %v64_v18 = vld [vmem:[#allocation2 + $0x38] sm:$0xff]  ;;  %v98_v19 = vsel %vm90_vm0, %v61_v14, 0.0  ;;  %v65_v20 = vld [vmem:[#allocation2 + $0x40] sm:$0xff]  ;;  %v99_v23 = vsel %vm90_vm0, %v62_v15, 0.0  ;;  %v101_v24 = vsel %vm90_vm0, %v63_v16, 0.0  ;;  %v66_v25 = vld [vmem:[#allocation2 + $0x48] sm:$0xff] }
  0x2a   :  { %5370 = vmatpush3.bf16.msra.mxu0 %v4966_v3  ;;  %v6381_v21 = vld [vmem:[#allocation4] sm:$0xff]  ;;  %v100_v26 = vadd.f32 %v99_v23, %v98_v19  ;;  %v67_v27 = vld [vmem:[#allocation2 + $0x50] sm:$0xff]  ;;  %v103_v29 = vsel %vm90_vm0, %v64_v18, 0.0  ;;  %v105_v30 = vsel %vm90_vm0, %v65_v20, 0.0  ;;  %v106_v34 = vsel %vm90_vm0, %v66_v25, 0.0  ;;  %v68_v40 = vld [vmem:[#allocation2 + $0x58] sm:$0xff] }
  0x2b   :  { %5371 = vmatprep.subr.bf16.mxu0 %v4965_v7  ;;  %v95_v22 = vadd.f32 %v94_v13, %v93_v12  ;;  %v158_v31 = vadd.f32 %v6381_v21, %v58_v6  ;;  %v159_v32 = vadd.f32 %v6381_v21, %v59_v8  ;;  %v157_v36 = vadd.f32 %v6381_v21, %v57_v5  ;;  %v69_v41 = vld [vmem:[#allocation2 + $0x60] sm:$0xff]  ;;  %v70_v42 = vld [vmem:[#allocation2 + $0x68] sm:$0xff]  ;;  %v71_v53 = vld [vmem:[#allocation2 + $0x70] sm:$0xff]  ;;  %s6330_s8 = smov 88   ;;  %s6331_s9 = smov 120  }
  0x2c   :  { %v102_v33 = vadd.f32 %v101_v24, %v100_v26  ;;  %v107_v37 = vadd.f32 %v106_v34, %v105_v30  ;;  %v108_v38 = vsel %vm90_vm0, %v67_v27, 0.0  ;;  %v160_v44 = vadd.f32 %v6381_v21, %v60_v9  ;;  %v72_v62 = vld [vmem:[#allocation2 + $0x78] sm:$0xff]  ;;  %v73_v63 = vld [vmem:[#allocation2 + $0x80] sm:$0xff]  ;;  %v74_v0 = vld [vmem:[#allocation2 + $0x88] sm:$0xff]  ;;  %s6332_s10 = smov 56   ;;  %s6333_s11 = smov 32  }
  0x2d   :  { %v97_v28 = vadd.f32 %v96_v17, %v95_v22  ;;  %v202_v45 = vpack.c.bf16 %v159_v32, %v158_v31  ;;  %v110_v49 = vsel %vm90_vm0, %v68_v40, 0.0  ;;  %v112_v50 = vsel %vm90_vm0, %v69_v41, 0.0  ;;  %v75_v8 = vld [vmem:[#allocation2 + $0x90] sm:$0xff]  ;;  %v77_v17 = vld [vmem:[#allocation2 + $0xa0] sm:$0xff]  ;;  %s6334_s12 = smov 80   ;;  %s6335_s13 = smov 112  }
  0x2e   :  { %5372 = vmatpush3.bf16.msra.mxu0 %v4965_v7  ;;  %v104_v39 = vadd.f32 %v103_v29, %v102_v33  ;;  %v109_v47 = vadd.f32 %v108_v38, %v107_v37  ;;  %v113_v51 = vsel %vm90_vm0, %v70_v42, 0.0  ;;  %v162_v54 = vadd.f32 %v6381_v21, %v61_v14  ;;  %v79_v29 = vld [vmem:[#allocation2 + $0xb0] sm:$0xff]  ;;  %s6336_s14 = smov 48   ;;  %s6337_s15 = smov 72  }
  0x2f   :  { %v148_v35 = vmul.f32 0.25, %v97_v28  ;;  %v163_v56 = vadd.f32 %v6381_v21, %v62_v15  ;;  %v114_v58 = vadd.f32 %v113_v51, %v112_v50  ;;  %v164_v59 = vadd.f32 %v6381_v21, %v63_v16  ;;  %v76_v16 = vld [vmem:[#allocation2 + $0x98] sm:$0xff]  ;;  %s6338_s16 = smov 104   ;;  %s6339_s17 = smov 40  }
  0x30   :  { %v149_v46 = vmul.f32 0.25, %v104_v39  ;;  %v111_v57 = vadd.f32 %v110_v49, %v109_v47  ;;  %v165_v60 = vadd.f32 %v6381_v21, %v64_v18  ;;  %v115_v61 = vsel %vm90_vm0, %v71_v53, 0.0  ;;  %v78_v18 = vld [vmem:[#allocation2 + $0xa8] sm:$0xff] }
  0x31   :  { %v156_v43 = vadd.f32 %v148_v35, %v6381_v21  ;;  %v204_v1 = vpack.c.bf16 %v163_v56, %v162_v54  ;;  %v116_v3 = vadd.f32 %v115_v61, %v114_v58  ;;  %v117_v5 = vsel %vm90_vm0, %v72_v62, 0.0  ;;  %v80_v35 = vld [vmem:[#allocation2 + $0xb8] sm:$0xff]  ;;  %v82_v47 = vld [vmem:[#allocation2 + $0xc8] sm:$0xff]  ;;  %v83_v54 = vld [vmem:[#allocation2 + $0xd0] sm:$0xff] }
  0x32   :  { %v161_v52 = vadd.f32 %v149_v46, %v6381_v21  ;;  %v150_v2 = vmul.f32 0.25, %v111_v57  ;;  %v205_v4 = vpack.c.bf16 %v165_v60, %v164_v59  ;;  %v119_v6 = vsel %vm90_vm0, %v73_v63, 0.0  ;;  %v81_v46 = vld [vmem:[#allocation2 + $0xc0] sm:$0xff]  ;;  %v84_v60 = vld [vmem:[#allocation2 + $0xd8] sm:$0xff] }
  0x33   :  { %v201_v48 = vpack.c.bf16 %v157_v36, %v156_v43  ;;  %v120_v7 = vsel %vm90_vm0, %v74_v0, 0.0  ;;  %v167_v10 = vadd.f32 %v6381_v21, %v65_v20  ;;  %v118_v11 = vadd.f32 %v117_v5, %v116_v3  ;;  %v85_v61 = vld [vmem:[#allocation2 + $0xe0] sm:$0xff]  ;;  %v87_v5 = vld [vmem:[#allocation2 + $0xf0] sm:$0xff] }
  0x34   :  { %v203_v55 = vpack.c.bf16 %v161_v52, %v160_v44  ;;  %v166_v9 = vadd.f32 %v150_v2, %v6381_v21  ;;  %v168_v12 = vadd.f32 %v6381_v21, %v66_v25  ;;  %v169_v13 = vadd.f32 %v6381_v21, %v67_v27 }
  0x35   :  { %5373 = vmatprep.mubr.msk.bf16.mxu0 %vm90_vm0, %v201_v48  ;;  %v121_v14 = vadd.f32 %v120_v7, %v119_v6  ;;  %v122_v15 = vsel %vm90_vm0, %v75_v8, 0.0  ;;  %v151_v22 = vmul.f32 0.25, %v118_v11  ;;  %v124_v26 = vsel %vm90_vm0, %v76_v16, 0.0 }
  0x36   :  { %5374 = vmatmul.mubr.msk.bf16.vlgmr.msra.gmra.mxu0 %vm90_vm0, %v202_v45  ;;  %v206_v19 = vpack.c.bf16 %v167_v10, %v166_v9  ;;  %v207_v23 = vpack.c.bf16 %v169_v13, %v168_v12  ;;  %v126_v20 = vsel %vm90_vm0, %v77_v17, 0.0  ;;  %v127_v28 = vsel %vm90_vm0, %v78_v18, 0.0  ;;  %v88_v13 = vld [vmem:[#allocation2 + $0xf8] sm:$0xff] }
  0x37   :  { %5377 = vmatprep.mubr.msk.bf16.mxu0 %vm90_vm0, %v203_v55  ;;  %v123_v24 = vadd.f32 %v122_v15, %v121_v14  ;;  %v170_v25 = vadd.f32 %v6381_v21, %v68_v40  ;;  %v171_v27 = vadd.f32 %v151_v22, %v6381_v21  ;;  %v172_v30 = vadd.f32 %v6381_v21, %v69_v41 }
  0x38   :  { %v173_v31 = vadd.f32 %v6381_v21, %v70_v42  ;;  %v128_v33 = vadd.f32 %v127_v28, %v126_v20  ;;  %v129_v34 = vsel %vm90_vm0, %v79_v29, 0.0  ;;  %v131_v43 = vsel %vm90_vm0, %v80_v35, 0.0 }
  0x39   :  { %v125_v32 = vadd.f32 %v124_v26, %v123_v24  ;;  %v208_v36 = vpack.c.bf16 %v171_v27, %v170_v25  ;;  %v174_v40 = vadd.f32 %v6381_v21, %v71_v53  ;;  %v175_v44 = vadd.f32 %v6381_v21, %v72_v62  ;;  %v86_v62 = vld [vmem:[#allocation2 + $0xe8] sm:$0xff] }
  0x3a   :  { %v209_v37 = vpack.c.bf16 %v173_v31, %v172_v30  ;;  %v130_v39 = vadd.f32 %v129_v34, %v128_v33  ;;  %v177_v42 = vadd.f32 %v6381_v21, %v73_v63  ;;  %v133_v51 = vsel %vm90_vm0, %v81_v46, 0.0 }
  0x3b   :  { %v152_v38 = vmul.f32 0.25, %v125_v32  ;;  %v210_v48 = vpack.c.bf16 %v175_v44, %v174_v40  ;;  %v134_v52 = vsel %vm90_vm0, %v82_v47, 0.0  ;;  %v178_v53 = vadd.f32 %v6381_v21, %v74_v0  ;;  %v6475_v40 = vld [vmem:[%s8130_s3] ss:$0 sm:$0xff] }
  0x3c   :  { %v132_v45 = vadd.f32 %v131_v43, %v130_v39  ;;  %v179_v55 = vadd.f32 %v6381_v21, %v75_v8  ;;  %v135_v56 = vadd.f32 %v134_v52, %v133_v51  ;;  %v180_v57 = vadd.f32 %v6381_v21, %v76_v16 }
  0x3d   :  { %v176_v41 = vadd.f32 %v152_v38, %v6381_v21  ;;  %v136_v59 = vsel %vm90_vm0, %v83_v54, 0.0  ;;  %v138_v3 = vsel %vm90_vm0, %v84_v60, 0.0  ;;  %v140_v0 = vsel %vm90_vm0, %v85_v61, 0.0 }
  0x3e   :  { %5378 = vmatmul.mubr.msk.bf16.gmra.mxu0 %vm90_vm0, %v204_v1  ;;  %v153_v50 = vmul.f32 0.25, %v132_v45  ;;  %v212_v63 = vpack.c.bf16 %v179_v55, %v178_v53  ;;  %v137_v1 = vadd.f32 %v136_v59, %v135_v56  ;;  %v182_v6 = vadd.f32 %v6381_v21, %v77_v17 }
  0x3f   :  { %5381 = vmatprep.mubr.msk.bf16.mxu0 %vm90_vm0, %v205_v4  ;;  %v211_v49 = vpack.c.bf16 %v177_v42, %v176_v41  ;;  %v141_v4 = vsel %vm90_vm0, %v86_v62, 0.0  ;;  %v183_v7 = vadd.f32 %v6381_v21, %v78_v18  ;;  %v184_v10 = vadd.f32 %v6381_v21, %v79_v29 }
  0x40   :  { %v181_v58 = vadd.f32 %v153_v50, %v6381_v21  ;;  %v139_v8 = vadd.f32 %v138_v3, %v137_v1  ;;  %v142_v9 = vadd.f32 %v141_v4, %v140_v0  ;;  %v185_v11 = vadd.f32 %v6381_v21, %v80_v35 }
  0x41   :  { %v143_v12 = vsel %vm90_vm0, %v87_v5, 0.0  ;;  %v214_v14 = vpack.c.bf16 %v183_v7, %v182_v6  ;;  %v145_v22 = vsel %vm90_vm0, %v88_v13, 0.0  ;;  %v187_v18 = vadd.f32 %v6381_v21, %v81_v46 }
  0x42   :  { %v213_v2 = vpack.c.bf16 %v181_v58, %v180_v57  ;;  %v154_v15 = vmul.f32 0.25, %v139_v8  ;;  %v144_v16 = vadd.f32 %v143_v12, %v142_v9  ;;  %v188_v24 = vadd.f32 %v6381_v21, %v82_v47 }
  0x43   :  { %v189_v26 = vadd.f32 %v6381_v21, %v83_v54  ;;  %v190_v25 = vadd.f32 %v6381_v21, %v84_v60  ;;  %v192_v30 = vadd.f32 %v6381_v21, %v85_v61  ;;  %v193_v31 = vadd.f32 %v6381_v21, %v86_v62 }
  0x44   :  { %v186_v17 = vadd.f32 %v154_v15, %v6381_v21  ;;  %v194_v34 = vadd.f32 %v6381_v21, %v87_v5  ;;  %v195_v35 = vadd.f32 %v6381_v21, %v88_v13  ;;  %v8132_v39 = vmov 0.0  }
  0x45   :  { %v217_v29 = vpack.c.bf16 %v189_v26, %v188_v24  ;;  %v219_v33 = vpack.c.bf16 %v193_v31, %v192_v30  ;;  %5413 = vmatprep.subr.bf16.mxu1 %v8132_v39  ;;  %5443 = vmatprep.subr.bf16.mxu0 %v8132_v39  ;;  %vm533_vm2 = vcmask 64512   ;;  %vm1105_vm3 = vcmask 1043456  }
  0x46   :  { %5382 = vmatmul.mubr.msk.bf16.gmra.mxu0 %vm90_vm0, %v206_v19  ;;  %v215_v19 = vpack.c.bf16 %v185_v11, %v184_v10  ;;  %v216_v20 = vpack.c.bf16 %v187_v18, %v186_v17  ;;  %5419 = vmatprep.mubr.msk.bf16.mxu1 %vm6329_vm1, %v8132_v39  ;;  %vm1013_vm4 = vcmask 326656  }
  0x47   :  { %5385 = vmatprep.mubr.msk.bf16.mxu0 %vm90_vm0, %v207_v23  ;;  %v146_v23 = vadd.f32 %v145_v22, %v144_v16 }
  0x49   :  { %v155_v28 = vmul.f32 0.25, %v146_v23 }
  0x4b   :  { %v191_v27 = vadd.f32 %v155_v28, %v6381_v21 }
  0x4d   :  { %v218_v32 = vpack.c.bf16 %v191_v27, %v190_v25 }
  0x4e   :  { %5386 = vmatmul.mubr.msk.bf16.gmra.mxu0 %vm90_vm0, %v208_v36  ;;  %v220_v36 = vpack.c.bf16 %v195_v35, %v194_v34 }
  0x4f   :  { %5389 = vmatprep.mubr.msk.bf16.mxu0 %vm90_vm0, %v209_v37 }
  0x56   :  { %5390 = vmatmul.mubr.msk.bf16.gmra.mxu0 %vm90_vm0, %v210_v48 }
  0x57   :  { %5393 = vmatprep.mubr.msk.bf16.mxu0 %vm90_vm0, %v211_v49 }
  0x5e   :  { %5394 = vmatmul.mubr.msk.bf16.gmra.mxu0 %vm90_vm0, %v212_v63 }
  0x5f   :  { %5397 = vmatprep.mubr.msk.bf16.mxu0 %vm90_vm0, %v213_v2 }
  0x66   :  { %5398 = vmatmul.mubr.msk.bf16.gmra.mxu0 %vm90_vm0, %v214_v14 }
  0x67   :  { %5401 = vmatprep.mubr.msk.bf16.mxu0 %vm90_vm0, %v215_v19 }
  0x6e   :  { %5402 = vmatmul.mubr.msk.bf16.gmra.mxu0 %vm90_vm0, %v216_v20 }
  0x6f   :  { %5405 = vmatprep.mubr.msk.bf16.mxu0 %vm90_vm0, %v217_v29 }
  0x76   :  { %5406 = vmatmul.mubr.msk.bf16.gmra.mxu0 %vm90_vm0, %v218_v32 }
  0x77   :  { %5409 = vmatprep.mubr.msk.bf16.mxu0 %vm90_vm0, %v219_v33 }
  0x7e   :  { %5410 = vmatmul.mubr.msk.bf16.gmra.mxu0 %vm90_vm0, %v220_v36 }
  0x7f   :  { %5449 = vmatprep.mubr.msk.bf16.mxu0 %vm6329_vm1, %v8132_v39 }
  0xf6   :  { %v5375_v37 = vpop.f32.mrf.mxu0 }
  0xf7   :  { %v342_v52 = vadd.f32 %v5375_v37, %v6475_v40 }
  0xf8   :  { %v333_v38 = vpop.f32.mrf.mxu0 }
  0xf9   :  { %v6478_v21 = vadd.f32 %v6475_v40, %v333_v38 }
  0xfa   :  { %v5376_v43 = vpop.f32.mrf.mxu0 }
  0xfb   :  { %v345_v49 = vadd.f32 %v5376_v43, %v6475_v40 }
  0xfc   :  { %v336_v44 = vpop.f32.mrf.mxu0 }
  0xfd   :  { %v337_v41 = vadd.f32 %v6475_v40, %v336_v44  ;;  %v6493_v53 = vpack.c.bf16 %v345_v49, %v342_v52 }
  0xfe   :  { %v5379_v42 = vpop.f32.mrf.mxu0 }
  0xff   :  { %v6482_v45 = vpack.c.bf16 %v337_v41, %v6478_v21  ;;  %v358_v0 = vadd.f32 %v5379_v42, %v6475_v40 }
 0x100   :  { %v349_v46 = vpop.f32.mrf.mxu0 }
 0x101   :  { %v350_v47 = vadd.f32 %v6475_v40, %v349_v46  ;;  %527 = vrot.lane.b32.xlu1 %v6482_v45, %s6328_s7 }
 0x102   :  { %v5380_v48 = vpop.f32.mrf.mxu0 }
 0x103   :  { %v6488_v50 = vpack.c.bf16 %v350_v47, %v350_v47  ;;  %v361_v56 = vadd.f32 %v5380_v48, %v6475_v40 }
 0x104   :  { %v352_v51 = vpop.f32.mrf.mxu0 }
 0x105   :  { %531 = vrot.lane.b32.xlu0 %v6488_v50, %s6328_s7  ;;  %v6509_v63 = vadd.f32 %v6475_v40, %v352_v51 }
 0x106   :  { %v5383_v54 = vpop.f32.mrf.mxu0 }
 0x107   :  { %v6520_v6 = vpack.c.bf16 %v358_v0, %v6509_v63  ;;  %v6532_v14 = vadd.f32 %v5383_v54, %v6475_v40 }
 0x108   :  { %v365_v55 = vpop.f32.mrf.mxu0 }
 0x109   :  { %v366_v57 = vadd.f32 %v6475_v40, %v365_v55  ;;  %529 = vrot.lane.b32.xlu0 %v6493_v53, %s6328_s7 }
 0x10a   :  { %v5384_v58 = vpop.f32.mrf.mxu0 }
 0x10b   :  { %v6499_v59 = vpack.c.bf16 %v366_v57, %v361_v56  ;;  %v377_v11 = vadd.f32 %v5384_v58, %v6475_v40 }
 0x10c   :  { %v368_v60 = vpop.f32.mrf.mxu0 }
 0x10d   :  { %v369_v61 = vadd.f32 %v6475_v40, %v368_v60  ;;  %591 = vrot.lane.b32.xlu0 %v6499_v59, %s6328_s7  ;;  %v6537_v16 = vpack.c.bf16 %v377_v11, %v6532_v14 }
 0x10e   :  { %v5387_v62 = vpop.f32.mrf.mxu0 }
 0x10f   :  { %v6511_v1 = vpack.c.bf16 %v369_v61, %v369_v61  ;;  %v390_v2 = vadd.f32 %v5387_v62, %v6475_v40 }
 0x110   :  { %v381_v3 = vpop.f32.mrf.mxu0 }
 0x111   :  { %v6515_v4 = vpack.c.bf16 %v390_v2, %v390_v2  ;;  %593 = vrot.lane.b32.xlu1 %v6511_v1, %s6328_s7  ;;  %v382_v8 = vadd.f32 %v6475_v40, %v381_v3 }
 0x112   :  { %v5388_v5 = vpop.f32.mrf.mxu0 }
 0x113   :  { %654 = vrot.lane.b32.xlu0 %v6515_v4, %s6328_s7  ;;  %v6552_v25 = vadd.f32 %v5388_v5, %v6475_v40 }
 0x114   :  { %v384_v7 = vpop.f32.mrf.mxu0 }
 0x115   :  { %v385_v9 = vadd.f32 %v6475_v40, %v384_v7  ;;  %589 = vrot.lane.b32.xlu1 %v6520_v6, %s6328_s7 }
 0x116   :  { %v5391_v10 = vpop.f32.mrf.mxu0 }
 0x117   :  { %v6529_v12 = vpack.c.bf16 %v385_v9, %v382_v8  ;;  %v406_v24 = vadd.f32 %v5391_v10, %v6475_v40 }
 0x118   :  { %v397_v13 = vpop.f32.mrf.mxu0 }
 0x119   :  { %652 = vrot.lane.b32.xlu0 %v6529_v12, %s6328_s7  ;;  %v398_v20 = vadd.f32 %v6475_v40, %v397_v13 }
 0x11a   :  { %v5392_v15 = vpop.f32.mrf.mxu0 }
 0x11b   :  { %v409_v19 = vadd.f32 %v5392_v15, %v6475_v40  ;;  %v6557_v30 = vpack.c.bf16 %v398_v20, %v6552_v25 }
 0x11c   :  { %v400_v22 = vpop.f32.mrf.mxu0 }
 0x11d   :  { %v6540_v17 = vpack.c.bf16 %v409_v19, %v409_v19  ;;  %v401_v18 = vadd.f32 %v6475_v40, %v400_v22  ;;  %650 = vrot.lane.b32.xlu0 %v6537_v16, %s6328_s7 }
 0x11e   :  { %v5395_v23 = vpop.f32.mrf.mxu0 }
 0x11f   :  { %715 = vrot.lane.b32.xlu1 %v6540_v17, %s6328_s7  ;;  %v6549_v28 = vpack.c.bf16 %v406_v24, %v401_v18  ;;  %v422_v38 = vadd.f32 %v5395_v23, %v6475_v40 }
 0x120   :  { %v413_v26 = vpop.f32.mrf.mxu0 }
 0x121   :  { %v6572_v46 = vadd.f32 %v6475_v40, %v413_v26 }
 0x122   :  { %v5396_v29 = vpop.f32.mrf.mxu0 }
 0x123   :  { %713 = vrot.lane.b32.xlu1 %v6549_v28, %s6328_s7  ;;  %v425_v35 = vadd.f32 %v5396_v29, %v6475_v40 }
 0x124   :  { %v416_v27 = vpop.f32.mrf.mxu0 }
 0x125   :  { %v6568_v44 = vpack.c.bf16 %v425_v35, %v422_v38  ;;  %v417_v41 = vadd.f32 %v6475_v40, %v416_v27 }
 0x126   :  { %v5399_v31 = vpop.f32.mrf.mxu0 }
 0x127   :  { %711 = vrot.lane.b32.xlu1 %v6557_v30, %s6328_s7  ;;  %8154 = vst [vmem:[#allocation9_spill] sm:$0xff] %v6568_v44  ;;  %v6577_v48 = vpack.c.bf16 %v417_v41, %v6572_v46  ;;  %v438_v5 = vadd.f32 %v5399_v31, %v6475_v40 }
 0x128   :  { %v429_v32 = vpop.f32.mrf.mxu0 }
 0x129   :  { %v430_v33 = vadd.f32 %v6475_v40, %v429_v32  ;;  %8155 = vst [vmem:[#allocation10_spill] sm:$0xff] %v6577_v48 }
 0x12a   :  { %v5400_v34 = vpop.f32.mrf.mxu0 }
 0x12b   :  { %v6563_v36 = vpack.c.bf16 %v430_v33, %v430_v33  ;;  %v441_v58 = vadd.f32 %v5400_v34, %v6475_v40 }
 0x12c   :  { %v432_v37 = vpop.f32.mrf.mxu0 }
 0x12d   :  { %776 = vrot.lane.b32.xlu0 %v6563_v36, %s6328_s7  ;;  %v6592_v62 = vadd.f32 %v6475_v40, %v432_v37 }
 0x12e   :  { %v5403_v43 = vpop.f32.mrf.mxu0 }
 0x12f   :  { %v6604_v9 = vpack.c.bf16 %v438_v5, %v6592_v62  ;;  %v6610_v15 = vadd.f32 %v5403_v43, %v6475_v40 }
 0x130   :  { %v445_v42 = vpop.f32.mrf.mxu0 }
 0x131   :  { %774 = vrot.lane.b32.xlu0 %v6568_v44, %s6328_s7  ;;  %v446_v54 = vadd.f32 %v6475_v40, %v445_v42 }
 0x132   :  { %v5404_v47 = vpop.f32.mrf.mxu0 }
 0x133   :  { %v6594_v2 = vpack.c.bf16 %v446_v54, %v441_v58  ;;  %v457_v10 = vadd.f32 %v5404_v47, %v6475_v40  ;;  %v6693_v47 = vpack.c.bf16 %v6478_v21, %v6478_v21 }
 0x134   :  { %v448_v49 = vpop.f32.mrf.mxu0 }
 0x135   :  { %v449_v51 = vadd.f32 %v6475_v40, %v448_v49  ;;  %772 = vrot.lane.b32.xlu0 %v6577_v48, %s6328_s7  ;;  %v6617_v22 = vpack.c.bf16 %v457_v10, %v6610_v15  ;;  %v6713_v10 = vpack.c.bf16 %v6509_v63, %v6509_v63 }
 0x136   :  { %v5407_v52 = vpop.f32.mrf.mxu0 }
 0x137   :  { %v6583_v55 = vpack.c.bf16 %v449_v51, %v449_v51  ;;  %v470_v56 = vadd.f32 %v5407_v52, %v6475_v40  ;;  %8158 = vst [vmem:[#allocation13_spill] sm:$0xff] %v6617_v22 }
 0x138   :  { %v461_v57 = vpop.f32.mrf.mxu0 }
 0x139   :  { %v6587_v60 = vpack.c.bf16 %v470_v56, %v470_v56  ;;  %837 = vrot.lane.b32.xlu1 %v6583_v55, %s6328_s7  ;;  %v462_v3 = vadd.f32 %v6475_v40, %v461_v57 }
 0x13a   :  { %v5408_v61 = vpop.f32.mrf.mxu0 }
 0x13b   :  { %8156 = vst [vmem:[#allocation11_spill] sm:$0xff] %v6587_v60  ;;  %898 = vrot.lane.b32.xlu0 %v6587_v60, %s6328_s7  ;;  %v6627_v29 = vadd.f32 %v5408_v61, %v6475_v40 }
 0x13c   :  { %v464_v0 = vpop.f32.mrf.mxu0 }
 0x13d   :  { %v465_v7 = vadd.f32 %v6475_v40, %v464_v0  ;;  %835 = vrot.lane.b32.xlu1 %v6594_v2, %s6328_s7 }
 0x13e   :  { %v5411_v8 = vpop.f32.mrf.mxu0 }
 0x13f   :  { %v6607_v11 = vpack.c.bf16 %v465_v7, %v462_v3  ;;  %v486_v18 = vadd.f32 %v5411_v8, %v6475_v40 }
 0x140   :  { %v477_v13 = vpop.f32.mrf.mxu0 }
 0x141   :  { %8157 = vst [vmem:[#allocation12_spill] sm:$0xff] %v6607_v11  ;;  %896 = vrot.lane.b32.xlu0 %v6607_v11, %s6328_s7  ;;  %833 = vrot.lane.b32.xlu1 %v6604_v9, %s6328_s7  ;;  %v478_v27 = vadd.f32 %v6475_v40, %v477_v13  ;;  %v6717_v13 = vpack.c.bf16 %v6552_v25, %v6552_v25 }
 0x142   :  { %v5412_v19 = vpop.f32.mrf.mxu0 }
 0x143   :  { %v489_v23 = vadd.f32 %v5412_v19, %v6475_v40  ;;  %v6637_v32 = vpack.c.bf16 %v478_v27, %v6627_v29 }
 0x144   :  { %v480_v24 = vpop.f32.mrf.mxu0 }
 0x145   :  { %v6621_v26 = vpack.c.bf16 %v489_v23, %v489_v23  ;;  %894 = vrot.lane.b32.xlu0 %v6617_v22, %s6328_s7  ;;  %v481_v20 = vadd.f32 %v6475_v40, %v480_v24  ;;  %8160 = vst [vmem:[#allocation15_spill] sm:$0xff] %v6637_v32 }
 0x147   :  { %v6630_v31 = vpack.c.bf16 %v486_v18, %v481_v20  ;;  %959 = vrot.lane.b32.xlu1 %v6621_v26, %s6328_s7 }
 0x149   :  { %8159 = vst [vmem:[#allocation14_spill] sm:$0xff] %v6630_v31  ;;  %1098 = vrot.lane.b32.xlu0 %v6488_v50, %s6325_s1 }
 0x14b   :  { %957 = vrot.lane.b32.xlu1 %v6630_v31, %s6328_s7 }
 0x14d   :  { %1094 = vrot.lane.b32.xlu0 %v6482_v45, %s6325_s1 }
 0x14f   :  { %955 = vrot.lane.b32.xlu1 %v6637_v32, %s6328_s7 }
 0x151   :  { %1153 = vrot.lane.b32.xlu0 %v6511_v1, %s6325_s1 }
 0x153   :  { %1096 = vrot.lane.b32.xlu1 %v6493_v53, %s6325_s1 }
 0x155   :  { %1151 = vrot.lane.b32.xlu0 %v6499_v59, %s6325_s1 }
 0x157   :  { %1149 = vrot.lane.b32.xlu1 %v6520_v6, %s6325_s1 }
 0x159   :  { %1207 = vrot.lane.b32.xlu0 %v6515_v4, %s6325_s1 }
 0x15b   :  { %1261 = vrot.lane.b32.xlu1 %v6540_v17, %s6325_s1 }
 0x15d   :  { %1205 = vrot.lane.b32.xlu0 %v6529_v12, %s6325_s1 }
 0x15f   :  { %1259 = vrot.lane.b32.xlu1 %v6549_v28, %s6325_s1 }
 0x161   :  { %1203 = vrot.lane.b32.xlu0 %v6537_v16, %s6325_s1 }
 0x163   :  { %1257 = vrot.lane.b32.xlu1 %v6557_v30, %s6325_s1 }
 0x165   :  { %1315 = vrot.lane.b32.xlu0 %v6563_v36, %s6325_s1 }
 0x167   :  { %1369 = vrot.lane.b32.xlu1 %v6583_v55, %s6325_s1 }
 0x169   :  { %1313 = vrot.lane.b32.xlu0 %v6568_v44, %s6325_s1 }
 0x16b   :  { %1367 = vrot.lane.b32.xlu1 %v6594_v2, %s6325_s1 }
 0x16d   :  { %1311 = vrot.lane.b32.xlu0 %v6577_v48, %s6325_s1 }
 0x16f   :  { %1365 = vrot.lane.b32.xlu1 %v6604_v9, %s6325_s1 }
 0x171   :  { %1423 = vrot.lane.b32.xlu0 %v6587_v60, %s6325_s1 }
 0x173   :  { %1477 = vrot.lane.b32.xlu1 %v6621_v26, %s6325_s1  ;;  %v528_v37 = vpop.permute.xlu1 %527 }
 0x174   :  { %v538_v43 = vsel %vm533_vm2, %v528_v37, 0 }
 0x175   :  { %1421 = vrot.lane.b32.xlu0 %v6607_v11, %s6325_s1 }
 0x177   :  { %v532_v40 = vpop.permute.xlu0 %531  ;;  %1475 = vrot.lane.b32.xlu1 %v6630_v31, %s6325_s1 }
 0x178   :  { %v544_v33 = vsel %vm533_vm2, %v532_v40, 0 }
 0x179   :  { %5414 = vmatpush3.bf16.xpose.msra.mxu1 %v544_v33 }
 0x17a   :  { %5415 = vmatprep.subr.bf16.mxu1 %v8132_v39 }
 0x17b   :  { %v530_v34 = vpop.permute.xlu0 %529 }
 0x17c   :  { %v541_v35 = vsel %vm533_vm2, %v530_v34, 0 }
 0x17f   :  { %v592_v41 = vpop.permute.xlu0 %591 }
 0x180   :  { %v602_v57 = vsel %vm533_vm2, %v592_v41, 0 }
 0x181   :  { %5416 = vmatpush3.bf16.xpose.msra.mxu1 %v541_v35 }
 0x182   :  { %5417 = vmatprep.subr.bf16.mxu1 %v8132_v39 }
 0x183   :  { %v594_v38 = vpop.permute.xlu1 %593 }
 0x184   :  { %v605_v49 = vsel %vm533_vm2, %v594_v38, 0  ;;  %v6740_v38 = vpack.c.bf16 %v6532_v14, %v6532_v14 }
 0x185   :  { %v655_v51 = vpop.permute.xlu0 %654 }
 0x186   :  { %v666_v19 = vsel %vm533_vm2, %v655_v51, 0 }
 0x187   :  { %v590_v42 = vpop.permute.xlu1 %589 }
 0x188   :  { %v599_v5 = vsel %vm533_vm2, %v590_v42, 0 }
 0x189   :  { %5418 = vmatpush3.bf16.xpose.msra.mxu1 %v538_v43 }
 0x18a   :  { %5423 = vmatprep.subr.bf16.mxu1 %v8132_v39 }
 0x18b   :  { %v653_v21 = vpop.permute.xlu0 %652 }
 0x18c   :  { %v663_v24 = vsel %vm533_vm2, %v653_v21, 0 }
 0x18f   :  { %v651_v61 = vpop.permute.xlu0 %650 }
 0x190   :  { %5420 = vmatmul.mubr.msk.bf16.vlgmr.msra.gmra.mxu1 %vm533_vm2, %v6693_v47  ;;  %v660_v33 = vsel %vm533_vm2, %v651_v61, 0 }
 0x191   :  { %v716_v52 = vpop.permute.xlu1 %715  ;;  %5424 = vmatpush3.bf16.xpose.msra.mxu1 %v605_v49  ;;  %5429 = vmatprep.mubr.msk.bf16.mxu1 %vm6329_vm1, %v8132_v39  ;;  %v6750_v49 = vpack.c.bf16 %v6592_v62, %v6592_v62 }
 0x192   :  { %v727_v54 = vsel %vm533_vm2, %v716_v52, 0  ;;  %5425 = vmatprep.subr.bf16.mxu1 %v8132_v39 }
 0x193   :  { %5444 = vmatpush3.bf16.xpose.msra.mxu0 %v727_v54 }
 0x194   :  { %5445 = vmatprep.subr.bf16.mxu0 %v8132_v39 }
 0x195   :  { %v714_v56 = vpop.permute.xlu1 %713 }
 0x196   :  { %v724_v58 = vsel %vm533_vm2, %v714_v56, 0 }
 0x199   :  { %5426 = vmatpush3.bf16.xpose.msra.mxu1 %v602_v57  ;;  %v712_v3 = vpop.permute.xlu1 %711 }
 0x19a   :  { %5427 = vmatprep.subr.bf16.mxu1 %v8132_v39  ;;  %v721_v7 = vsel %vm533_vm2, %v712_v3, 0  ;;  %v6772_v3 = vpack.c.bf16 %v6572_v46, %v6572_v46 }
 0x19b   :  { %5446 = vmatpush3.bf16.xpose.msra.mxu0 %v724_v58 }
 0x19c   :  { %5447 = vmatprep.subr.bf16.mxu0 %v8132_v39  ;;  %8161 = vst [vmem:[#allocation16_spill] sm:$0xff] %v6772_v3 }
 0x19f   :  { %v777_v0 = vpop.permute.xlu0 %776 }
 0x1a0   :  { %v788_v43 = vsel %vm533_vm2, %v777_v0, 0 }
 0x1a1   :  { %5428 = vmatpush3.bf16.xpose.msra.mxu1 %v599_v5 }
 0x1a2   :  { %5433 = vmatprep.subr.bf16.mxu1 %v8132_v39 }
 0x1a3   :  { %5448 = vmatpush3.bf16.xpose.msra.mxu0 %v721_v7  ;;  %v775_v8 = vpop.permute.xlu0 %774  ;;  %v6782_v7 = vpack.c.bf16 %v6627_v29, %v6627_v29 }
 0x1a4   :  { %5463 = vmatprep.subr.bf16.mxu0 %v8132_v39  ;;  %v785_v52 = vsel %vm533_vm2, %v775_v8, 0 }
 0x1a5   :  { %8162 = vst [vmem:[#allocation17_spill] sm:$0xff] %v6782_v7 }
 0x1a7   :  { %v773_v18 = vpop.permute.xlu0 %772 }
 0x1a8   :  { %5430 = vmatmul.mubr.msk.bf16.vlgmr.msra.gmra.mxu1 %vm533_vm2, %v6713_v10  ;;  %v782_v56 = vsel %vm533_vm2, %v773_v18, 0 }
 0x1a9   :  { %5434 = vmatpush3.bf16.xpose.msra.mxu1 %v666_v19  ;;  %5439 = vmatprep.mubr.msk.bf16.mxu1 %vm6329_vm1, %v8132_v39 }
 0x1aa   :  { %5450 = vmatmul.mubr.msk.bf16.vlgmr.msra.gmra.mxu0 %vm533_vm2, %v6717_v13  ;;  %5435 = vmatprep.subr.bf16.mxu1 %v8132_v39 }
 0x1ab   :  { %v838_v63 = vpop.permute.xlu1 %837  ;;  %5469 = vmatprep.mubr.msk.bf16.mxu0 %vm6329_vm1, %v8132_v39 }
 0x1ac   :  { %v849_v25 = vsel %vm533_vm2, %v838_v63, 0  ;;  %v6799_v63 = vpack.c.bf16 %v6610_v15, %v6610_v15 }
 0x1ad   :  { %5464 = vmatpush3.bf16.xpose.msra.mxu0 %v849_v25  ;;  %v899_v23 = vpop.permute.xlu0 %898 }
 0x1ae   :  { %5465 = vmatprep.subr.bf16.mxu0 %v8132_v39  ;;  %v910_v0 = vsel %vm533_vm2, %v899_v23, 0  ;;  %8163 = vst [vmem:[#allocation18_spill] sm:$0xff] %v6799_v63 }
 0x1af   :  { %v836_v20 = vpop.permute.xlu1 %835 }
 0x1b0   :  { %v846_v27 = vsel %vm533_vm2, %v836_v20, 0 }
 0x1b1   :  { %5436 = vmatpush3.bf16.xpose.msra.mxu1 %v663_v24 }
 0x1b2   :  { %5437 = vmatprep.subr.bf16.mxu1 %v8132_v39 }
 0x1b3   :  { %v897_v40 = vpop.permute.xlu0 %896  ;;  %v834_v34 = vpop.permute.xlu1 %833 }
 0x1b4   :  { %v843_v37 = vsel %vm533_vm2, %v834_v34, 0  ;;  %v907_v19 = vsel %vm533_vm2, %v897_v40, 0 }
 0x1b5   :  { %5466 = vmatpush3.bf16.xpose.msra.mxu0 %v846_v27 }
 0x1b6   :  { %5467 = vmatprep.subr.bf16.mxu0 %v8132_v39 }
 0x1b7   :  { %v895_v35 = vpop.permute.xlu0 %894 }
 0x1b8   :  { %v904_v18 = vsel %vm533_vm2, %v895_v35, 0 }
 0x1b9   :  { %5438 = vmatpush3.bf16.xpose.msra.mxu1 %v660_v33  ;;  %v960_v42 = vpop.permute.xlu1 %959 }
 0x1ba   :  { %5453 = vmatprep.subr.bf16.mxu1 %v8132_v39  ;;  %v971_v14 = vsel %vm533_vm2, %v960_v42, 0 }
 0x1bb   :  { %v1099_v41 = vpop.permute.xlu0 %1098 }
 0x1bc   :  { %v1107_v25 = vsel %vm1105_vm3, %v1099_v41, 0 }
 0x1bd   :  { %5468 = vmatpush3.bf16.xpose.msra.mxu0 %v843_v37  ;;  %v958_v54 = vpop.permute.xlu1 %957 }
 0x1be   :  { %5483 = vmatprep.subr.bf16.mxu0 %v8132_v39  ;;  %v968_v62 = vsel %vm533_vm2, %v958_v54, 0 }
 0x1bf   :  { %v1095_v51 = vpop.permute.xlu0 %1094 }
 0x1c0   :  { %5440 = vmatmul.mubr.msk.bf16.vlgmr.msra.gmra.mxu1 %vm533_vm2, %v6740_v38 }
 0x1c1   :  { %5454 = vmatpush3.bf16.xpose.msra.mxu1 %v788_v43  ;;  %5459 = vmatprep.mubr.msk.bf16.mxu1 %vm6329_vm1, %v8132_v39  ;;  %v956_v57 = vpop.permute.xlu1 %955 }
 0x1c2   :  { %5455 = vmatprep.subr.bf16.mxu1 %v8132_v39  ;;  %v965_v58 = vsel %vm533_vm2, %v956_v57, 0 }
 0x1c3   :  { %v6762_v21 = vpop.permute.xlu0 %1153 }
 0x1c4   :  { %5470 = vmatmul.mubr.msk.bf16.vlgmr.msra.gmra.mxu0 %vm533_vm2, %v6750_v49 }
 0x1c5   :  { %5484 = vmatpush3.bf16.xpose.msra.mxu0 %v971_v14  ;;  %5489 = vmatprep.mubr.msk.bf16.mxu0 %vm6329_vm1, %v8132_v39  ;;  %v1097_v23 = vpop.permute.xlu1 %1096 }
 0x1c6   :  { %5485 = vmatprep.subr.bf16.mxu0 %v8132_v39 }
 0x1c7   :  { %v6767_v61 = vpop.permute.xlu0 %1151 }
 0x1c9   :  { %5456 = vmatpush3.bf16.xpose.msra.mxu1 %v785_v52 }
 0x1ca   :  { %5457 = vmatprep.subr.bf16.mxu1 %v8132_v39 }
 0x1cb   :  { %v1208_v5 = vpop.permute.xlu0 %1207 }
 0x1cc   :  { %v1215_v46 = vsel %vm1105_vm3, %v1208_v5, 0 }
 0x1cd   :  { %5486 = vmatpush3.bf16.xpose.msra.mxu0 %v968_v62 }
 0x1ce   :  { %5487 = vmatprep.subr.bf16.mxu0 %v8132_v39 }
 0x1cf   :  { %v1206_v8 = vpop.permute.xlu0 %1205 }
 0x1d1   :  { %5458 = vmatpush3.bf16.xpose.msra.mxu1 %v782_v56 }
 0x1d2   :  { %5473 = vmatprep.subr.bf16.mxu1 %v8132_v39 }
 0x1d3   :  { %v1204_v29 = vpop.permute.xlu0 %1203 }
 0x1d5   :  { %5488 = vmatpush3.bf16.xpose.msra.mxu0 %v965_v58 }
 0x1d6   :  { %5513 = vmatprep.subr.bf16.mxu0 %v8132_v39 }
 0x1d8   :  { %5460 = vmatmul.mubr.msk.bf16.vlgmr.msra.gmra.mxu1 %vm533_vm2, %v6772_v3 }
 0x1d9   :  { %5474 = vmatpush3.bf16.xpose.msra.mxu1 %v910_v0  ;;  %5479 = vmatprep.mubr.msk.bf16.mxu1 %vm6329_vm1, %v8132_v39 }
 0x1da   :  { %5475 = vmatprep.subr.bf16.mxu1 %v8132_v39 }
 0x1dc   :  { %5490 = vmatmul.mubr.msk.bf16.vlgmr.msra.gmra.mxu0 %vm533_vm2, %v6782_v7 }
 0x1dd   :  { %5514 = vmatpush3.bf16.msra.mxu0 %v1215_v46  ;;  %5519 = vmatprep.mubr.msk.bf16.mxu0 %vm6329_vm1, %v8132_v39 }
 0x1de   :  { %5515 = vmatprep.subr.bf16.mxu0 %v8132_v39 }
 0x1e1   :  { %5516 = vmatpush3.bf16.msra.mxu0 %v1206_v8  ;;  %5476 = vmatpush3.bf16.xpose.msra.mxu1 %v907_v19 }
 0x1e2   :  { %5517 = vmatprep.subr.bf16.mxu0 %v8132_v39  ;;  %5477 = vmatprep.subr.bf16.mxu1 %v8132_v39 }
 0x1e5   :  { %5518 = vmatpush3.bf16.msra.mxu0 %v1204_v29 }
 0x1e6   :  { %5533 = vmatprep.subr.bf16.mxu0 %v8132_v39 }
 0x1e9   :  { %5478 = vmatpush3.bf16.xpose.msra.mxu1 %v904_v18 }
 0x1ea   :  { %5493 = vmatprep.subr.bf16.mxu1 %v8132_v39 }
 0x1f0   :  { %5480 = vmatmul.mubr.msk.bf16.vlgmr.msra.gmra.mxu1 %vm533_vm2, %v6799_v63 }
 0x1f1   :  { %5494 = vmatpush3.bf16.msra.mxu1 %v1107_v25  ;;  %5499 = vmatprep.mubr.msk.bf16.mxu1 %vm6329_vm1, %v8132_v39 }
 0x1f2   :  { %5495 = vmatprep.subr.bf16.mxu1 %v8132_v39 }
 0x1f5   :  { %5496 = vmatpush3.bf16.msra.mxu1 %v1097_v23 }
 0x1f6   :  { %5497 = vmatprep.subr.bf16.mxu1 %v8132_v39 }
 0x1f9   :  { %5498 = vmatpush3.bf16.msra.mxu1 %v1095_v51 }
 0x1fa   :  { %5503 = vmatprep.subr.bf16.mxu1 %v8132_v39 }
 0x250   :  { %v6809_v15 = vpop.f32.mrf.mxu1 }
 0x251   :  { %v1014_v24 = vsel %vm1013_vm4, %v6809_v15, -inf }
 0x252   :  { %1015 = vmax.xlane.f32.xlu0 %v1014_v24  ;;  %v5421_v20 = vpop.f32.mrf.mxu1 }
 0x254   :  { %v583_v27 = vpop.f32.mrf.mxu1 }
 0x256   :  { %v5422_v40 = vpop.f32.mrf.mxu1 }
 0x268   :  { %v6813_v33 = vpop.f32.mrf.mxu1 }
 0x269   :  { %v1017_v34 = vsel %vm1013_vm4, %v6813_v33, -inf }
 0x26a   :  { %v6817_v35 = vpop.f32.mrf.mxu0  ;;  %1018 = vmax.xlane.f32.xlu1 %v1017_v34  ;;  %v5431_v37 = vpop.f32.mrf.mxu1 }
 0x26b   :  { %v1023_v42 = vsel %vm1013_vm4, %v6817_v35, -inf }
 0x26c   :  { %v644_v43 = vpop.f32.mrf.mxu1  ;;  %v5451_v41 = vpop.f32.mrf.mxu0 }
 0x26e   :  { %v766_v14 = vpop.f32.mrf.mxu0  ;;  %1024 = vmax.xlane.f32.xlu1 %v1023_v42  ;;  %v5432_v51 = vpop.f32.mrf.mxu1 }
 0x26f   :  { %v1150_v51 = vpop.permute.xlu1 %1149 }
 0x270   :  { %v5452_v52 = vpop.f32.mrf.mxu0 }
 0x271   :  { %v6843_v52 = vpop.permute.xlu0 %1315 }
 0x280   :  { %v6821_v54 = vpop.f32.mrf.mxu1 }
 0x281   :  { %v1020_v62 = vsel %vm1013_vm4, %v6821_v54, -inf }
 0x282   :  { %1021 = vmax.xlane.f32.xlu1 %v1020_v62  ;;  %v5441_v56 = vpop.f32.mrf.mxu1  ;;  %v6845_v62 = vpop.permute.xlu1 %1261 }
 0x283   :  { %v6847_v56 = vpop.permute.xlu0 %1313 }
 0x284   :  { %v705_v57 = vpop.f32.mrf.mxu1  ;;  %v6825_v58 = vpop.f32.mrf.mxu0 }
 0x285   :  { %v1029_v0 = vsel %vm1013_vm4, %v6825_v58, -inf }
 0x286   :  { %v5471_v5 = vpop.f32.mrf.mxu0  ;;  %1030 = vmax.xlane.f32.xlu1 %v1029_v0  ;;  %v5442_v46 = vpop.f32.mrf.mxu1 }
 0x287   :  { %v6849_v57 = vpop.permute.xlu1 %1259  ;;  %v6851_v0 = vpop.permute.xlu0 %1311 }
 0x288   :  { %v888_v8 = vpop.f32.mrf.mxu0 }
 0x28a   :  { %v5472_v19 = vpop.f32.mrf.mxu0 }
 0x28b   :  { %v6859_v46 = vpop.permute.xlu1 %1257  ;;  %v6861_v8 = vpop.permute.xlu0 %1423 }
 0x28f   :  { %v6865_v19 = vpop.permute.xlu1 %1369 }
 0x297   :  { %1473 = vrot.lane.b32.xlu1 %v6637_v32, %s6325_s1 }
 0x298   :  { %v6831_v29 = vpop.f32.mrf.mxu1 }
 0x299   :  { %v1026_v18 = vsel %vm1013_vm4, %v6831_v29, -inf }
 0x29a   :  { %1027 = vmax.xlane.f32.xlu0 %v1026_v18  ;;  %v5461_v25 = vpop.f32.mrf.mxu1  ;;  %v6867_v18 = vpop.permute.xlu0 %1421 }
 0x29c   :  { %v827_v23 = vpop.f32.mrf.mxu1  ;;  %v6835_v24 = vpop.f32.mrf.mxu0 }
 0x29d   :  { %v1035_v14 = vsel %vm1013_vm4, %v6835_v24, -inf }
 0x29e   :  { %v5462_v20 = vpop.f32.mrf.mxu1  ;;  %v5491_v27 = vpop.f32.mrf.mxu0 }
 0x29f   :  { %v6874_v20 = vpop.permute.xlu1 %1367 }
 0x2a0   :  { %v1010_v40 = vpop.f32.mrf.mxu0 }
 0x2a2   :  { %v5492_v34 = vpop.f32.mrf.mxu0 }
 0x2a3   :  { %v6878_v40 = vpop.permute.xlu1 %1365 }
 0x2b0   :  { %1419 = vrot.lane.b32.xlu0 %v6617_v22, %s6325_s1  ;;  %v6839_v37 = vpop.f32.mrf.mxu1 }
 0x2b1   :  { %v1032_v5 = vsel %vm1013_vm4, %v6839_v37, -inf }
 0x2b2   :  { %v5481_v43 = vpop.f32.mrf.mxu1 }
 0x2b4   :  { %v949_v41 = vpop.f32.mrf.mxu1 }
 0x2b6   :  { %v5482_v42 = vpop.f32.mrf.mxu1 }
 0x2b7   :  { %v1161_v42 = vsel %vm1105_vm3, %v6762_v21, 0 }
 0x2bb   :  { %1036 = vmax.xlane.f32.xlu1 %v1035_v14 }
 0x2cc   :  { %1615 = vrot.lane.b32.xlu1 %v6511_v1, %s6330_s8 }
 0x2cf   :  { %1033 = vmax.xlane.f32.xlu0 %v1032_v5 }
 0x2d0   :  { %1613 = vrot.lane.b32.xlu1 %v6499_v59, %s6330_s8 }
 0x2d4   :  { %1611 = vrot.lane.b32.xlu1 %v6520_v6, %s6330_s8 }
 0x2d8   :  { %1737 = vrot.lane.b32.xlu1 %v6540_v17, %s6330_s8 }
 0x2db   :  { %v1016_v25 = vpop.xlane.xlu0 %1015 }
 0x2dc   :  { %v1038_v23 = vsub.f32 %v6809_v15, %v1016_v25  ;;  %1609 = vrot.lane.b32.xlu1 %v6713_v10, %s6331_s9  ;;  %v6886_v15 = vpop.permute.xlu1 %1477 }
 0x2de   :  { %v1046_v27 = vmul.f32 1.442695, %v1038_v23  ;;  %v1269_v23 = vsel %vm1105_vm3, %v6845_v62, 0 }
 0x2e0   :  { %6123 = vpow2.f32 %v1046_v27  ;;  %1735 = vrot.lane.b32.xlu1 %v6549_v28, %s6330_s8  ;;  %v6898_v41 = vpop.permute.xlu1 %1475 }
 0x2e4   :  { %1733 = vrot.lane.b32.xlu1 %v6557_v30, %s6330_s8 }
 0x2e5   :  { %1554 = vrot.lane.b32.xlu0 %v6488_v50, %s6330_s8 }
 0x2e8   :  { %1859 = vrot.lane.b32.xlu1 %v6583_v55, %s6330_s8 }
 0x2e9   :  { %1552 = vrot.lane.b32.xlu0 %v6493_v53, %s6330_s8 }
 0x2ec   :  { %1731 = vrot.lane.b32.xlu1 %v6717_v13, %s6331_s9 }
 0x2ed   :  { %v6892_v34 = vpop.eup %6123  ;;  %1550 = vrot.lane.b32.xlu0 %v6482_v45, %s6330_s8 }
 0x2ee   :  { %v1086_v43 = vpack.c.bf16 %v6892_v34, %v6892_v34 }
 0x2f0   :  { %5500 = vmatmul.mubr.msk.bf16.vlgmr.msra.gmra.mxu1 %vm1013_vm4, %v1086_v43  ;;  %1857 = vrot.lane.b32.xlu1 %v6594_v2, %s6330_s8 }
 0x2f1   :  { %5504 = vmatpush3.bf16.msra.mxu1 %v1161_v42  ;;  %1676 = vrot.lane.b32.xlu0 %v6515_v4, %s6330_s8 }
 0x2f2   :  { %5505 = vmatprep.subr.bf16.mxu1 %v8132_v39  ;;  %5509 = vmatprep.mubr.msk.bf16.mxu1 %vm6329_vm1, %v8132_v39 }
 0x2f3   :  { %v1019_v14 = vpop.xlane.xlu1 %1018 }
 0x2f4   :  { %v1039_v5 = vsub.f32 %v6813_v33, %v1019_v14  ;;  %1855 = vrot.lane.b32.xlu1 %v6604_v9, %s6330_s8 }
 0x2f5   :  { %5506 = vmatpush3.bf16.msra.mxu1 %v6767_v61  ;;  %1548 = vrot.lane.b32.xlu0 %v6693_v47, %s6331_s9 }
 0x2f6   :  { %v1048_v21 = vmul.f32 1.442695, %v1039_v5  ;;  %5507 = vmatprep.subr.bf16.mxu1 %v8132_v39 }
 0x2f7   :  { %v1025_v25 = vpop.xlane.xlu1 %1024 }
 0x2f8   :  { %6125 = vpow2.f32 %v1048_v21  ;;  %1981 = vrot.lane.b32.xlu1 %v6621_v26, %s6330_s8  ;;  %v1041_v33 = vsub.f32 %v6817_v35, %v1025_v25  ;;  %v1377_v21 = vsel %vm1105_vm3, %v6865_v19, 0  ;;  %v1323_v19 = vsel %vm1105_vm3, %v6843_v52, 0 }
 0x2f9   :  { %5508 = vmatpush3.bf16.msra.mxu1 %v1150_v51  ;;  %1674 = vrot.lane.b32.xlu0 %v6529_v12, %s6330_s8  ;;  %v1485_v25 = vsel %vm1105_vm3, %v6886_v15, 0  ;;  %v1431_v15 = vsel %vm1105_vm3, %v6861_v8, 0 }
 0x2fa   :  { %5523 = vmatprep.subr.bf16.mxu1 %v8132_v39  ;;  %v1052_v61 = vmul.f32 1.442695, %v1041_v33 }
 0x2fc   :  { %1853 = vrot.lane.b32.xlu1 %v6750_v49, %s6331_s9  ;;  %6127 = vpow2.f32 %v1052_v61 }
 0x2fd   :  { %1672 = vrot.lane.b32.xlu0 %v6537_v16, %s6330_s8 }
 0x300   :  { %1979 = vrot.lane.b32.xlu1 %v6630_v31, %s6330_s8 }
 0x301   :  { %1798 = vrot.lane.b32.xlu0 %v6563_v36, %s6330_s8 }
 0x304   :  { %1977 = vrot.lane.b32.xlu1 %v6637_v32, %s6330_s8 }
 0x305   :  { %v6933_v35 = vpop.eup %6125  ;;  %1670 = vrot.lane.b32.xlu0 %v6740_v38, %s6331_s9 }
 0x306   :  { %v1087_v51 = vpack.c.bf16 %v6933_v35, %v6933_v35 }
 0x308   :  { %5510 = vmatmul.mubr.msk.bf16.vlgmr.msra.gmra.mxu1 %vm1013_vm4, %v1087_v51  ;;  %1975 = vrot.lane.b32.xlu1 %v6782_v7, %s6331_s9 }
 0x309   :  { %5524 = vmatpush3.bf16.msra.mxu1 %v1269_v23  ;;  %1796 = vrot.lane.b32.xlu0 %v6568_v44, %s6330_s8  ;;  %v6956_v42 = vpop.eup %6127 }
 0x30a   :  { %5525 = vmatprep.subr.bf16.mxu1 %v8132_v39  ;;  %5529 = vmatprep.mubr.msk.bf16.mxu1 %vm6329_vm1, %v8132_v39 }
 0x30b   :  { %v1022_v27 = vpop.xlane.xlu1 %1021 }
 0x30c   :  { %v1040_v43 = vsub.f32 %v6821_v54, %v1022_v27  ;;  %2119 = vrot.lane.b32.xlu1 %v6488_v50, %s6332_s10 }
 0x30d   :  { %5526 = vmatpush3.bf16.msra.mxu1 %v6849_v57  ;;  %1794 = vrot.lane.b32.xlu0 %v6577_v48, %s6330_s8  ;;  %v1089_v57 = vpack.c.bf16 %v6956_v42, %v6956_v42 }
 0x30e   :  { %v1050_v62 = vmul.f32 1.442695, %v1040_v43  ;;  %5527 = vmatprep.subr.bf16.mxu1 %v8132_v39 }
 0x30f   :  { %v1031_v14 = vpop.xlane.xlu1 %1030 }
 0x310   :  { %6129 = vpow2.f32 %v1050_v62  ;;  %v1043_v5 = vsub.f32 %v6825_v58, %v1031_v14  ;;  %2117 = vrot.lane.b32.xlu1 %v6493_v53, %s6332_s10 }
 0x311   :  { %5528 = vmatpush3.bf16.msra.mxu1 %v6859_v46  ;;  %1920 = vrot.lane.b32.xlu0 %v6587_v60, %s6330_s8 }
 0x312   :  { %v1056_v54 = vmul.f32 1.442695, %v1043_v5  ;;  %5543 = vmatprep.subr.bf16.mxu1 %v8132_v39 }
 0x314   :  { %6131 = vpow2.f32 %v1056_v54  ;;  %5530 = vmatmul.mubr.msk.bf16.vlgmr.msra.gmra.mxu1 %vm1013_vm4, %v1089_v57  ;;  %2115 = vrot.lane.b32.xlu1 %v6482_v45, %s6332_s10 }
 0x315   :  { %5544 = vmatpush3.bf16.msra.mxu1 %v1377_v21  ;;  %1792 = vrot.lane.b32.xlu0 %v6772_v3, %s6331_s9 }
 0x316   :  { %5545 = vmatprep.subr.bf16.mxu1 %v8132_v39  ;;  %5549 = vmatprep.mubr.msk.bf16.mxu1 %vm6329_vm1, %v8132_v39 }
 0x318   :  { %2169 = vrot.lane.b32.xlu1 %v6520_v6, %s6332_s10 }
 0x319   :  { %5546 = vmatpush3.bf16.msra.mxu1 %v6874_v20  ;;  %1918 = vrot.lane.b32.xlu0 %v6607_v11, %s6330_s8 }
 0x31a   :  { %5547 = vmatprep.subr.bf16.mxu1 %v8132_v39 }
 0x31c   :  { %2281 = vrot.lane.b32.xlu1 %v6540_v17, %s6332_s10 }
 0x31d   :  { %v6985_v58 = vpop.eup %6129  ;;  %5548 = vmatpush3.bf16.msra.mxu1 %v6878_v40  ;;  %1916 = vrot.lane.b32.xlu0 %v6617_v22, %s6330_s8 }
 0x31e   :  { %v1088_v46 = vpack.c.bf16 %v6985_v58, %v6985_v58  ;;  %5563 = vmatprep.subr.bf16.mxu1 %v8132_v39 }
 0x320   :  { %2279 = vrot.lane.b32.xlu1 %v6549_v28, %s6332_s10  ;;  %5520 = vmatmul.mubr.msk.bf16.vlgmr.msra.gmra.mxu0 %vm1013_vm4, %v1088_v46 }
 0x321   :  { %v6998_v20 = vpop.eup %6131  ;;  %5534 = vmatpush3.bf16.msra.mxu0 %v1323_v19  ;;  %1914 = vrot.lane.b32.xlu0 %v6799_v63, %s6331_s9 }
 0x322   :  { %5535 = vmatprep.subr.bf16.mxu0 %v8132_v39  ;;  %v1091_v40 = vpack.c.bf16 %v6998_v20, %v6998_v20  ;;  %5539 = vmatprep.mubr.msk.bf16.mxu0 %vm6329_vm1, %v8132_v39 }
 0x323   :  { %v1028_v52 = vpop.xlane.xlu0 %1027 }
 0x324   :  { %v1042_v33 = vsub.f32 %v6831_v29, %v1028_v52  ;;  %2277 = vrot.lane.b32.xlu1 %v6557_v30, %s6332_s10  ;;  %5550 = vmatmul.mubr.msk.bf16.vlgmr.msra.gmra.mxu1 %vm1013_vm4, %v1091_v40  ;;  %v1474_v29 = vpop.permute.xlu1 %1473 }
 0x325   :  { %5536 = vmatpush3.bf16.msra.mxu0 %v6847_v56  ;;  %5564 = vmatpush3.bf16.msra.mxu1 %v1485_v25 }
 0x326   :  { %v1054_v61 = vmul.f32 1.442695, %v1042_v33  ;;  %2173 = vrot.lane.b32.xlu0 %v6511_v1, %s6332_s10  ;;  %5537 = vmatprep.subr.bf16.mxu0 %v8132_v39 }
 0x327   :  { %5565 = vmatprep.subr.bf16.mxu1 %v8132_v39  ;;  %5569 = vmatprep.mubr.msk.bf16.mxu1 %vm6329_vm1, %v8132_v39 }
 0x328   :  { %6133 = vpow2.f32 %v1054_v61  ;;  %2389 = vrot.lane.b32.xlu1 %v6583_v55, %s6332_s10 }
 0x329   :  { %5538 = vmatpush3.bf16.msra.mxu0 %v6851_v0  ;;  %5566 = vmatpush3.bf16.msra.mxu1 %v6898_v41  ;;  %v1420_v41 = vpop.permute.xlu0 %1419 }
 0x32a   :  { %2171 = vrot.lane.b32.xlu0 %v6499_v59, %s6332_s10  ;;  %5567 = vmatprep.subr.bf16.mxu1 %v8132_v39 }
 0x32b   :  { %5553 = vmatprep.subr.bf16.mxu0 %v8132_v39 }
 0x32c   :  { %2387 = vrot.lane.b32.xlu1 %v6594_v2, %s6332_s10 }
 0x32d   :  { %5568 = vmatpush3.bf16.msra.mxu1 %v1474_v29 }
 0x32e   :  { %2227 = vrot.lane.b32.xlu0 %v6515_v4, %s6332_s10  ;;  %5583 = vmatprep.subr.bf16.mxu1 %v8132_v39 }
 0x330   :  { %2385 = vrot.lane.b32.xlu1 %v6604_v9, %s6332_s10 }
 0x332   :  { %2225 = vrot.lane.b32.xlu0 %v6529_v12, %s6332_s10 }
 0x334   :  { %2497 = vrot.lane.b32.xlu1 %v6621_v26, %s6332_s10 }
 0x335   :  { %v7039_v56 = vpop.eup %6133 }
 0x336   :  { %2223 = vrot.lane.b32.xlu0 %v6537_v16, %s6332_s10  ;;  %v1090_v0 = vpack.c.bf16 %v7039_v56, %v7039_v56 }
 0x338   :  { %5540 = vmatmul.mubr.msk.bf16.vlgmr.msra.gmra.mxu0 %vm1013_vm4, %v1090_v0 }
 0x339   :  { %5554 = vmatpush3.bf16.msra.mxu0 %v1431_v15  ;;  %5559 = vmatprep.mubr.msk.bf16.mxu0 %vm6329_vm1, %v8132_v39 }
 0x33a   :  { %2335 = vrot.lane.b32.xlu0 %v6563_v36, %s6332_s10  ;;  %5555 = vmatprep.subr.bf16.mxu0 %v8132_v39 }
 0x33d   :  { %5556 = vmatpush3.bf16.msra.mxu0 %v6867_v18 }
 0x33e   :  { %2333 = vrot.lane.b32.xlu0 %v6568_v44, %s6332_s10  ;;  %5557 = vmatprep.subr.bf16.mxu0 %v8132_v39 }
 0x341   :  { %5558 = vmatpush3.bf16.msra.mxu0 %v1420_v41 }
 0x342   :  { %2331 = vrot.lane.b32.xlu0 %v6577_v48, %s6332_s10  ;;  %5573 = vmatprep.subr.bf16.mxu0 %v8132_v39 }
 0x344   :  { %v1037_v8 = vpop.xlane.xlu1 %1036 }
 0x345   :  { %v1045_v51 = vsub.f32 %v6835_v24, %v1037_v8 }
 0x346   :  { %2443 = vrot.lane.b32.xlu0 %v6587_v60, %s6332_s10 }
 0x347   :  { %v1060_v23 = vmul.f32 1.442695, %v1045_v51 }
 0x348   :  { %v1616_v18 = vpop.permute.xlu1 %1615 }
 0x349   :  { %6135 = vpow2.f32 %v1060_v23  ;;  %v1627_v5 = vsel %vm533_vm2, %v1616_v18, 0 }
 0x34c   :  { %v1614_v27 = vpop.permute.xlu1 %1613 }
 0x34d   :  { %v1624_v19 = vsel %vm533_vm2, %v1614_v27, 0 }
 0x350   :  { %v1612_v24 = vpop.permute.xlu1 %1611 }
 0x351   :  { %v1621_v33 = vsel %vm533_vm2, %v1612_v24, 0 }
 0x354   :  { %v1738_v40 = vpop.permute.xlu1 %1737 }
 0x355   :  { %v1749_v8 = vsel %vm533_vm2, %v1738_v40, 0 }
 0x356   :  { %v7063_v43 = vpop.eup %6135 }
 0x357   :  { %v1093_v62 = vpack.c.bf16 %v7063_v43, %v7063_v43 }
 0x358   :  { %v1034_v14 = vpop.xlane.xlu0 %1033  ;;  %v1610_v52 = vpop.permute.xlu1 %1609 }
 0x359   :  { %v1044_v54 = vsub.f32 %v6839_v37, %v1034_v14  ;;  %5570 = vmatmul.mubr.msk.bf16.vlgmr.msra.gmra.mxu1 %vm1013_vm4, %v1093_v62 }
 0x35a   :  { %5584 = vmatpush3.bf16.xpose.msra.mxu1 %v1627_v5  ;;  %5589 = vmatprep.mubr.msk.bf16.mxu1 %vm6329_vm1, %v8132_v39 }
 0x35b   :  { %v1058_v57 = vmul.f32 1.442695, %v1044_v54  ;;  %5585 = vmatprep.subr.bf16.mxu1 %v8132_v39 }
 0x35c   :  { %v1555_v21 = vpop.permute.xlu0 %1554  ;;  %v1736_v0 = vpop.permute.xlu1 %1735 }
 0x35d   :  { %6137 = vpow2.f32 %v1058_v57  ;;  %v1566_v15 = vsel %vm533_vm2, %v1555_v21, 0  ;;  %v1746_v27 = vsel %vm533_vm2, %v1736_v0, 0 }
 0x360   :  { %v1553_v46 = vpop.permute.xlu0 %1552  ;;  %v1734_v51 = vpop.permute.xlu1 %1733 }
 0x361   :  { %v1563_v18 = vsel %vm533_vm2, %v1553_v46, 0  ;;  %v1743_v57 = vsel %vm533_vm2, %v1734_v51, 0 }
 0x362   :  { %5586 = vmatpush3.bf16.xpose.msra.mxu1 %v1624_v19 }
 0x363   :  { %5587 = vmatprep.subr.bf16.mxu1 %v8132_v39 }
 0x364   :  { %v1551_v37 = vpop.permute.xlu0 %1550  ;;  %v1860_v62 = vpop.permute.xlu1 %1859 }
 0x365   :  { %v1560_v5 = vsel %vm533_vm2, %v1551_v37, 0  ;;  %v1871_v40 = vsel %vm533_vm2, %v1860_v62, 0 }
 0x368   :  { %v1677_v25 = vpop.permute.xlu0 %1676  ;;  %v1732_v54 = vpop.permute.xlu1 %1731 }
 0x369   :  { %v1688_v21 = vsel %vm533_vm2, %v1677_v25, 0 }
 0x36a   :  { %v7076_v61 = vpop.eup %6137  ;;  %5588 = vmatpush3.bf16.xpose.msra.mxu1 %v1621_v33 }
 0x36b   :  { %v1092_v29 = vpack.c.bf16 %v7076_v61, %v7076_v61  ;;  %5603 = vmatprep.subr.bf16.mxu1 %v8132_v39 }
 0x36c   :  { %v1549_v41 = vpop.permute.xlu0 %1548  ;;  %v1858_v46 = vpop.permute.xlu1 %1857 }
 0x36d   :  { %5560 = vmatmul.mubr.msk.bf16.vlgmr.msra.gmra.mxu0 %vm1013_vm4, %v1092_v29  ;;  %v1868_v33 = vsel %vm533_vm2, %v1858_v46, 0 }
 0x36e   :  { %5574 = vmatpush3.bf16.xpose.msra.mxu0 %v1566_v15  ;;  %5579 = vmatprep.mubr.msk.bf16.mxu0 %vm6329_vm1, %v8132_v39 }
 0x36f   :  { %5575 = vmatprep.subr.bf16.mxu0 %v8132_v39 }
 0x370   :  { %v1675_v23 = vpop.permute.xlu0 %1674  ;;  %v1856_v37 = vpop.permute.xlu1 %1855 }
 0x371   :  { %5590 = vmatmul.mubr.msk.bf16.vlgmr.msra.gmra.mxu1 %vm533_vm2, %v1610_v52  ;;  %v1685_v25 = vsel %vm533_vm2, %v1675_v23, 0  ;;  %v1865_v51 = vsel %vm533_vm2, %v1856_v37, 0 }
 0x372   :  { %5604 = vmatpush3.bf16.xpose.msra.mxu1 %v1749_v8  ;;  %5609 = vmatprep.mubr.msk.bf16.mxu1 %vm6329_vm1, %v8132_v39 }
 0x373   :  { %5605 = vmatprep.subr.bf16.mxu1 %v8132_v39 }
 0x374   :  { %v1673_v14 = vpop.permute.xlu0 %1672  ;;  %v1982_v29 = vpop.permute.xlu1 %1981 }
 0x375   :  { %v1682_v15 = vsel %vm533_vm2, %v1673_v14, 0  ;;  %v1993_v62 = vsel %vm533_vm2, %v1982_v29, 0 }
 0x376   :  { %5576 = vmatpush3.bf16.xpose.msra.mxu0 %v1563_v18 }
 0x377   :  { %5577 = vmatprep.subr.bf16.mxu0 %v8132_v39 }
 0x378   :  { %v1799_v24 = vpop.permute.xlu0 %1798 }
 0x379   :  { %v1810_v23 = vsel %vm533_vm2, %v1799_v24, 0 }
 0x37a   :  { %5606 = vmatpush3.bf16.xpose.msra.mxu1 %v1746_v27 }
 0x37b   :  { %5607 = vmatprep.subr.bf16.mxu1 %v8132_v39 }
 0x37c   :  { %v1671_v19 = vpop.permute.xlu0 %1670 }
 0x37e   :  { %5578 = vmatpush3.bf16.xpose.msra.mxu0 %v1560_v5 }
 0x37f   :  { %5593 = vmatprep.subr.bf16.mxu0 %v8132_v39 }
 0x380   :  { %v1797_v52 = vpop.permute.xlu0 %1796 }
 0x382   :  { %5608 = vmatpush3.bf16.xpose.msra.mxu1 %v1743_v57 }
 0x383   :  { %5623 = vmatprep.subr.bf16.mxu1 %v8132_v39 }
 0x384   :  { %v1795_v0 = vpop.permute.xlu0 %1794 }
 0x385   :  { %5580 = vmatmul.mubr.msk.bf16.vlgmr.msra.gmra.mxu0 %vm533_vm2, %v1549_v41  ;;  %v1854_v41 = vpop.permute.xlu1 %1853  ;;  %v1804_v46 = vsel %vm533_vm2, %v1795_v0, 0 }
 0x386   :  { %5594 = vmatpush3.bf16.xpose.msra.mxu0 %v1688_v21  ;;  %5599 = vmatprep.mubr.msk.bf16.mxu0 %vm6329_vm1, %v8132_v39 }
 0x387   :  { %5595 = vmatprep.subr.bf16.mxu0 %v8132_v39 }
 0x388   :  { %v1921_v8 = vpop.permute.xlu0 %1920 }
 0x389   :  { %5610 = vmatmul.mubr.msk.bf16.vlgmr.msra.gmra.mxu1 %vm533_vm2, %v1732_v54  ;;  %v1980_v18 = vpop.permute.xlu1 %1979  ;;  %v1807_v54 = vsel %vm533_vm2, %v1797_v52, 0 }
 0x38a   :  { %5624 = vmatpush3.bf16.xpose.msra.mxu1 %v1871_v40  ;;  %5629 = vmatprep.mubr.msk.bf16.mxu1 %vm6329_vm1, %v8132_v39  ;;  %v1990_v24 = vsel %vm533_vm2, %v1980_v18, 0 }
 0x38b   :  { %5625 = vmatprep.subr.bf16.mxu1 %v8132_v39 }
 0x38c   :  { %v1793_v27 = vpop.permute.xlu0 %1792 }
 0x38d   :  { %v1978_v14 = vpop.permute.xlu1 %1977 }
 0x38e   :  { %5596 = vmatpush3.bf16.xpose.msra.mxu0 %v1685_v25  ;;  %v1987_v37 = vsel %vm533_vm2, %v1978_v14, 0 }
 0x38f   :  { %5597 = vmatprep.subr.bf16.mxu0 %v8132_v39 }
 0x390   :  { %v1919_v5 = vpop.permute.xlu0 %1918 }
 0x391   :  { %v1976_v57 = vpop.permute.xlu1 %1975 }
 0x392   :  { %5626 = vmatpush3.bf16.xpose.msra.mxu1 %v1868_v33  ;;  %v1932_v33 = vsel %vm533_vm2, %v1921_v8, 0 }
 0x393   :  { %5627 = vmatprep.subr.bf16.mxu1 %v8132_v39 }
 0x394   :  { %v1917_v21 = vpop.permute.xlu0 %1916 }
 0x396   :  { %5598 = vmatpush3.bf16.xpose.msra.mxu0 %v1682_v15 }
 0x397   :  { %5613 = vmatprep.subr.bf16.mxu0 %v8132_v39 }
 0x398   :  { %v1915_v40 = vpop.permute.xlu0 %1914 }
 0x39a   :  { %5628 = vmatpush3.bf16.xpose.msra.mxu1 %v1865_v51 }
 0x39b   :  { %5643 = vmatprep.subr.bf16.mxu1 %v8132_v39 }
 0x39c   :  { %v2174_v0 = vpop.permute.xlu0 %2173 }
 0x39d   :  { %5600 = vmatmul.mubr.msk.bf16.vlgmr.msra.gmra.mxu0 %vm533_vm2, %v1671_v19  ;;  %v2120_v19 = vpop.permute.xlu1 %2119  ;;  %v2181_v51 = vsel %vm1105_vm3, %v2174_v0, 0 }
 0x39e   :  { %5614 = vmatpush3.bf16.xpose.msra.mxu0 %v1810_v23  ;;  %5619 = vmatprep.mubr.msk.bf16.mxu0 %vm6329_vm1, %v8132_v39  ;;  %v1929_v23 = vsel %vm533_vm2, %v1919_v5, 0 }
 0x39f   :  { %5615 = vmatprep.subr.bf16.mxu0 %v8132_v39 }
 0x3a0   :  { %v2172_v18 = vpop.permute.xlu0 %2171 }
 0x3a1   :  { %5630 = vmatmul.mubr.msk.bf16.vlgmr.msra.gmra.mxu1 %vm533_vm2, %v1854_v41  ;;  %v2118_v29 = vpop.permute.xlu1 %2117 }
 0x3a2   :  { %5644 = vmatpush3.bf16.xpose.msra.mxu1 %v1993_v62  ;;  %5649 = vmatprep.mubr.msk.bf16.mxu1 %vm6329_vm1, %v8132_v39  ;;  %v1926_v62 = vsel %vm533_vm2, %v1917_v21, 0 }
 0x3a3   :  { %5645 = vmatprep.subr.bf16.mxu1 %v8132_v39 }
 0x3a5   :  { %v2116_v8 = vpop.permute.xlu1 %2115 }
 0x3a6   :  { %5616 = vmatpush3.bf16.xpose.msra.mxu0 %v1807_v54 }
 0x3a7   :  { %5617 = vmatprep.subr.bf16.mxu0 %v8132_v39 }
 0x3aa   :  { %5646 = vmatpush3.bf16.xpose.msra.mxu1 %v1990_v24  ;;  %v2127_v24 = vsel %vm1105_vm3, %v2120_v19, 0 }
 0x3ab   :  { %5647 = vmatprep.subr.bf16.mxu1 %v8132_v39 }
 0x3ae   :  { %5618 = vmatpush3.bf16.xpose.msra.mxu0 %v1804_v46 }
 0x3af   :  { %5633 = vmatprep.subr.bf16.mxu0 %v8132_v39 }
 0x3b0   :  { %v7134_v52 = vpop.f32.mrf.mxu1 }
 0x3b2   :  { %5648 = vmatpush3.bf16.xpose.msra.mxu1 %v1987_v37  ;;  %v5501_v25 = vpop.f32.mrf.mxu1 }
 0x3b3   :  { %5663 = vmatprep.subr.bf16.mxu1 %v8132_v39 }
 0x3b4   :  { %v1146_v15 = vpop.f32.mrf.mxu1 }
 0x3b5   :  { %5620 = vmatmul.mubr.msk.bf16.vlgmr.msra.gmra.mxu0 %vm533_vm2, %v1793_v27  ;;  %v2170_v27 = vpop.permute.xlu1 %2169 }
 0x3b6   :  { %5634 = vmatpush3.bf16.xpose.msra.mxu0 %v1932_v33  ;;  %5639 = vmatprep.mubr.msk.bf16.mxu0 %vm6329_vm1, %v8132_v39  ;;  %v5502_v41 = vpop.f32.mrf.mxu1 }
 0x3b7   :  { %5635 = vmatprep.subr.bf16.mxu0 %v8132_v39 }
 0x3b9   :  { %5650 = vmatmul.mubr.msk.bf16.vlgmr.msra.gmra.mxu1 %vm533_vm2, %v1976_v57  ;;  %v2282_v63 = vpop.permute.xlu1 %2281 }
 0x3ba   :  { %5664 = vmatpush3.bf16.msra.mxu1 %v2181_v51  ;;  %5669 = vmatprep.mubr.msk.bf16.mxu1 %vm6329_vm1, %v8132_v39 }
 0x3bb   :  { %5665 = vmatprep.subr.bf16.mxu1 %v8132_v39 }
 0x3bd   :  { %v2280_v3 = vpop.permute.xlu1 %2279 }
 0x3be   :  { %5636 = vmatpush3.bf16.xpose.msra.mxu0 %v1929_v23  ;;  %5666 = vmatpush3.bf16.msra.mxu1 %v2172_v18 }
 0x3bf   :  { %5667 = vmatprep.subr.bf16.mxu1 %v8132_v39  ;;  %5637 = vmatprep.subr.bf16.mxu0 %v8132_v39 }
 0x3c1   :  { %v2278_v7 = vpop.permute.xlu1 %2277 }
 0x3c2   :  { %5668 = vmatpush3.bf16.msra.mxu1 %v2170_v27 }
 0x3c3   :  { %5683 = vmatprep.subr.bf16.mxu1 %v8132_v39 }
 0x3c6   :  { %5638 = vmatpush3.bf16.xpose.msra.mxu0 %v1926_v62 }
 0x3c7   :  { %5653 = vmatprep.subr.bf16.mxu0 %v8132_v39 }
 0x3c8   :  { %v7153_v14 = vpop.f32.mrf.mxu1 }
 0x3ca   :  { %v5511_v54 = vpop.f32.mrf.mxu1 }
 0x3cc   :  { %v1200_v5 = vpop.f32.mrf.mxu1 }
 0x3cd   :  { %5640 = vmatmul.mubr.msk.bf16.vlgmr.msra.gmra.mxu0 %vm533_vm2, %v1915_v40 }
 0x3ce   :  { %5654 = vmatpush3.bf16.msra.mxu0 %v2127_v24  ;;  %v5512_v57 = vpop.f32.mrf.mxu1  ;;  %5659 = vmatprep.mubr.msk.bf16.mxu0 %vm6329_vm1, %v8132_v39 }
 0x3cf   :  { %5655 = vmatprep.subr.bf16.mxu0 %v8132_v39 }
 0x3d2   :  { %5656 = vmatpush3.bf16.msra.mxu0 %v2118_v29 }
 0x3d3   :  { %5657 = vmatprep.subr.bf16.mxu0 %v8132_v39 }
 0x3d4   :  { %v7161_v21 = vpop.f32.mrf.mxu1 }
 0x3d6   :  { %v5531_v46 = vpop.f32.mrf.mxu1  ;;  %5658 = vmatpush3.bf16.msra.mxu0 %v2116_v8 }
 0x3d7   :  { %5673 = vmatprep.subr.bf16.mxu0 %v8132_v39 }
 0x3d8   :  { %v1308_v37 = vpop.f32.mrf.mxu1 }
 0x3da   :  { %v5532_v19 = vpop.f32.mrf.mxu1 }
 0x3e0   :  { %v7164_v25 = vpop.f32.mrf.mxu0 }
 0x3e2   :  { %v5521_v40 = vpop.f32.mrf.mxu0 }
 0x3e4   :  { %v1254_v33 = vpop.f32.mrf.mxu0  ;;  %v7166_v15 = vpop.f32.mrf.mxu1 }
 0x3e6   :  { %v5522_v0 = vpop.f32.mrf.mxu0  ;;  %v5551_v41 = vpop.f32.mrf.mxu1 }
 0x3e8   :  { %v1416_v51 = vpop.f32.mrf.mxu1 }
 0x3ea   :  { %v5552_v29 = vpop.f32.mrf.mxu1 }
 0x3f8   :  { %v7168_v23 = vpop.f32.mrf.mxu0 }
 0x3fa   :  { %v5541_v18 = vpop.f32.mrf.mxu0 }
 0x3fc   :  { %v1362_v27 = vpop.f32.mrf.mxu0 }
 0x3fe   :  { %v5542_v62 = vpop.f32.mrf.mxu0 }
 0x419   :  { %v7170_v8 = vpop.f32.mrf.mxu1 }
 0x41b   :  { %v5571_v54 = vpop.f32.mrf.mxu1 }
 0x41d   :  { %v1524_v5 = vpop.f32.mrf.mxu1 }
 0x41f   :  { %v5572_v24 = vpop.f32.mrf.mxu1 }
 0x42d   :  { %v7172_v57 = vpop.f32.mrf.mxu0 }
 0x42f   :  { %v5561_v46 = vpop.f32.mrf.mxu0 }
 0x431   :  { %v7174_v37 = vpop.f32.mrf.mxu1  ;;  %v1470_v19 = vpop.f32.mrf.mxu0 }
 0x432   :  { %v2038_v40 = vsel %vm1013_vm4, %v7174_v37, -inf }
 0x433   :  { %2039 = vmax.xlane.f32.xlu1 %v2038_v40  ;;  %v5591_v33 = vpop.f32.mrf.mxu1  ;;  %v5562_v0 = vpop.f32.mrf.mxu0 }
 0x435   :  { %v1666_v41 = vpop.f32.mrf.mxu1 }
 0x437   :  { %v5592_v51 = vpop.f32.mrf.mxu1 }
 0x444   :  { %2495 = vrot.lane.b32.xlu1 %v6630_v31, %s6332_s10  ;;  %v6251_v31 = vld [vmem:[#allocation6 + $0x4] sm:$0xf] }
 0x445   :  { %v7180_v29 = vpop.f32.mrf.mxu0 }
 0x446   :  { %v2035_v18 = vsel %vm1013_vm4, %v7180_v29, -inf }
 0x447   :  { %2036 = vmax.xlane.f32.xlu0 %v2035_v18  ;;  %v5581_v27 = vpop.f32.mrf.mxu0 }
 0x449   :  { %v1605_v62 = vpop.f32.mrf.mxu0  ;;  %v7184_v54 = vpop.f32.mrf.mxu1 }
 0x44a   :  { %v2044_v5 = vsel %vm1013_vm4, %v7184_v54, -inf }
 0x44b   :  { %v5582_v24 = vpop.f32.mrf.mxu0  ;;  %2045 = vmax.xlane.f32.xlu0 %v2044_v5  ;;  %v5611_v46 = vpop.f32.mrf.mxu1 }
 0x44d   :  { %v1788_v19 = vpop.f32.mrf.mxu1 }
 0x44f   :  { %v5612_v40 = vpop.f32.mrf.mxu1 }
 0x45d   :  { %v7188_v33 = vpop.f32.mrf.mxu0 }
 0x45e   :  { %v2041_v0 = vsel %vm1013_vm4, %v7188_v33, -inf }
 0x45f   :  { %v5601_v41 = vpop.f32.mrf.mxu0  ;;  %2042 = vmax.xlane.f32.xlu0 %v2041_v0 }
 0x461   :  { %v1727_v51 = vpop.f32.mrf.mxu0  ;;  %v7192_v18 = vpop.f32.mrf.mxu1 }
 0x462   :  { %v2050_v27 = vsel %vm1013_vm4, %v7192_v18, -inf }
 0x463   :  { %v5602_v62 = vpop.f32.mrf.mxu0  ;;  %2051 = vmax.xlane.f32.xlu0 %v2050_v27  ;;  %v5631_v24 = vpop.f32.mrf.mxu1 }
 0x465   :  { %v1910_v5 = vpop.f32.mrf.mxu1 }
 0x467   :  { %v5632_v46 = vpop.f32.mrf.mxu1 }
 0x475   :  { %v7196_v19 = vpop.f32.mrf.mxu0 }
 0x476   :  { %v2047_v40 = vsel %vm1013_vm4, %v7196_v19, -inf }
 0x477   :  { %v5621_v39 = vpop.f32.mrf.mxu0  ;;  %2048 = vmax.xlane.f32.xlu1 %v2047_v40 }
 0x479   :  { %v1849_v41 = vpop.f32.mrf.mxu0  ;;  %2441 = vrot.lane.b32.xlu0 %v6607_v11, %s6332_s10  ;;  %v7202_v0 = vpop.f32.mrf.mxu1 }
 0x47a   :  { %v2056_v51 = vsel %vm1013_vm4, %v7202_v0, -inf }
 0x47b   :  { %v5622_v27 = vpop.f32.mrf.mxu0  ;;  %2057 = vmax.xlane.f32.xlu1 %v2056_v51  ;;  %v5651_v62 = vpop.f32.mrf.mxu1 }
 0x47c   :  { %v7212_v27 = vpop.permute.xlu1 %2389  ;;  %v2228_v51 = vpop.permute.xlu0 %2227 }
 0x47d   :  { %v2032_v24 = vpop.f32.mrf.mxu1 }
 0x47f   :  { %v5652_v5 = vpop.f32.mrf.mxu1 }
 0x480   :  { %v7214_v62 = vpop.permute.xlu1 %2387  ;;  %v7216_v24 = vpop.permute.xlu0 %2225  ;;  %v1065_v5 = vsel %vm1013_vm4, %v6933_v35, 0.0  ;;  %v1080_v35 = vsel %vm1013_vm4, %v7076_v61, 0.0 }
 0x48c   :  { %2493 = vrot.lane.b32.xlu1 %v6637_v32, %s6332_s10 }
 0x48d   :  { %v7208_v46 = vpop.f32.mrf.mxu0 }
 0x48e   :  { %v2053_v11 = vsel %vm1013_vm4, %v7208_v46, -inf }
 0x48f   :  { %v5641_v39 = vpop.f32.mrf.mxu0 }
 0x490   :  { %v7222_v39 = vpop.permute.xlu1 %2385 }
 0x491   :  { %v1971_v40 = vpop.f32.mrf.mxu0 }
 0x492   :  { %v7226_v40 = vpop.permute.xlu0 %2223 }
 0x493   :  { %v5642_v41 = vpop.f32.mrf.mxu0 }
 0x494   :  { %v1074_v41 = vsel %vm1013_vm4, %v7039_v56, 0.0  ;;  %v7230_v60 = vpop.permute.xlu1 %2497  ;;  %v5019_v56 = vcombine.low %v6251_v31, %v6251_v31  ;;  %v2289_v31 = vsel %vm1105_vm3, %v2282_v63, 0  ;;  %v1077_v63 = vsel %vm1013_vm4, %v6998_v20, 0.0 }
 0x496   :  { %v7232_v32 = vpop.permute.xlu0 %2335 }
 0x498   :  { %2054 = vmax.xlane.f32.xlu0 %v2053_v11  ;;  %v1068_v11 = vsel %vm1013_vm4, %v6985_v58, 0.0 }
 0x49a   :  { %v7237_v58 = vpop.permute.xlu0 %2333 }
 0x4ae   :  { %2439 = vrot.lane.b32.xlu0 %v6617_v22, %s6332_s10 }
 0x4b0   :  { %1066 = vadd.xlane.f32.xlu1 %v1065_v5 }
 0x4b4   :  { %1069 = vadd.xlane.f32.xlu1 %v1068_v11  ;;  %v7239_v11 = vpop.permute.xlu0 %2331 }
 0x4b8   :  { %1075 = vadd.xlane.f32.xlu1 %v1074_v41  ;;  %v7241_v44 = vpop.permute.xlu0 %2443  ;;  %v1062_v41 = vsel %vm1013_vm4, %v6892_v34, 0.0 }
 0x4bc   :  { %v2040_v5 = vpop.xlane.xlu1 %2039  ;;  %1081 = vadd.xlane.f32.xlu1 %v1080_v35 }
 0x4bd   :  { %v2060_v22 = vsub.f32 %v7174_v37, %v2040_v5  ;;  %v8164_v5 = vmov 0.0  }
 0x4bf   :  { %v2069_v48 = vmul.f32 1.442695, %v2060_v22 }
 0x4c1   :  { %6139 = vpow2.f32 %v2069_v48  ;;  %v1071_v48 = vsel %vm1013_vm4, %v6956_v42, 0.0 }
 0x4cd   :  { %1063 = vadd.xlane.f32.xlu0 %v1062_v41  ;;  %2568 = vrot.lane.b32.xlu1 %v5019_v56, %s6333_s11  ;;  %v1083_v41 = vsel %vm1013_vm4, %v7063_v43, 0.0 }
 0x4ce   :  { %v7246_v61 = vpop.eup %6139 }
 0x4cf   :  { %v2108_v22 = vpack.c.bf16 %v7246_v61, %v7246_v61 }
 0x4d0   :  { %v2037_v37 = vpop.xlane.xlu0 %2036 }
 0x4d1   :  { %v2059_v35 = vsub.f32 %v7180_v29, %v2037_v37  ;;  %5670 = vmatmul.mubr.msk.bf16.vlgmr.msra.gmra.mxu1 %vm1013_vm4, %v2108_v22  ;;  %1072 = vadd.xlane.f32.xlu0 %v1071_v48  ;;  %v2397_v37 = vsel %vm1105_vm3, %v7212_v27, 0 }
 0x4d2   :  { %5684 = vmatpush3.bf16.msra.mxu1 %v2289_v31  ;;  %2739 = vrot.lane.b32.xlu1 %v6488_v50, %s6334_s12 }
 0x4d3   :  { %v2067_v34 = vmul.f32 1.442695, %v2059_v35  ;;  %5685 = vmatprep.subr.bf16.mxu1 %v8164_v5  ;;  %5689 = vmatprep.mubr.msk.bf16.mxu1 %vm6329_vm1, %v8164_v5 }
 0x4d4   :  { %v2046_v56 = vpop.xlane.xlu0 %2045 }
 0x4d5   :  { %6141 = vpow2.f32 %v2067_v34  ;;  %v2062_v42 = vsub.f32 %v7184_v54, %v2046_v56  ;;  %1078 = vadd.xlane.f32.xlu0 %v1077_v63  ;;  %v2235_v54 = vsel %vm1105_vm3, %v2228_v51, 0  ;;  %v6252_v51 = vld [vmem:[#allocation6] sm:$0xf]  ;;  %v2496_v63 = vpop.permute.xlu1 %2495 }
 0x4d6   :  { %5686 = vmatpush3.bf16.msra.mxu1 %v2280_v3  ;;  %2799 = vrot.lane.b32.xlu1 %v6511_v1, %s6334_s12  ;;  %v5024_v31 = vcombine.low %v6252_v51, %v6252_v51 }
 0x4d7   :  { %v2073_v29 = vmul.f32 1.442695, %v2062_v42  ;;  %5687 = vmatprep.subr.bf16.mxu1 %v8164_v5 }
 0x4d9   :  { %6143 = vpow2.f32 %v2073_v29  ;;  %1084 = vadd.xlane.f32.xlu0 %v1083_v41  ;;  %v2505_v29 = vsel %vm1105_vm3, %v7230_v60, 0 }
 0x4da   :  { %5688 = vmatpush3.bf16.msra.mxu1 %v2278_v7  ;;  %2797 = vrot.lane.b32.xlu1 %v6499_v59, %s6334_s12 }
 0x4db   :  { %5703 = vmatprep.subr.bf16.mxu1 %v8164_v5 }
 0x4e2   :  { %v7271_v20 = vpop.eup %6141 }
 0x4e3   :  { %v2107_v3 = vpack.c.bf16 %v7271_v20, %v7271_v20 }
 0x4e5   :  { %5660 = vmatmul.mubr.msk.bf16.vlgmr.msra.gmra.mxu0 %vm1013_vm4, %v2107_v3 }
 0x4e6   :  { %v7277_v22 = vpop.eup %6143  ;;  %5674 = vmatpush3.bf16.msra.mxu0 %v2235_v54  ;;  %5679 = vmatprep.mubr.msk.bf16.mxu0 %vm6329_vm1, %v8164_v5 }
 0x4e7   :  { %5675 = vmatprep.subr.bf16.mxu0 %v8164_v5  ;;  %v2110_v7 = vpack.c.bf16 %v7277_v22, %v7277_v22 }
 0x4e8   :  { %v2043_v43 = vpop.xlane.xlu0 %2042 }
 0x4e9   :  { %v2061_v48 = vsub.f32 %v7188_v33, %v2043_v43  ;;  %5690 = vmatmul.mubr.msk.bf16.vlgmr.msra.gmra.mxu1 %vm1013_vm4, %v2110_v7  ;;  %v2083_v7 = vsel %vm1013_vm4, %v7271_v20, 0.0 }
 0x4ea   :  { %5676 = vmatpush3.bf16.msra.mxu0 %v7216_v24  ;;  %5704 = vmatpush3.bf16.msra.mxu1 %v2397_v37  ;;  %v2451_v37 = vsel %vm1105_vm3, %v7241_v44, 0 }
 0x4eb   :  { %v2071_v35 = vmul.f32 1.442695, %v2061_v48  ;;  %5677 = vmatprep.subr.bf16.mxu0 %v8164_v5  ;;  %5705 = vmatprep.subr.bf16.mxu1 %v8164_v5  ;;  %v2092_v48 = vsel %vm1013_vm4, %v7277_v22, 0.0 }
 0x4ec   :  { %v2052_v34 = vpop.xlane.xlu0 %2051  ;;  %5709 = vmatprep.mubr.msk.bf16.mxu1 %vm6329_vm1, %v8164_v5 }
 0x4ed   :  { %6145 = vpow2.f32 %v2071_v35  ;;  %v2064_v27 = vsub.f32 %v7192_v18, %v2052_v34 }
 0x4ee   :  { %5678 = vmatpush3.bf16.msra.mxu0 %v7226_v40  ;;  %5706 = vmatpush3.bf16.msra.mxu1 %v7214_v62  ;;  %v2343_v62 = vsel %vm1105_vm3, %v7232_v32, 0 }
 0x4ef   :  { %v2077_v33 = vmul.f32 1.442695, %v2064_v27  ;;  %2651 = vrot.lane.b32.xlu0 %v5024_v31, %s6333_s11  ;;  %5707 = vmatprep.subr.bf16.mxu1 %v8164_v5 }
 0x4f0   :  { %5693 = vmatprep.subr.bf16.mxu0 %v8164_v5  ;;  %v2442_v20 = vpop.permute.xlu0 %2441 }
 0x4f1   :  { %6147 = vpow2.f32 %v2077_v33 }
 0x4f2   :  { %5708 = vmatpush3.bf16.msra.mxu1 %v7222_v39 }
 0x4f3   :  { %5723 = vmatprep.subr.bf16.mxu1 %v8164_v5 }
 0x4fa   :  { %v6146_v24 = vpop.eup %6145 }
 0x4fb   :  { %v2109_v56 = vpack.c.bf16 %v6146_v24, %v6146_v24  ;;  %v2089_v18 = vsel %vm1013_vm4, %v6146_v24, 0.0 }
 0x4fd   :  { %5680 = vmatmul.mubr.msk.bf16.vlgmr.msra.gmra.mxu0 %vm1013_vm4, %v2109_v56 }
 0x4fe   :  { %v7305_v40 = vpop.eup %6147  ;;  %5694 = vmatpush3.bf16.msra.mxu0 %v2343_v62  ;;  %2090 = vadd.xlane.f32.xlu1 %v2089_v18 }
 0x4ff   :  { %5695 = vmatprep.subr.bf16.mxu0 %v8164_v5  ;;  %v2112_v39 = vpack.c.bf16 %v7305_v40, %v7305_v40  ;;  %5699 = vmatprep.mubr.msk.bf16.mxu0 %vm6329_vm1, %v8164_v5  ;;  %v2098_v62 = vsel %vm1013_vm4, %v7305_v40, 0.0 }
 0x500   :  { %v2049_v42 = vpop.xlane.xlu1 %2048 }
 0x501   :  { %v2063_v32 = vsub.f32 %v7196_v19, %v2049_v42  ;;  %5710 = vmatmul.mubr.msk.bf16.vlgmr.msra.gmra.mxu1 %vm1013_vm4, %v2112_v39 }
 0x502   :  { %5696 = vmatpush3.bf16.msra.mxu0 %v7237_v58  ;;  %5724 = vmatpush3.bf16.msra.mxu1 %v2505_v29  ;;  %v2086_v58 = vsel %vm1013_vm4, %v7246_v61, 0.0 }
 0x503   :  { %v2075_v41 = vmul.f32 1.442695, %v2063_v32  ;;  %5697 = vmatprep.subr.bf16.mxu0 %v8164_v5  ;;  %5725 = vmatprep.subr.bf16.mxu1 %v8164_v5 }
 0x504   :  { %v2058_v3 = vpop.xlane.xlu1 %2057  ;;  %5729 = vmatprep.mubr.msk.bf16.mxu1 %vm6329_vm1, %v8164_v5 }
 0x505   :  { %6149 = vpow2.f32 %v2075_v41  ;;  %v2066_v54 = vsub.f32 %v7202_v0, %v2058_v3 }
 0x506   :  { %5698 = vmatpush3.bf16.msra.mxu0 %v7239_v11  ;;  %5726 = vmatpush3.bf16.msra.mxu1 %v2496_v63 }
 0x507   :  { %v2081_v60 = vmul.f32 1.442695, %v2066_v54  ;;  %5727 = vmatprep.subr.bf16.mxu1 %v8164_v5  ;;  %5713 = vmatprep.subr.bf16.mxu0 %v8164_v5 }
 0x508   :  { %v2494_v19 = vpop.permute.xlu1 %2493 }
 0x509   :  { %6151 = vpow2.f32 %v2081_v60 }
 0x50a   :  { %5728 = vmatpush3.bf16.msra.mxu1 %v2494_v19 }
 0x50e   :  { %2087 = vadd.xlane.f32.xlu0 %v2086_v58 }
 0x512   :  { %v6150_v43 = vpop.eup %6149  ;;  %2084 = vadd.xlane.f32.xlu0 %v2083_v7 }
 0x513   :  { %v2095_v0 = vsel %vm1013_vm4, %v6150_v43, 0.0  ;;  %v2111_v11 = vpack.c.bf16 %v6150_v43, %v6150_v43 }
 0x514   :  { %2096 = vadd.xlane.f32.xlu1 %v2095_v0 }
 0x515   :  { %5700 = vmatmul.mubr.msk.bf16.vlgmr.msra.gmra.mxu0 %vm1013_vm4, %v2111_v11 }
 0x516   :  { %v6152_v51 = vpop.eup %6151  ;;  %5714 = vmatpush3.bf16.msra.mxu0 %v2451_v37  ;;  %2093 = vadd.xlane.f32.xlu0 %v2092_v48 }
 0x517   :  { %5715 = vmatprep.subr.bf16.mxu0 %v8164_v5  ;;  %v2114_v61 = vpack.c.bf16 %v6152_v51, %v6152_v51  ;;  %5719 = vmatprep.mubr.msk.bf16.mxu0 %vm6329_vm1, %v8164_v5  ;;  %v2104_v42 = vsel %vm1013_vm4, %v6152_v51, 0.0 }
 0x519   :  { %5730 = vmatmul.mubr.msk.bf16.vlgmr.msra.gmra.mxu1 %vm1013_vm4, %v2114_v61 }
 0x51a   :  { %5716 = vmatpush3.bf16.msra.mxu0 %v2442_v20 }
 0x51b   :  { %5717 = vmatprep.subr.bf16.mxu0 %v8164_v5 }
 0x521   :  { %v2055_v44 = vpop.xlane.xlu0 %2054 }
 0x522   :  { %v2065_v31 = vsub.f32 %v7208_v46, %v2055_v44 }
 0x524   :  { %v2079_v35 = vmul.f32 1.442695, %v2065_v31 }
 0x525   :  { %v2440_v22 = vpop.permute.xlu0 %2439  ;;  %2795 = vrot.lane.b32.xlu1 %v6520_v6, %s6334_s12 }
 0x526   :  { %6153 = vpow2.f32 %v2079_v35  ;;  %5718 = vmatpush3.bf16.msra.mxu0 %v2440_v22 }
 0x52c   :  { %2737 = vrot.lane.b32.xlu0 %v6493_v53, %s6334_s12 }
 0x533   :  { %v6154_v34 = vpop.eup %6153 }
 0x534   :  { %v2113_v27 = vpack.c.bf16 %v6154_v34, %v6154_v34  ;;  %v2101_v46 = vsel %vm1013_vm4, %v6154_v34, 0.0 }
 0x536   :  { %5720 = vmatmul.mubr.msk.bf16.vlgmr.msra.gmra.mxu0 %vm1013_vm4, %v2113_v27 }
 0x539   :  { %v1067_v33 = vpop.xlane.xlu1 %1066 }
 0x53a   :  { %6155 = vrcp.f32 %v1067_v33 }
 0x53d   :  { %v1070_v24 = vpop.xlane.xlu1 %1069 }
 0x541   :  { %v1076_v56 = vpop.xlane.xlu1 %1075 }
 0x545   :  { %v1082_v18 = vpop.xlane.xlu1 %1081 }
 0x547   :  { %v6156_v41 = vpop.eup %6155 }
 0x548   :  { %v1536_v58 = vmul.f32 %v6156_v41, %v7153_v14 }
 0x549   :  { %2102 = vadd.xlane.f32.xlu1 %v2101_v46  ;;  %v2569_v63 = vpop.permute.xlu1 %2568  ;;  %v8170_v46 = vld [vmem:[#allocation17_spill] sm:$0xff] }
 0x54a   :  { %6093 = vmatprep.subr.msk.bf16.mxu0 %vm1105_vm3, %v2569_v63  ;;  %v2583_v39 = vsel %vm1105_vm3, %v2569_v63, 0  ;;  %v8171_v63 = vld [vmem:[#allocation16_spill] sm:$0xff] }
 0x54b   :  { %2099 = vadd.xlane.f32.xlu0 %v2098_v62  ;;  %5734 = vmatpush3.bf16.msra.mxu0 %v2583_v39  ;;  %v8172_v62 = vld [vmem:[#allocation12_spill] sm:$0xff] }
 0x54c   :  { %5753 = vmatprep.subr.bf16.mxu0 %v8164_v5 }
 0x54d   :  { %v7359_v60 = vpop.permute.xlu1 %2739 }
 0x54f   :  { %2105 = vadd.xlane.f32.xlu0 %v2104_v42 }
 0x551   :  { %v2800_v51 = vpop.permute.xlu1 %2799 }
 0x552   :  { %v2811_v44 = vsel %vm533_vm2, %v2800_v51, 0 }
 0x555   :  { %v2798_v27 = vpop.permute.xlu1 %2797 }
 0x556   :  { %v1064_v29 = vpop.xlane.xlu0 %1063  ;;  %v2808_v33 = vsel %vm533_vm2, %v2798_v27, 0 }
 0x557   :  { %6157 = vrcp.f32 %v1064_v29  ;;  %v8173_v29 = vld [vmem:[#allocation13_spill] sm:$0xff] }
 0x558   :  { %6159 = vrcp.f32 %v1070_v24  ;;  %v8167_v24 = vld [vmem:[#allocation10_spill] sm:$0xff] }
 0x55a   :  { %v1073_v32 = vpop.xlane.xlu0 %1072  ;;  %2919 = vrot.lane.b32.xlu1 %v6540_v17, %s6334_s12 }
 0x55b   :  { %6161 = vrcp.f32 %v1073_v32 }
 0x55c   :  { %6163 = vrcp.f32 %v1076_v56  ;;  %v8168_v56 = vld [vmem:[#allocation15_spill] sm:$0xff] }
 0x55e   :  { %v1079_v40 = vpop.xlane.xlu0 %1078  ;;  %2793 = vrot.lane.b32.xlu1 %v6713_v10, %s6335_s13 }
 0x55f   :  { %6165 = vrcp.f32 %v1079_v40 }
 0x560   :  { %6167 = vrcp.f32 %v1082_v18  ;;  %v8169_v18 = vld [vmem:[#allocation11_spill] sm:$0xff] }
 0x562   :  { %v1085_v3 = vpop.xlane.xlu0 %1084  ;;  %2917 = vrot.lane.b32.xlu1 %v6549_v28, %s6334_s12 }
 0x563   :  { %6169 = vrcp.f32 %v1085_v3 }
 0x564   :  { %v6158_v54 = vpop.eup %6157 }
 0x565   :  { %2735 = vrot.lane.b32.xlu0 %v6482_v45, %s6334_s12  ;;  %v1535_v19 = vmul.f32 %v6158_v54, %v7134_v52  ;;  %v6160_v7 = vpop.eup %6159  ;;  %v8174_v54 = vld [vmem:[#allocation18_spill] sm:$0xff] }
 0x566   :  { %2915 = vrot.lane.b32.xlu1 %v6557_v30, %s6334_s12  ;;  %v2652_v43 = vpop.permute.xlu0 %2651  ;;  %v1537_v52 = vmul.f32 %v6160_v7, %v7164_v25 }
 0x567   :  { %6094 = vmatprep.subr.msk.bf16.mxu1 %vm1105_vm3, %v2652_v43  ;;  %v2666_v0 = vsel %vm1105_vm3, %v2652_v43, 0  ;;  %v1543_v11 = vpack.c.bf16 %v1536_v58, %v1535_v19 }
 0x568   :  { %v6162_v37 = vpop.eup %6161  ;;  %5744 = vmatpush3.bf16.msra.mxu1 %v2666_v0 }
 0x569   :  { %2859 = vrot.lane.b32.xlu0 %v6515_v4, %s6334_s12  ;;  %5745 = vmatprep.mubr.msk.bf16.mxu1 %vm533_vm2, %v1543_v11  ;;  %v1538_v14 = vmul.f32 %v6162_v37, %v7161_v21  ;;  %v6164_v48 = vpop.eup %6163 }
 0x56a   :  { %3039 = vrot.lane.b32.xlu1 %v6583_v55, %s6334_s12  ;;  %5763 = vmatprep.subr.bf16.mxu1 %v8164_v5  ;;  %v1539_v25 = vmul.f32 %v6164_v48, %v7168_v23 }
 0x56b   :  { %v1544_v61 = vpack.c.bf16 %v1538_v14, %v1537_v52 }
 0x56c   :  { %v6166_v20 = vpop.eup %6165 }
 0x56d   :  { %2733 = vrot.lane.b32.xlu0 %v6693_v47, %s6335_s13  ;;  %5746 = vmatmul.mubr.msk.bf16.vlgmr.msra.gmra.mxu1 %vm533_vm2, %v1544_v61  ;;  %v1540_v21 = vmul.f32 %v6166_v20, %v7166_v15  ;;  %v6168_v31 = vpop.eup %6167 }
 0x56e   :  { %5764 = vmatpush3.bf16.xpose.msra.mxu1 %v2811_v44  ;;  %2913 = vrot.lane.b32.xlu1 %v6717_v13, %s6335_s13  ;;  %v1541_v34 = vmul.f32 %v6168_v31, %v7172_v57  ;;  %v8166_v57 = vld [vmem:[#allocation14_spill] sm:$0xff] }
 0x56f   :  { %v1545_v35 = vpack.c.bf16 %v1540_v21, %v1539_v25  ;;  %5765 = vmatprep.subr.bf16.mxu1 %v8164_v5 }
 0x570   :  { %v6170_v22 = vpop.eup %6169 }
 0x571   :  { %2857 = vrot.lane.b32.xlu0 %v6529_v12, %s6334_s12  ;;  %5749 = vmatprep.mubr.msk.bf16.mxu1 %vm533_vm2, %v1545_v35  ;;  %v1542_v23 = vmul.f32 %v6170_v22, %v7170_v8  ;;  %v8165_v8 = vld [vmem:[#allocation9_spill] sm:$0xff] }
 0x572   :  { %3037 = vrot.lane.b32.xlu1 %v6594_v2, %s6334_s12 }
 0x573   :  { %v1546_v15 = vpack.c.bf16 %v1542_v23, %v1541_v34 }
 0x575   :  { %2855 = vrot.lane.b32.xlu0 %v6537_v16, %s6334_s12  ;;  %5750 = vmatmul.mubr.msk.bf16.gmra.mxu1 %vm533_vm2, %v1546_v15 }
 0x576   :  { %5766 = vmatpush3.bf16.xpose.msra.mxu1 %v2808_v33  ;;  %3035 = vrot.lane.b32.xlu1 %v6604_v9, %s6334_s12 }
 0x577   :  { %5767 = vmatprep.subr.bf16.mxu1 %v8164_v5  ;;  %5769 = vmatprep.mubr.msk.bf16.mxu1 %vm6329_vm1, %v8164_v5 }
 0x579   :  { %2979 = vrot.lane.b32.xlu0 %v6563_v36, %s6334_s12 }
 0x57a   :  { %3159 = vrot.lane.b32.xlu1 %v6621_v26, %s6334_s12 }
 0x57d   :  { %2853 = vrot.lane.b32.xlu0 %v6740_v38, %s6335_s13 }
 0x57e   :  { %3033 = vrot.lane.b32.xlu1 %v6750_v49, %s6335_s13 }
 0x581   :  { %2977 = vrot.lane.b32.xlu0 %v8165_v8, %s6334_s12 }
 0x582   :  { %3157 = vrot.lane.b32.xlu1 %v8166_v57, %s6334_s12 }
 0x585   :  { %2975 = vrot.lane.b32.xlu0 %v8167_v24, %s6334_s12 }
 0x586   :  { %3155 = vrot.lane.b32.xlu1 %v8168_v56, %s6334_s12 }
 0x587   :  { %v2091_v3 = vpop.xlane.xlu1 %2090 }
 0x589   :  { %3099 = vrot.lane.b32.xlu0 %v8169_v18, %s6334_s12 }
 0x58a   :  { %3153 = vrot.lane.b32.xlu1 %v8170_v46, %s6335_s13 }
 0x58d   :  { %2973 = vrot.lane.b32.xlu0 %v8171_v63, %s6335_s13 }
 0x58e   :  { %3297 = vrot.lane.b32.xlu1 %v6488_v50, %s6336_s14 }
 0x591   :  { %3097 = vrot.lane.b32.xlu0 %v8172_v62, %s6334_s12  ;;  %v2217_v39 = vpop.f32.mrf.mxu1 }
 0x592   :  { %3295 = vrot.lane.b32.xlu1 %v6493_v53, %s6336_s14 }
 0x593   :  { %v5671_v42 = vpop.f32.mrf.mxu1 }
 0x595   :  { %3095 = vrot.lane.b32.xlu0 %v8173_v29, %s6334_s12  ;;  %v2220_v32 = vpop.f32.mrf.mxu1 }
 0x596   :  { %3293 = vrot.lane.b32.xlu1 %v6482_v45, %s6336_s14 }
 0x597   :  { %v2088_v40 = vpop.xlane.xlu0 %2087  ;;  %v5672_v41 = vpop.f32.mrf.mxu1 }
 0x598   :  { %6171 = vrcp.f32 %v2088_v40  ;;  %v2751_v40 = vsel %vm533_vm2, %v7359_v60, 0 }
 0x599   :  { %3093 = vrot.lane.b32.xlu0 %v8174_v54, %s6335_s13 }
 0x59a   :  { %3347 = vrot.lane.b32.xlu1 %v6520_v6, %s6336_s14 }
 0x59b   :  { %v2085_v19 = vpop.xlane.xlu0 %2084 }
 0x59c   :  { %6173 = vrcp.f32 %v2085_v19 }
 0x59d   :  { %3351 = vrot.lane.b32.xlu0 %v6511_v1, %s6336_s14  ;;  %v2097_v58 = vpop.xlane.xlu1 %2096 }
 0x59e   :  { %3459 = vrot.lane.b32.xlu1 %v6540_v17, %s6336_s14 }
 0x59f   :  { %v2094_v51 = vpop.xlane.xlu0 %2093 }
 0x5a0   :  { %6175 = vrcp.f32 %v2094_v51 }
 0x5a1   :  { %3349 = vrot.lane.b32.xlu0 %v6499_v59, %s6336_s14  ;;  %v2796_v7 = vpop.permute.xlu1 %2795  ;;  %6177 = vrcp.f32 %v2091_v3 }
 0x5a2   :  { %v2805_v43 = vsel %vm533_vm2, %v2796_v7, 0  ;;  %3457 = vrot.lane.b32.xlu1 %v6549_v28, %s6336_s14  ;;  %6179 = vrcp.f32 %v2097_v58 }
 0x5a3   :  { %5768 = vmatpush3.bf16.xpose.msra.mxu1 %v2805_v43  ;;  %v2738_v7 = vpop.permute.xlu0 %2737 }
 0x5a4   :  { %5783 = vmatprep.subr.bf16.mxu1 %v8164_v5 }
 0x5a5   :  { %v2163_v0 = vpop.f32.mrf.mxu0  ;;  %3405 = vrot.lane.b32.xlu0 %v6515_v4, %s6336_s14  ;;  %v6172_v11 = vpop.eup %6171 }
 0x5a6   :  { %3455 = vrot.lane.b32.xlu1 %v6557_v30, %s6336_s14  ;;  %v2556_v20 = vmul.f32 %v6172_v11, %v2217_v39 }
 0x5a7   :  { %v5661_v37 = vpop.f32.mrf.mxu0 }
 0x5a9   :  { %v6174_v52 = vpop.eup %6173  ;;  %v2166_v14 = vpop.f32.mrf.mxu0  ;;  %3403 = vrot.lane.b32.xlu0 %v6529_v12, %s6336_s14 }
 0x5aa   :  { %v2325_v48 = vpop.f32.mrf.mxu1  ;;  %v2555_v61 = vmul.f32 %v6174_v52, %v2163_v0  ;;  %3567 = vrot.lane.b32.xlu1 %v6583_v55, %s6336_s14  ;;  %v2748_v0 = vsel %vm533_vm2, %v2738_v7, 0 }
 0x5ab   :  { %v5662_v44 = vpop.f32.mrf.mxu0 }
 0x5ac   :  { %v5691_v25 = vpop.f32.mrf.mxu1  ;;  %v2563_v21 = vpack.c.bf16 %v2556_v20, %v2555_v61 }
 0x5ad   :  { %3401 = vrot.lane.b32.xlu0 %v6537_v16, %s6336_s14  ;;  %v6176_v22 = vpop.eup %6175 }
 0x5ae   :  { %v2328_v31 = vpop.f32.mrf.mxu1  ;;  %3565 = vrot.lane.b32.xlu1 %v6594_v2, %s6336_s14  ;;  %5735 = vmatprep.mubr.msk.bf16.mxu0 %vm533_vm2, %v2563_v21  ;;  %v6178_v34 = vpop.eup %6177  ;;  %v2558_v27 = vmul.f32 %v6176_v22, %v2325_v48 }
 0x5b0   :  { %v5692_v35 = vpop.f32.mrf.mxu1 }
 0x5b1   :  { %3513 = vrot.lane.b32.xlu0 %v6563_v36, %s6336_s14 }
 0x5b2   :  { %3563 = vrot.lane.b32.xlu1 %v6604_v9, %s6336_s14 }
 0x5b5   :  { %3511 = vrot.lane.b32.xlu0 %v8165_v8, %s6336_s14 }
 0x5b9   :  { %3509 = vrot.lane.b32.xlu0 %v8167_v24, %s6336_s14 }
 0x5bd   :  { %v2271_v23 = vpop.f32.mrf.mxu0  ;;  %3621 = vrot.lane.b32.xlu0 %v8169_v18, %s6336_s14 }
 0x5be   :  { %v2557_v15 = vmul.f32 %v6178_v34, %v2271_v23 }
 0x5bf   :  { %v5681_v33 = vpop.f32.mrf.mxu0 }
 0x5c0   :  { %v2564_v39 = vpack.c.bf16 %v2558_v27, %v2557_v15  ;;  %v6180_v27 = vpop.eup %6179 }
 0x5c1   :  { %v2274_v42 = vpop.f32.mrf.mxu0  ;;  %v2433_v32 = vpop.f32.mrf.mxu1 }
 0x5c2   :  { %5736 = vmatmul.mubr.msk.bf16.vlgmr.msra.gmra.mxu0 %vm533_vm2, %v2564_v39 }
 0x5c3   :  { %5754 = vmatpush3.bf16.xpose.msra.mxu0 %v2751_v40  ;;  %v5682_v41 = vpop.f32.mrf.mxu0  ;;  %v5711_v3 = vpop.f32.mrf.mxu1 }
 0x5c4   :  { %5755 = vmatprep.subr.bf16.mxu0 %v8164_v5 }
 0x5c5   :  { %v2436_v19 = vpop.f32.mrf.mxu1 }
 0x5c7   :  { %v5712_v43 = vpop.f32.mrf.mxu1 }
 0x5cb   :  { %5756 = vmatpush3.bf16.xpose.msra.mxu0 %v2748_v0 }
 0x5cc   :  { %5757 = vmatprep.subr.bf16.mxu0 %v8164_v5 }
 0x5d2   :  { %v2103_v11 = vpop.xlane.xlu1 %2102 }
 0x5d4   :  { %v2100_v37 = vpop.xlane.xlu0 %2099 }
 0x5d5   :  { %6181 = vrcp.f32 %v2100_v37  ;;  %v2379_v60 = vpop.f32.mrf.mxu0 }
 0x5d6   :  { %v2920_v52 = vpop.permute.xlu1 %2919  ;;  %v2559_v39 = vmul.f32 %v6180_v27, %v2379_v60 }
 0x5d7   :  { %v5701_v14 = vpop.f32.mrf.mxu0  ;;  %v2931_v44 = vsel %vm533_vm2, %v2920_v52, 0 }
 0x5d8   :  { %v2106_v48 = vpop.xlane.xlu0 %2105 }
 0x5d9   :  { %v2382_v51 = vpop.f32.mrf.mxu0  ;;  %v2541_v61 = vpop.f32.mrf.mxu1  ;;  %6183 = vrcp.f32 %v2106_v48 }
 0x5da   :  { %v2794_v20 = vpop.permute.xlu1 %2793  ;;  %6185 = vrcp.f32 %v2103_v11 }
 0x5db   :  { %v5702_v25 = vpop.f32.mrf.mxu0  ;;  %v5731_v21 = vpop.f32.mrf.mxu1  ;;  %5770 = vmatmul.mubr.msk.bf16.vlgmr.msra.gmra.mxu1 %vm533_vm2, %v2794_v20 }
 0x5dc   :  { %5784 = vmatpush3.bf16.xpose.msra.mxu1 %v2931_v44  ;;  %v2736_v31 = vpop.permute.xlu0 %2735  ;;  %5789 = vmatprep.mubr.msk.bf16.mxu1 %vm6329_vm1, %v8164_v5 }
 0x5dd   :  { %v2745_v58 = vsel %vm533_vm2, %v2736_v31, 0  ;;  %v2544_v35 = vpop.f32.mrf.mxu1  ;;  %5785 = vmatprep.subr.bf16.mxu1 %v8164_v5 }
 0x5de   :  { %v2918_v22 = vpop.permute.xlu1 %2917  ;;  %5758 = vmatpush3.bf16.xpose.msra.mxu0 %v2745_v58 }
 0x5df   :  { %v5732_v34 = vpop.f32.mrf.mxu1  ;;  %5773 = vmatprep.subr.bf16.mxu0 %v8164_v5  ;;  %v2928_v40 = vsel %vm533_vm2, %v2918_v22, 0 }
 0x5e0   :  { %v2860_v23 = vpop.permute.xlu0 %2859 }
 0x5e2   :  { %v6182_v15 = vpop.eup %6181  ;;  %v2916_v33 = vpop.permute.xlu1 %2915 }
 0x5e3   :  { %v2560_v42 = vmul.f32 %v6182_v15, %v2433_v32  ;;  %v2925_v0 = vsel %vm533_vm2, %v2916_v33, 0 }
 0x5e4   :  { %5786 = vmatpush3.bf16.xpose.msra.mxu1 %v2928_v40  ;;  %v2734_v41 = vpop.permute.xlu0 %2733 }
 0x5e5   :  { %v2565_v3 = vpack.c.bf16 %v2560_v42, %v2559_v39  ;;  %5787 = vmatprep.subr.bf16.mxu1 %v8164_v5  ;;  %v2871_v39 = vsel %vm533_vm2, %v2860_v23, 0 }
 0x5e6   :  { %v3040_v19 = vpop.permute.xlu1 %3039  ;;  %v6184_v14 = vpop.eup %6183 }
 0x5e7   :  { %5739 = vmatprep.mubr.msk.bf16.mxu0 %vm533_vm2, %v2565_v3  ;;  %v3051_v52 = vsel %vm533_vm2, %v3040_v19, 0  ;;  %v6186_v51 = vpop.eup %6185  ;;  %v2562_v44 = vmul.f32 %v6184_v14, %v2541_v61 }
 0x5e8   :  { %v2858_v7 = vpop.permute.xlu0 %2857 }
 0x5e9   :  { %v2868_v19 = vsel %vm533_vm2, %v2858_v7, 0 }
 0x5ea   :  { %v2914_v43 = vpop.permute.xlu1 %2913 }
 0x5ec   :  { %5788 = vmatpush3.bf16.xpose.msra.mxu1 %v2925_v0  ;;  %v2856_v37 = vpop.permute.xlu0 %2855 }
 0x5ed   :  { %5803 = vmatprep.subr.bf16.mxu1 %v8164_v5  ;;  %v2865_v0 = vsel %vm533_vm2, %v2856_v37, 0 }
 0x5ee   :  { %v3038_v32 = vpop.permute.xlu1 %3037 }
 0x5ef   :  { %v3048_v22 = vsel %vm533_vm2, %v3038_v32, 0 }
 0x5f0   :  { %v2980_v60 = vpop.permute.xlu0 %2979 }
 0x5f2   :  { %v3036_v11 = vpop.permute.xlu1 %3035 }
 0x5f3   :  { %5790 = vmatmul.mubr.msk.bf16.vlgmr.msra.gmra.mxu1 %vm533_vm2, %v2914_v43  ;;  %v3045_v42 = vsel %vm533_vm2, %v3036_v11, 0 }
 0x5f4   :  { %5804 = vmatpush3.bf16.xpose.msra.mxu1 %v3051_v52  ;;  %v2854_v48 = vpop.permute.xlu0 %2853  ;;  %5809 = vmatprep.mubr.msk.bf16.mxu1 %vm6329_vm1, %v8164_v5 }
 0x5f5   :  { %5805 = vmatprep.subr.bf16.mxu1 %v8164_v5 }
 0x5f6   :  { %v2487_v20 = vpop.f32.mrf.mxu0  ;;  %v3160_v34 = vpop.permute.xlu1 %3159 }
 0x5f7   :  { %v2561_v25 = vmul.f32 %v6186_v51, %v2487_v20  ;;  %v3171_v43 = vsel %vm533_vm2, %v3160_v34, 0  ;;  %v2991_v51 = vsel %vm533_vm2, %v2980_v60, 0 }
 0x5f8   :  { %v5721_v21 = vpop.f32.mrf.mxu0  ;;  %v2978_v31 = vpop.permute.xlu0 %2977 }
 0x5f9   :  { %v2566_v58 = vpack.c.bf16 %v2562_v44, %v2561_v25  ;;  %v2988_v25 = vsel %vm533_vm2, %v2978_v31, 0 }
 0x5fa   :  { %v2490_v35 = vpop.f32.mrf.mxu0  ;;  %v3034_v33 = vpop.permute.xlu1 %3033 }
 0x5fb   :  { %5740 = vmatmul.mubr.msk.bf16.gmra.mxu0 %vm533_vm2, %v2566_v58 }
 0x5fc   :  { %5806 = vmatpush3.bf16.xpose.msra.mxu1 %v3048_v22  ;;  %v5722_v27 = vpop.f32.mrf.mxu0  ;;  %v2976_v15 = vpop.permute.xlu0 %2975  ;;  %5759 = vmatprep.mubr.msk.bf16.mxu0 %vm6329_vm1, %v8164_v5 }
 0x5fd   :  { %5807 = vmatprep.subr.bf16.mxu1 %v8164_v5  ;;  %v2985_v31 = vsel %vm533_vm2, %v2976_v15, 0 }
 0x5fe   :  { %v3158_v40 = vpop.permute.xlu1 %3157 }
 0x5ff   :  { %v3168_v32 = vsel %vm533_vm2, %v3158_v40, 0 }
 0x600   :  { %v3100_v61 = vpop.permute.xlu0 %3099 }
 0x601   :  { %v3111_v35 = vsel %vm533_vm2, %v3100_v61, 0 }
 0x602   :  { %v3156_v23 = vpop.permute.xlu1 %3155 }
 0x603   :  { %5760 = vmatmul.mubr.msk.bf16.vlgmr.msra.gmra.mxu0 %vm533_vm2, %v2734_v41  ;;  %v3165_v20 = vsel %vm533_vm2, %v3156_v23, 0 }
 0x604   :  { %5774 = vmatpush3.bf16.xpose.msra.mxu0 %v2871_v39  ;;  %5808 = vmatpush3.bf16.xpose.msra.mxu1 %v3045_v42  ;;  %v2974_v3 = vpop.permute.xlu0 %2973 }
 0x605   :  { %5823 = vmatprep.subr.bf16.mxu1 %v8164_v5  ;;  %5775 = vmatprep.subr.bf16.mxu0 %v8164_v5 }
 0x606   :  { %5779 = vmatprep.mubr.msk.bf16.mxu0 %vm6329_vm1, %v8164_v5  ;;  %v3154_v7 = vpop.permute.xlu1 %3153 }
 0x608   :  { %v3098_v41 = vpop.permute.xlu0 %3097 }
 0x609   :  { %v3108_v22 = vsel %vm533_vm2, %v3098_v41, 0 }
 0x60a   :  { %v3298_v14 = vpop.permute.xlu1 %3297 }
 0x60b   :  { %5810 = vmatmul.mubr.msk.bf16.vlgmr.msra.gmra.mxu1 %vm533_vm2, %v3034_v33  ;;  %v3305_v27 = vsel %vm1105_vm3, %v3298_v14, 0 }
 0x60c   :  { %5776 = vmatpush3.bf16.xpose.msra.mxu0 %v2868_v19  ;;  %5824 = vmatpush3.bf16.xpose.msra.mxu1 %v3171_v43  ;;  %v3096_v52 = vpop.permute.xlu0 %3095 }
 0x60d   :  { %5825 = vmatprep.subr.bf16.mxu1 %v8164_v5  ;;  %5777 = vmatprep.subr.bf16.mxu0 %v8164_v5  ;;  %v3105_v34 = vsel %vm533_vm2, %v3096_v52, 0 }
 0x60e   :  { %5829 = vmatprep.mubr.msk.bf16.mxu1 %vm6329_vm1, %v8164_v5  ;;  %v3296_v37 = vpop.permute.xlu1 %3295 }
 0x610   :  { %v3094_v11 = vpop.permute.xlu0 %3093 }
 0x612   :  { %v3294_v60 = vpop.permute.xlu1 %3293 }
 0x614   :  { %5778 = vmatpush3.bf16.xpose.msra.mxu0 %v2865_v0  ;;  %5826 = vmatpush3.bf16.xpose.msra.mxu1 %v3168_v32  ;;  %v3352_v44 = vpop.permute.xlu0 %3351 }
 0x615   :  { %5827 = vmatprep.subr.bf16.mxu1 %v8164_v5  ;;  %5793 = vmatprep.subr.bf16.mxu0 %v8164_v5  ;;  %v3359_v21 = vsel %vm1105_vm3, %v3352_v44, 0 }
 0x616   :  { %v3348_v58 = vpop.permute.xlu1 %3347 }
 0x61b   :  { %5780 = vmatmul.mubr.msk.bf16.vlgmr.msra.gmra.mxu0 %vm533_vm2, %v2854_v48  ;;  %v3350_v48 = vpop.permute.xlu0 %3349 }
 0x61c   :  { %5794 = vmatpush3.bf16.xpose.msra.mxu0 %v2991_v51  ;;  %5828 = vmatpush3.bf16.xpose.msra.mxu1 %v3165_v20 }
 0x61d   :  { %5843 = vmatprep.subr.bf16.mxu1 %v8164_v5  ;;  %5795 = vmatprep.subr.bf16.mxu0 %v8164_v5 }
 0x61e   :  { %5799 = vmatprep.mubr.msk.bf16.mxu0 %vm6329_vm1, %v8164_v5 }
 0x623   :  { %5830 = vmatmul.mubr.msk.bf16.vlgmr.msra.gmra.mxu1 %vm533_vm2, %v3154_v7 }
 0x624   :  { %5796 = vmatpush3.bf16.xpose.msra.mxu0 %v2988_v25  ;;  %5844 = vmatpush3.bf16.msra.mxu1 %v3359_v21 }
 0x625   :  { %5845 = vmatprep.subr.bf16.mxu1 %v8164_v5  ;;  %5797 = vmatprep.subr.bf16.mxu0 %v8164_v5 }
 0x626   :  { %5849 = vmatprep.mubr.msk.bf16.mxu1 %vm6329_vm1, %v8164_v5 }
 0x628   :  { %5846 = vmatpush3.bf16.msra.mxu1 %v3350_v48 }
 0x629   :  { %5847 = vmatprep.subr.bf16.mxu1 %v8164_v5 }
 0x62c   :  { %5798 = vmatpush3.bf16.xpose.msra.mxu0 %v2985_v31  ;;  %5848 = vmatpush3.bf16.msra.mxu1 %v3348_v58 }
 0x62d   :  { %5813 = vmatprep.subr.bf16.mxu0 %v8164_v5  ;;  %5863 = vmatprep.subr.bf16.mxu1 %v8164_v5  ;;  %v7551_v15 = vpop.f32.mrf.mxu1 }
 0x62f   :  { %v7553_v33 = vpop.f32.mrf.mxu1 }
 0x631   :  { %v7555_v61 = vpop.f32.mrf.mxu1 }
 0x632   :  { %8175 = vst [vmem:[#allocation9_spill] sm:$0xff] %v7555_v61 }
 0x633   :  { %5800 = vmatmul.mubr.msk.bf16.vlgmr.msra.gmra.mxu0 %vm533_vm2, %v2974_v3  ;;  %v7557_v39 = vpop.f32.mrf.mxu1 }
 0x634   :  { %5814 = vmatpush3.bf16.xpose.msra.mxu0 %v3111_v35  ;;  %5819 = vmatprep.mubr.msk.bf16.mxu0 %vm6329_vm1, %v8164_v5  ;;  %8176 = vst [vmem:[#allocation14_spill] sm:$0xff] %v7557_v39 }
 0x635   :  { %5815 = vmatprep.subr.bf16.mxu0 %v8164_v5  ;;  %v7559_v42 = vpop.f32.mrf.mxu1 }
 0x636   :  { %8177 = vst [vmem:[#allocation10_spill] sm:$0xff] %v7559_v42 }
 0x637   :  { %v7561_v40 = vpop.f32.mrf.mxu1 }
 0x638   :  { %8178 = vst [vmem:[#allocation15_spill] sm:$0xff] %v7561_v40 }
 0x639   :  { %v7563_v3 = vpop.f32.mrf.mxu1 }
 0x63a   :  { %8179 = vst [vmem:[#allocation11_spill] sm:$0xff] %v7563_v3 }
 0x63b   :  { %v2721_v19 = vpop.f32.mrf.mxu1 }
 0x63c   :  { %5816 = vmatpush3.bf16.xpose.msra.mxu0 %v3108_v22 }
 0x63d   :  { %5817 = vmatprep.subr.bf16.mxu0 %v8164_v5 }
 0x644   :  { %5818 = vmatpush3.bf16.xpose.msra.mxu0 %v3105_v34 }
 0x645   :  { %5833 = vmatprep.subr.bf16.mxu0 %v8164_v5 }
 0x64b   :  { %5820 = vmatmul.mubr.msk.bf16.vlgmr.msra.gmra.mxu0 %vm533_vm2, %v3094_v11 }
 0x64c   :  { %5834 = vmatpush3.bf16.msra.mxu0 %v3305_v27  ;;  %5839 = vmatprep.mubr.msk.bf16.mxu0 %vm6329_vm1, %v8164_v5 }
 0x64d   :  { %5835 = vmatprep.subr.bf16.mxu0 %v8164_v5 }
 0x650   :  { %5836 = vmatpush3.bf16.msra.mxu0 %v3296_v37 }
 0x651   :  { %5837 = vmatprep.subr.bf16.mxu0 %v8164_v5 }
 0x654   :  { %5838 = vmatpush3.bf16.msra.mxu0 %v3294_v60 }
 0x655   :  { %5853 = vmatprep.subr.bf16.mxu0 %v8164_v5 }
 0x682   :  { %v7569_v7 = vpop.f32.mrf.mxu0 }
 0x684   :  { %v7573_v52 = vpop.f32.mrf.mxu0 }
 0x686   :  { %v7579_v51 = vpop.f32.mrf.mxu0 }
 0x687   :  { %8180 = vst [vmem:[#allocation17_spill] sm:$0xff] %v7579_v51 }
 0x688   :  { %v7581_v44 = vpop.f32.mrf.mxu0 }
 0x689   :  { %8181 = vst [vmem:[#allocation16_spill] sm:$0xff] %v7581_v44 }
 0x69b   :  { %v7565_v43 = vpop.f32.mrf.mxu1 }
 0x69c   :  { %v3216_v23 = vsel %vm1013_vm4, %v7565_v43, -inf }
 0x69d   :  { %3217 = vmax.xlane.f32.xlu1 %v3216_v23  ;;  %v5771_v41 = vpop.f32.mrf.mxu1 }
 0x69f   :  { %v2850_v0 = vpop.f32.mrf.mxu1 }
 0x6a1   :  { %v5772_v32 = vpop.f32.mrf.mxu1 }
 0x6ae   :  { %3675 = vrot.lane.b32.xlu1 %v6621_v26, %s6336_s14 }
 0x6b3   :  { %v7575_v14 = vpop.f32.mrf.mxu1 }
 0x6b4   :  { %v3222_v11 = vsel %vm1013_vm4, %v7575_v14, -inf }
 0x6b5   :  { %3223 = vmax.xlane.f32.xlu0 %v3222_v11  ;;  %v5791_v20 = vpop.f32.mrf.mxu1 }
 0x6b7   :  { %v2970_v37 = vpop.f32.mrf.mxu1 }
 0x6b9   :  { %v5792_v25 = vpop.f32.mrf.mxu1 }
 0x6bb   :  { %v7583_v21 = vpop.f32.mrf.mxu0 }
 0x6bc   :  { %8182 = vst [vmem:[#allocation12_spill] sm:$0xff] %v7583_v21 }
 0x6bd   :  { %v7585_v60 = vpop.f32.mrf.mxu0 }
 0x6be   :  { %8183 = vst [vmem:[#allocation13_spill] sm:$0xff] %v7585_v60 }
 0x6bf   :  { %v7587_v48 = vpop.f32.mrf.mxu0 }
 0x6c0   :  { %8184 = vst [vmem:[#allocation18_spill] sm:$0xff] %v7587_v48 }
 0x6c1   :  { %v2638_v31 = vpop.f32.mrf.mxu0 }
 0x6c2   :  { %v7589_v58 = vadd.f32 %v2721_v19, %v2638_v31 }
 0x6c3   :  { %v7591_v35 = vpop.f32.mrf.mxu0 }
 0x6c4   :  { %8185 = vst [vmem:[#allocation19_spill] sm:$0xff] %v7589_v58  ;;  %v3213_v11 = vsel %vm1013_vm4, %v7591_v35, -inf }
 0x6c5   :  { %v5761_v22 = vpop.f32.mrf.mxu0 }
 0x6c7   :  { %v2790_v34 = vpop.f32.mrf.mxu0 }
 0x6c9   :  { %v5762_v27 = vpop.f32.mrf.mxu0 }
 0x6cb   :  { %v7593_v23 = vpop.f32.mrf.mxu1 }
 0x6cc   :  { %v3228_v41 = vsel %vm1013_vm4, %v7593_v23, -inf }
 0x6cd   :  { %3229 = vmax.xlane.f32.xlu0 %v3228_v41  ;;  %v5811_v0 = vpop.f32.mrf.mxu1 }
 0x6cf   :  { %v3090_v32 = vpop.f32.mrf.mxu1 }
 0x6d1   :  { %3214 = vmax.xlane.f32.xlu0 %v3213_v11  ;;  %v5812_v20 = vpop.f32.mrf.mxu1 }
 0x6db   :  { %v7599_v19 = vpop.f32.mrf.mxu0 }
 0x6dc   :  { %v3219_v37 = vsel %vm1013_vm4, %v7599_v19, -inf }
 0x6dd   :  { %v5781_v25 = vpop.f32.mrf.mxu0  ;;  %3220 = vmax.xlane.f32.xlu0 %v3219_v37 }
 0x6df   :  { %v2910_v31 = vpop.f32.mrf.mxu0 }
 0x6e1   :  { %v5782_v22 = vpop.f32.mrf.mxu0 }
 0x6e2   :  { %v3460_v22 = vpop.permute.xlu1 %3459 }
 0x6e3   :  { %v7603_v34 = vpop.f32.mrf.mxu1 }
 0x6e4   :  { %v3234_v27 = vsel %vm1013_vm4, %v7603_v34, -inf }
 0x6e5   :  { %3235 = vmax.xlane.f32.xlu1 %v3234_v27  ;;  %v5831_v41 = vpop.f32.mrf.mxu1 }
 0x6e6   :  { %v3458_v27 = vpop.permute.xlu1 %3457 }
 0x6e7   :  { %v3210_v0 = vpop.f32.mrf.mxu1 }
 0x6e9   :  { %v5832_v32 = vpop.f32.mrf.mxu1 }
 0x6ea   :  { %v3456_v58 = vpop.permute.xlu1 %3455 }
 0x6f3   :  { %v7607_v11 = vpop.f32.mrf.mxu0  ;;  %3619 = vrot.lane.b32.xlu0 %v8172_v62, %s6336_s14 }
 0x6f4   :  { %v3225_v20 = vsel %vm1013_vm4, %v7607_v11, -inf }
 0x6f5   :  { %v5801_v37 = vpop.f32.mrf.mxu0  ;;  %3226 = vmax.xlane.f32.xlu1 %v3225_v20  ;;  %v7621_v20 = vpop.permute.xlu0 %3405 }
 0x6f7   :  { %v3030_v25 = vpop.f32.mrf.mxu0 }
 0x6f8   :  { %v3568_v25 = vpop.permute.xlu1 %3567 }
 0x6f9   :  { %v5802_v31 = vpop.f32.mrf.mxu0 }
 0x6fa   :  { %v7623_v31 = vpop.permute.xlu0 %3403 }
 0x6fc   :  { %v3566_v48 = vpop.permute.xlu1 %3565 }
 0x6fe   :  { %v7625_v40 = vpop.permute.xlu0 %3401 }
 0x700   :  { %v3564_v60 = vpop.permute.xlu1 %3563 }
 0x706   :  { %3673 = vrot.lane.b32.xlu1 %v8166_v57, %s6336_s14 }
 0x70a   :  { %3671 = vrot.lane.b32.xlu1 %v8168_v56, %s6336_s14 }
 0x70b   :  { %v7617_v41 = vpop.f32.mrf.mxu0 }
 0x70c   :  { %v3231_v37 = vsel %vm1013_vm4, %v7617_v41, -inf }
 0x70d   :  { %v5821_v0 = vpop.f32.mrf.mxu0 }
 0x70e   :  { %v7628_v0 = vpop.permute.xlu0 %3513 }
 0x70f   :  { %v3150_v32 = vpop.f32.mrf.mxu0 }
 0x711   :  { %v5822_v3 = vpop.f32.mrf.mxu0 }
 0x712   :  { %3232 = vmax.xlane.f32.xlu0 %v3231_v37  ;;  %v7632_v32 = vpop.permute.xlu0 %3511 }
 0x716   :  { %v7634_v37 = vpop.permute.xlu0 %3509 }
 0x71a   :  { %v7637_v51 = vpop.permute.xlu0 %3621 }
 0x726   :  { %v3218_v42 = vpop.xlane.xlu1 %3217 }
 0x727   :  { %v3238_v21 = vsub.f32 %v7565_v43, %v3218_v42  ;;  %v3467_v42 = vsel %vm1105_vm3, %v3460_v22, 0 }
 0x728   :  { %3617 = vrot.lane.b32.xlu0 %v8173_v29, %s6336_s14 }
 0x729   :  { %v3247_v3 = vmul.f32 1.442695, %v3238_v21 }
 0x72b   :  { %6187 = vpow2.f32 %v3247_v3 }
 0x738   :  { %v6188_v39 = vpop.eup %6187 }
 0x739   :  { %v3264_v44 = vsel %vm1013_vm4, %v6188_v39, 0.0  ;;  %v3286_v61 = vpack.c.bf16 %v6188_v39, %v6188_v39  ;;  %v6253_v39 = vld [vmem:[#allocation6 + $0x8] sm:$0xf] }
 0x73a   :  { %3265 = vadd.xlane.f32.xlu1 %v3264_v44  ;;  %v5045_v44 = vcombine.low %v6253_v39, %v6253_v39 }
 0x73b   :  { %5850 = vmatmul.mubr.msk.bf16.vlgmr.msra.gmra.mxu1 %vm1013_vm4, %v3286_v61 }
 0x73c   :  { %5864 = vmatpush3.bf16.msra.mxu1 %v3467_v42  ;;  %5869 = vmatprep.mubr.msk.bf16.mxu1 %vm6329_vm1, %v8164_v5 }
 0x73d   :  { %5865 = vmatprep.subr.bf16.mxu1 %v8164_v5 }
 0x73e   :  { %v3224_v43 = vpop.xlane.xlu0 %3223 }
 0x73f   :  { %v3240_v21 = vsub.f32 %v7575_v14, %v3224_v43 }
 0x740   :  { %5866 = vmatpush3.bf16.msra.mxu1 %v3458_v27  ;;  %v3575_v27 = vsel %vm1105_vm3, %v3568_v25, 0 }
 0x741   :  { %v3251_v3 = vmul.f32 1.442695, %v3240_v21  ;;  %5867 = vmatprep.subr.bf16.mxu1 %v8164_v5 }
 0x743   :  { %6189 = vpow2.f32 %v3251_v3 }
 0x744   :  { %5868 = vmatpush3.bf16.msra.mxu1 %v3456_v58 }
 0x745   :  { %5883 = vmatprep.subr.bf16.mxu1 %v8164_v5 }
 0x74b   :  { %3746 = vrot.lane.b32.xlu1 %v5045_v44, %s6333_s11 }
 0x74f   :  { %3902 = vrot.lane.b32.xlu1 %v6511_v1, %s6337_s15 }
 0x750   :  { %v6190_v61 = vpop.eup %6189 }
 0x751   :  { %v3270_v22 = vsel %vm1013_vm4, %v6190_v61, 0.0  ;;  %v3288_v14 = vpack.c.bf16 %v6190_v61, %v6190_v61  ;;  %v3676_v61 = vpop.permute.xlu1 %3675 }
 0x752   :  { %3271 = vadd.xlane.f32.xlu0 %v3270_v22 }
 0x753   :  { %5870 = vmatmul.mubr.msk.bf16.vlgmr.msra.gmra.mxu1 %vm1013_vm4, %v3288_v14  ;;  %3840 = vrot.lane.b32.xlu1 %v6493_v53, %s6337_s15 }
 0x754   :  { %5884 = vmatpush3.bf16.msra.mxu1 %v3575_v27  ;;  %5889 = vmatprep.mubr.msk.bf16.mxu1 %vm6329_vm1, %v8164_v5  ;;  %v3683_v27 = vsel %vm1105_vm3, %v3676_v61, 0 }
 0x755   :  { %5885 = vmatprep.subr.bf16.mxu1 %v8164_v5 }
 0x756   :  { %v3230_v58 = vpop.xlane.xlu0 %3229 }
 0x757   :  { %v3242_v42 = vsub.f32 %v7593_v23, %v3230_v58  ;;  %3838 = vrot.lane.b32.xlu1 %v6482_v45, %s6337_s15  ;;  %v3413_v58 = vsel %vm1105_vm3, %v7621_v20, 0 }
 0x758   :  { %5886 = vmatpush3.bf16.msra.mxu1 %v3566_v48 }
 0x759   :  { %v3255_v43 = vmul.f32 1.442695, %v3242_v42  ;;  %5887 = vmatprep.subr.bf16.mxu1 %v8164_v5 }
 0x75a   :  { %v3215_v25 = vpop.xlane.xlu0 %3214 }
 0x75b   :  { %6191 = vpow2.f32 %v3255_v43  ;;  %v3237_v21 = vsub.f32 %v7591_v35, %v3215_v25 }
 0x75c   :  { %5888 = vmatpush3.bf16.msra.mxu1 %v3564_v60 }
 0x75d   :  { %v3245_v3 = vmul.f32 1.442695, %v3237_v21  ;;  %5903 = vmatprep.subr.bf16.mxu1 %v8164_v5 }
 0x75f   :  { %6193 = vpow2.f32 %v3245_v3 }
 0x766   :  { %v3221_v39 = vpop.xlane.xlu0 %3220 }
 0x767   :  { %v3239_v44 = vsub.f32 %v7599_v19, %v3221_v39 }
 0x768   :  { %v6192_v23 = vpop.eup %6191 }
 0x769   :  { %v3249_v22 = vmul.f32 1.442695, %v3239_v44  ;;  %v3276_v48 = vsel %vm1013_vm4, %v6192_v23, 0.0  ;;  %v3290_v14 = vpack.c.bf16 %v6192_v23, %v6192_v23 }
 0x76a   :  { %3277 = vadd.xlane.f32.xlu0 %v3276_v48 }
 0x76b   :  { %6195 = vpow2.f32 %v3249_v22  ;;  %5890 = vmatmul.mubr.msk.bf16.vlgmr.msra.gmra.mxu1 %vm1013_vm4, %v3290_v14  ;;  %v3620_v14 = vpop.permute.xlu0 %3619 }
 0x76c   :  { %v6194_v60 = vpop.eup %6193  ;;  %5904 = vmatpush3.bf16.msra.mxu1 %v3683_v27  ;;  %5909 = vmatprep.mubr.msk.bf16.mxu1 %vm6329_vm1, %v8164_v5 }
 0x76d   :  { %v3285_v35 = vpack.c.bf16 %v6194_v60, %v6194_v60  ;;  %5905 = vmatprep.subr.bf16.mxu1 %v8164_v5  ;;  %v3261_v44 = vsel %vm1013_vm4, %v6194_v60, 0.0 }
 0x76e   :  { %v3236_v19 = vpop.xlane.xlu1 %3235 }
 0x76f   :  { %v3244_v42 = vsub.f32 %v7603_v34, %v3236_v19  ;;  %5840 = vmatmul.mubr.msk.bf16.vlgmr.msra.gmra.mxu0 %vm1013_vm4, %v3285_v35  ;;  %v3521_v34 = vsel %vm1105_vm3, %v7628_v0, 0 }
 0x770   :  { %5854 = vmatpush3.bf16.msra.mxu0 %v3413_v58  ;;  %5859 = vmatprep.mubr.msk.bf16.mxu0 %vm6329_vm1, %v8164_v5 }
 0x771   :  { %v3259_v43 = vmul.f32 1.442695, %v3244_v42  ;;  %5855 = vmatprep.subr.bf16.mxu0 %v8164_v5 }
 0x773   :  { %6197 = vpow2.f32 %v3259_v43 }
 0x774   :  { %5856 = vmatpush3.bf16.msra.mxu0 %v7623_v31 }
 0x775   :  { %5857 = vmatprep.subr.bf16.mxu0 %v8164_v5 }
 0x778   :  { %v6196_v25 = vpop.eup %6195  ;;  %5858 = vmatpush3.bf16.msra.mxu0 %v7625_v40 }
 0x779   :  { %v3287_v20 = vpack.c.bf16 %v6196_v25, %v6196_v25  ;;  %5873 = vmatprep.subr.bf16.mxu0 %v8164_v5  ;;  %v3267_v23 = vsel %vm1013_vm4, %v6196_v25, 0.0 }
 0x77b   :  { %5860 = vmatmul.mubr.msk.bf16.vlgmr.msra.gmra.mxu0 %vm1013_vm4, %v3287_v20 }
 0x77c   :  { %5874 = vmatpush3.bf16.msra.mxu0 %v3521_v34  ;;  %5879 = vmatprep.mubr.msk.bf16.mxu0 %vm6329_vm1, %v8164_v5 }
 0x77d   :  { %5875 = vmatprep.subr.bf16.mxu0 %v8164_v5 }
 0x77e   :  { %v3227_v31 = vpop.xlane.xlu1 %3226 }
 0x77f   :  { %v3241_v21 = vsub.f32 %v7607_v11, %v3227_v31 }
 0x780   :  { %v6198_v3 = vpop.eup %6197  ;;  %5876 = vmatpush3.bf16.msra.mxu0 %v7632_v32 }
 0x781   :  { %v3253_v40 = vmul.f32 1.442695, %v3241_v21  ;;  %5877 = vmatprep.subr.bf16.mxu0 %v8164_v5  ;;  %v3282_v39 = vsel %vm1013_vm4, %v6198_v3, 0.0  ;;  %v3292_v32 = vpack.c.bf16 %v6198_v3, %v6198_v3 }
 0x782   :  { %3283 = vadd.xlane.f32.xlu0 %v3282_v39  ;;  %v3674_v0 = vpop.permute.xlu1 %3673 }
 0x783   :  { %6199 = vpow2.f32 %v3253_v40  ;;  %5906 = vmatpush3.bf16.msra.mxu1 %v3674_v0 }
 0x784   :  { %5878 = vmatpush3.bf16.msra.mxu0 %v7634_v37  ;;  %5907 = vmatprep.subr.bf16.mxu1 %v8164_v5  ;;  %v3629_v37 = vsel %vm1105_vm3, %v7637_v51, 0 }
 0x785   :  { %5893 = vmatprep.subr.bf16.mxu0 %v8164_v5 }
 0x786   :  { %3262 = vadd.xlane.f32.xlu0 %v3261_v44  ;;  %v3672_v11 = vpop.permute.xlu1 %3671 }
 0x787   :  { %5908 = vmatpush3.bf16.msra.mxu1 %v3672_v11 }
 0x78a   :  { %3268 = vadd.xlane.f32.xlu0 %v3267_v23  ;;  %5910 = vmatmul.mubr.msk.bf16.vlgmr.msra.gmra.mxu1 %vm1013_vm4, %v3292_v32 }
 0x790   :  { %v6200_v61 = vpop.eup %6199 }
 0x791   :  { %v3289_v22 = vpack.c.bf16 %v6200_v61, %v6200_v61  ;;  %v3273_v48 = vsel %vm1013_vm4, %v6200_v61, 0.0 }
 0x792   :  { %3274 = vadd.xlane.f32.xlu1 %v3273_v48 }
 0x793   :  { %5880 = vmatmul.mubr.msk.bf16.vlgmr.msra.gmra.mxu0 %vm1013_vm4, %v3289_v22 }
 0x794   :  { %5894 = vmatpush3.bf16.msra.mxu0 %v3629_v37  ;;  %5899 = vmatprep.mubr.msk.bf16.mxu0 %vm6329_vm1, %v8164_v5 }
 0x795   :  { %5895 = vmatprep.subr.bf16.mxu0 %v8164_v5 }
 0x798   :  { %5896 = vmatpush3.bf16.msra.mxu0 %v3620_v14 }
 0x799   :  { %5897 = vmatprep.subr.bf16.mxu0 %v8164_v5 }
 0x79b   :  { %v3233_v27 = vpop.xlane.xlu0 %3232 }
 0x79c   :  { %v3243_v60 = vsub.f32 %v7617_v41, %v3233_v27 }
 0x79e   :  { %v3257_v35 = vmul.f32 1.442695, %v3243_v60 }
 0x79f   :  { %v3618_v19 = vpop.permute.xlu0 %3617 }
 0x7a0   :  { %6201 = vpow2.f32 %v3257_v35  ;;  %3842 = vrot.lane.b32.xlu0 %v6488_v50, %s6337_s15  ;;  %5898 = vmatpush3.bf16.msra.mxu0 %v3618_v19 }
 0x7a1   :  { %5923 = vmatprep.subr.bf16.mxu0 %v8164_v5 }
 0x7a4   :  { %3900 = vrot.lane.b32.xlu0 %v6499_v59, %s6337_s15 }
 0x7a8   :  { %3898 = vrot.lane.b32.xlu0 %v6520_v6, %s6337_s15 }
 0x7ac   :  { %4022 = vrot.lane.b32.xlu0 %v6540_v17, %s6337_s15 }
 0x7ad   :  { %v6202_v51 = vpop.eup %6201 }
 0x7ae   :  { %v3291_v41 = vpack.c.bf16 %v6202_v51, %v6202_v51  ;;  %v3279_v58 = vsel %vm1013_vm4, %v6202_v51, 0.0 }
 0x7af   :  { %3280 = vadd.xlane.f32.xlu1 %v3279_v58 }
 0x7b0   :  { %3896 = vrot.lane.b32.xlu0 %v6713_v10, %s6338_s16  ;;  %5900 = vmatmul.mubr.msk.bf16.vlgmr.msra.gmra.mxu0 %vm1013_vm4, %v3291_v41 }
 0x7b1   :  { %5929 = vmatprep.mubr.msk.bf16.mxu0 %vm6329_vm1, %v8164_v5 }
 0x7b4   :  { %4020 = vrot.lane.b32.xlu0 %v6549_v28, %s6337_s15 }
 0x7b8   :  { %4018 = vrot.lane.b32.xlu0 %v6557_v30, %s6337_s15 }
 0x7bc   :  { %4142 = vrot.lane.b32.xlu0 %v6583_v55, %s6337_s15 }
 0x7c0   :  { %4016 = vrot.lane.b32.xlu0 %v6717_v13, %s6338_s16  ;;  %3962 = vrot.lane.b32.xlu1 %v6515_v4, %s6337_s15 }
 0x7c3   :  { %v3266_v10 = vpop.xlane.xlu1 %3265 }
 0x7c4   :  { %4140 = vrot.lane.b32.xlu0 %v6594_v2, %s6337_s15  ;;  %3836 = vrot.lane.b32.xlu1 %v6693_v47, %s6338_s16  ;;  %6203 = vrcp.f32 %v3266_v10 }
 0x7c7   :  { %v3747_v42 = vpop.permute.xlu1 %3746 }
 0x7c8   :  { %4138 = vrot.lane.b32.xlu0 %v6604_v9, %s6337_s15  ;;  %3960 = vrot.lane.b32.xlu1 %v6529_v12, %s6337_s15  ;;  %v3761_v43 = vsel %vm1105_vm3, %v3747_v42, 0 }
 0x7c9   :  { %6095 = vmatprep.subr.msk.bf16.mxu1 %vm1105_vm3, %v3747_v42 }
 0x7ca   :  { %5914 = vmatpush3.bf16.msra.mxu1 %v3761_v43 }
 0x7cb   :  { %5933 = vmatprep.subr.bf16.mxu1 %v8164_v5 }
 0x7cc   :  { %4262 = vrot.lane.b32.xlu0 %v6621_v26, %s6337_s15  ;;  %3958 = vrot.lane.b32.xlu1 %v6537_v16, %s6337_s15 }
 0x7d0   :  { %4136 = vrot.lane.b32.xlu0 %v6750_v49, %s6338_s16  ;;  %4082 = vrot.lane.b32.xlu1 %v6563_v36, %s6337_s15 }
 0x7d1   :  { %v6204_v34 = vpop.eup %6203 }
 0x7d4   :  { %4260 = vrot.lane.b32.xlu0 %v8166_v57, %s6337_s15  ;;  %3956 = vrot.lane.b32.xlu1 %v6740_v38, %s6338_s16 }
 0x7d8   :  { %4258 = vrot.lane.b32.xlu0 %v8168_v56, %s6337_s15  ;;  %4080 = vrot.lane.b32.xlu1 %v8165_v8, %s6337_s15 }
 0x7dc   :  { %4256 = vrot.lane.b32.xlu0 %v8170_v46, %s6338_s16  ;;  %4078 = vrot.lane.b32.xlu1 %v8167_v24, %s6337_s15 }
 0x7e0   :  { %4400 = vrot.lane.b32.xlu0 %v6488_v50, %s6339_s17  ;;  %4202 = vrot.lane.b32.xlu1 %v8169_v18, %s6337_s15 }
 0x7e4   :  { %4398 = vrot.lane.b32.xlu0 %v6493_v53, %s6339_s17  ;;  %4076 = vrot.lane.b32.xlu1 %v8171_v63, %s6338_s16 }
 0x7e8   :  { %4450 = vrot.lane.b32.xlu0 %v6520_v6, %s6339_s17  ;;  %4200 = vrot.lane.b32.xlu1 %v8172_v62, %s6337_s15 }
 0x7ec   :  { %4562 = vrot.lane.b32.xlu0 %v6540_v17, %s6339_s17  ;;  %4198 = vrot.lane.b32.xlu1 %v8173_v29, %s6337_s15  ;;  %v3272_v17 = vpop.xlane.xlu0 %3271 }
 0x7f0   :  { %4506 = vrot.lane.b32.xlu0 %v6529_v12, %s6339_s17  ;;  %4196 = vrot.lane.b32.xlu1 %v8174_v54, %s6338_s16 }
 0x7f4   :  { %4558 = vrot.lane.b32.xlu0 %v6557_v30, %s6339_s17  ;;  %4454 = vrot.lane.b32.xlu1 %v6511_v1, %s6339_s17  ;;  %v7797_v1 = vpop.xlane.xlu0 %3277 }
 0x7f8   :  { %4670 = vrot.lane.b32.xlu0 %v6583_v55, %s6339_s17  ;;  %4452 = vrot.lane.b32.xlu1 %v6499_v59, %s6339_s17 }
 0x7fb   :  { %v3395_v50 = vpop.f32.mrf.mxu1 }
 0x7fc   :  { %4396 = vrot.lane.b32.xlu1 %v6482_v45, %s6339_s17  ;;  %v3734_v3 = vmul.f32 %v6204_v34, %v3395_v50 }
 0x7fd   :  { %v5851_v53 = vpop.f32.mrf.mxu1 }
 0x7ff   :  { %v3398_v6 = vpop.f32.mrf.mxu1 }
 0x800   :  { %4508 = vrot.lane.b32.xlu1 %v6515_v4, %s6339_s17  ;;  %v3903_v4 = vpop.permute.xlu1 %3902 }
 0x801   :  { %v5852_v12 = vpop.f32.mrf.mxu1  ;;  %v3914_v43 = vsel %vm533_vm2, %v3903_v4, 0 }
 0x804   :  { %4560 = vrot.lane.b32.xlu1 %v6549_v28, %s6339_s17  ;;  %v3841_v46 = vpop.permute.xlu1 %3840 }
 0x808   :  { %4504 = vrot.lane.b32.xlu1 %v6537_v16, %s6339_s17  ;;  %v3851_v16 = vsel %vm533_vm2, %v3841_v46, 0 }
 0x80b   :  { %v7801_v59 = vpop.xlane.xlu0 %3283 }
 0x80c   :  { %4616 = vrot.lane.b32.xlu1 %v6563_v36, %s6339_s17  ;;  %v3839_v36 = vpop.permute.xlu1 %3838 }
 0x80d   :  { %v3848_v63 = vsel %vm533_vm2, %v3839_v36, 0 }
 0x80f   :  { %v3263_v45 = vpop.xlane.xlu0 %3262 }
 0x810   :  { %6205 = vrcp.f32 %v3263_v45 }
 0x811   :  { %6207 = vrcp.f32 %v3272_v17 }
 0x813   :  { %v3269_v30 = vpop.xlane.xlu0 %3268  ;;  %v3503_v55 = vpop.f32.mrf.mxu1 }
 0x814   :  { %6209 = vrcp.f32 %v3269_v30 }
 0x815   :  { %v5871_v47 = vpop.f32.mrf.mxu1  ;;  %6211 = vrcp.f32 %v7797_v1 }
 0x817   :  { %v3843_v13 = vpop.permute.xlu0 %3842  ;;  %v3506_v38 = vpop.f32.mrf.mxu1 }
 0x818   :  { %v3854_v49 = vsel %vm533_vm2, %v3843_v13, 0 }
 0x819   :  { %v5872_v28 = vpop.f32.mrf.mxu1  ;;  %5924 = vmatpush3.bf16.xpose.msra.mxu0 %v3854_v49 }
 0x81a   :  { %5925 = vmatprep.subr.bf16.mxu0 %v8164_v5 }
 0x81b   :  { %v3901_v25 = vpop.permute.xlu0 %3900  ;;  %v3275_v61 = vpop.xlane.xlu1 %3274 }
 0x81c   :  { %6213 = vrcp.f32 %v3275_v61  ;;  %v3911_v45 = vsel %vm533_vm2, %v3901_v25, 0 }
 0x81d   :  { %v6206_v31 = vpop.eup %6205  ;;  %6215 = vrcp.f32 %v7801_v59 }
 0x81e   :  { %v6208_v14 = vpop.eup %6207 }
 0x81f   :  { %v3899_v44 = vpop.permute.xlu0 %3898  ;;  %v3736_v35 = vmul.f32 %v6208_v14, %v3503_v55 }
 0x820   :  { %v3908_v1 = vsel %vm533_vm2, %v3899_v44, 0 }
 0x821   :  { %5926 = vmatpush3.bf16.xpose.msra.mxu0 %v3851_v16  ;;  %v6210_v27 = vpop.eup %6209 }
 0x822   :  { %5927 = vmatprep.subr.bf16.mxu0 %v8164_v5  ;;  %v6212_v36 = vpop.eup %6211 }
 0x823   :  { %v7814_v48 = vpop.permute.xlu0 %4022 }
 0x827   :  { %v7818_v58 = vpop.permute.xlu0 %3896 }
 0x829   :  { %5928 = vmatpush3.bf16.xpose.msra.mxu0 %v3848_v63  ;;  %v6214_v63 = vpop.eup %6213 }
 0x82a   :  { %5943 = vmatprep.subr.bf16.mxu0 %v8164_v5 }
 0x82b   :  { %v7811_v54 = vpop.f32.mrf.mxu1  ;;  %v7828_v12 = vpop.permute.xlu0 %4020 }
 0x82d   :  { %v5891_v20 = vpop.f32.mrf.mxu1 }
 0x82e   :  { %v3738_v20 = vmul.f32 %v6212_v36, %v7811_v54 }
 0x82f   :  { %v3341_v21 = vpop.f32.mrf.mxu0  ;;  %v3614_v39 = vpop.f32.mrf.mxu1 }
 0x830   :  { %v3733_v40 = vmul.f32 %v6206_v31, %v3341_v21  ;;  %v7833_v47 = vpop.permute.xlu0 %4018 }
 0x831   :  { %v5841_v0 = vpop.f32.mrf.mxu0  ;;  %v5892_v32 = vpop.f32.mrf.mxu1  ;;  %v4028_v36 = vsel %vm533_vm2, %v7833_v47, 0 }
 0x832   :  { %v3741_v11 = vpack.c.bf16 %v3734_v3, %v3733_v40 }
 0x833   :  { %v3344_v23 = vpop.f32.mrf.mxu0 }
 0x834   :  { %5915 = vmatprep.mubr.msk.bf16.mxu1 %vm533_vm2, %v3741_v11  ;;  %v7838_v28 = vpop.permute.xlu0 %4142 }
 0x835   :  { %v5842_v22 = vpop.f32.mrf.mxu0 }
 0x838   :  { %v7816_v37 = vpop.xlane.xlu1 %3280  ;;  %v7844_v3 = vpop.permute.xlu0 %4016 }
 0x839   :  { %6217 = vrcp.f32 %v7816_v37 }
 0x83b   :  { %v3449_v60 = vpop.f32.mrf.mxu0 }
 0x83c   :  { %v3735_v19 = vmul.f32 %v6210_v27, %v3449_v60  ;;  %v3963_v51 = vpop.permute.xlu1 %3962  ;;  %v7852_v54 = vpop.permute.xlu0 %4140 }
 0x83d   :  { %v5861_v41 = vpop.f32.mrf.mxu0  ;;  %v3974_v53 = vsel %vm533_vm2, %v3963_v51, 0  ;;  %v4151_v47 = vsel %vm533_vm2, %v7852_v54, 0 }
 0x83e   :  { %v3742_v10 = vpack.c.bf16 %v3736_v35, %v3735_v19  ;;  %v6216_v19 = vpop.eup %6215 }
 0x83f   :  { %v3452_v42 = vpop.f32.mrf.mxu0 }
 0x840   :  { %v3837_v50 = vpop.permute.xlu1 %3836  ;;  %5916 = vmatmul.mubr.msk.bf16.vlgmr.msra.gmra.mxu1 %vm533_vm2, %v3742_v10  ;;  %v7856_v61 = vpop.permute.xlu0 %4138 }
 0x841   :  { %5934 = vmatpush3.bf16.xpose.msra.mxu1 %v3914_v43  ;;  %v5862_v6 = vpop.f32.mrf.mxu0  ;;  %5930 = vmatmul.mubr.msk.bf16.vlgmr.msra.gmra.mxu0 %vm533_vm2, %v3837_v50 }
 0x842   :  { %5944 = vmatpush3.bf16.xpose.msra.mxu0 %v3974_v53  ;;  %5935 = vmatprep.subr.bf16.mxu1 %v8164_v5 }
 0x843   :  { %5945 = vmatprep.subr.bf16.mxu0 %v8164_v5  ;;  %5949 = vmatprep.mubr.msk.bf16.mxu0 %vm6329_vm1, %v8164_v5 }
 0x844   :  { %v3961_v17 = vpop.permute.xlu1 %3960  ;;  %v7860_v14 = vpop.permute.xlu0 %4262 }
 0x845   :  { %v3971_v30 = vsel %vm533_vm2, %v3961_v17, 0 }
 0x846   :  { %v6218_v59 = vpop.eup %6217 }
 0x848   :  { %v3959_v55 = vpop.permute.xlu1 %3958  ;;  %v7864_v35 = vpop.permute.xlu0 %4136 }
 0x849   :  { %5936 = vmatpush3.bf16.xpose.msra.mxu1 %v3911_v45  ;;  %v3968_v16 = vsel %vm533_vm2, %v3959_v55, 0 }
 0x84a   :  { %5946 = vmatpush3.bf16.xpose.msra.mxu0 %v3971_v30  ;;  %v3719_v4 = vpop.f32.mrf.mxu1  ;;  %5937 = vmatprep.subr.bf16.mxu1 %v8164_v5 }
 0x84b   :  { %5947 = vmatprep.subr.bf16.mxu0 %v8164_v5  ;;  %v3740_v41 = vmul.f32 %v6216_v19, %v3719_v4  ;;  %v4034_v4 = vsel %vm533_vm2, %v7814_v48, 0 }
 0x84c   :  { %v5911_v13 = vpop.f32.mrf.mxu1  ;;  %v4083_v49 = vpop.permute.xlu1 %4082 }
 0x84d   :  { %v4094_v0 = vsel %vm533_vm2, %v4083_v49, 0  ;;  %v4261_v53 = vpop.permute.xlu0 %4260 }
 0x84e   :  { %v3722_v38 = vpop.f32.mrf.mxu1 }
 0x850   :  { %v5912_v46 = vpop.f32.mrf.mxu1  ;;  %v3957_v31 = vpop.permute.xlu1 %3956 }
 0x851   :  { %5938 = vmatpush3.bf16.xpose.msra.mxu1 %v3908_v1  ;;  %v4259_v55 = vpop.permute.xlu0 %4258  ;;  %v4031_v1 = vsel %vm533_vm2, %v7828_v12, 0 }
 0x852   :  { %5948 = vmatpush3.bf16.xpose.msra.mxu0 %v3968_v16  ;;  %5953 = vmatprep.subr.bf16.mxu1 %v8164_v5 }
 0x853   :  { %v3557_v25 = vpop.f32.mrf.mxu0  ;;  %5963 = vmatprep.subr.bf16.mxu0 %v8164_v5 }
 0x854   :  { %v3737_v34 = vmul.f32 %v6214_v63, %v3557_v25  ;;  %v4081_v11 = vpop.permute.xlu1 %4080  ;;  %v4154_v25 = vsel %vm533_vm2, %v7838_v28, 0  ;;  %v4274_v28 = vsel %vm533_vm2, %v7860_v14, 0 }
 0x855   :  { %v5881_v21 = vpop.f32.mrf.mxu0  ;;  %v4091_v32 = vsel %vm533_vm2, %v4081_v11, 0  ;;  %v4257_v38 = vpop.permute.xlu0 %4256 }
 0x856   :  { %v3743_v40 = vpack.c.bf16 %v3738_v20, %v3737_v34  ;;  %v4148_v20 = vsel %vm533_vm2, %v7856_v61, 0  ;;  %v4271_v34 = vsel %vm533_vm2, %v4261_v53, 0  ;;  %v8187_v61 = vld [vmem:[#allocation9_spill] sm:$0xff] }
 0x857   :  { %v3560_v39 = vpop.f32.mrf.mxu0 }
 0x858   :  { %5919 = vmatprep.mubr.msk.bf16.mxu1 %vm533_vm2, %v3743_v40  ;;  %v4079_v23 = vpop.permute.xlu1 %4078  ;;  %v2711_v40 = vadd.f32 %v7551_v15, %v7569_v7  ;;  %v8188_v7 = vld [vmem:[#allocation16_spill] sm:$0xff] }
 0x859   :  { %5950 = vmatmul.mubr.msk.bf16.vlgmr.msra.gmra.mxu0 %vm533_vm2, %v3957_v31  ;;  %v5882_v44 = vpop.f32.mrf.mxu0  ;;  %v4088_v27 = vsel %vm533_vm2, %v4079_v23, 0  ;;  %v4401_v46 = vpop.permute.xlu0 %4400  ;;  %v4268_v31 = vsel %vm533_vm2, %v4259_v55, 0  ;;  %v8186_v23 = vld [vmem:[#allocation17_spill] sm:$0xff] }
 0x85a   :  { %5964 = vmatpush3.bf16.xpose.msra.mxu0 %v4094_v0  ;;  %5969 = vmatprep.mubr.msk.bf16.mxu0 %vm6329_vm1, %v8164_v5  ;;  %v2703_v0 = vadd.f32 %v7553_v33, %v7573_v52 }
 0x85b   :  { %5965 = vmatprep.subr.bf16.mxu0 %v8164_v5 }
 0x85c   :  { %v4203_v22 = vpop.permute.xlu1 %4202 }
 0x85d   :  { %v4214_v10 = vsel %vm533_vm2, %v4203_v22, 0  ;;  %v4399_v12 = vpop.permute.xlu0 %4398  ;;  %v2714_v22 = vadd.f32 %v8187_v61, %v8186_v23 }
 0x860   :  { %v4077_v60 = vpop.permute.xlu1 %4076 }
 0x862   :  { %5966 = vmatpush3.bf16.xpose.msra.mxu0 %v4091_v32 }
 0x863   :  { %5967 = vmatprep.subr.bf16.mxu0 %v8164_v5 }
 0x864   :  { %v4201_v43 = vpop.permute.xlu1 %4200 }
 0x865   :  { %v4211_v45 = vsel %vm533_vm2, %v4201_v43, 0 }
 0x868   :  { %v4199_v30 = vpop.permute.xlu1 %4198 }
 0x869   :  { %v4208_v49 = vsel %vm533_vm2, %v4199_v30, 0 }
 0x86a   :  { %5968 = vmatpush3.bf16.xpose.msra.mxu0 %v4088_v27 }
 0x86b   :  { %5983 = vmatprep.subr.bf16.mxu0 %v8164_v5 }
 0x86c   :  { %v4197_v13 = vpop.permute.xlu1 %4196 }
 0x870   :  { %v3665_v51 = vpop.f32.mrf.mxu0  ;;  %v4455_v48 = vpop.permute.xlu1 %4454 }
 0x871   :  { %v3739_v37 = vmul.f32 %v6218_v59, %v3665_v51  ;;  %5970 = vmatmul.mubr.msk.bf16.vlgmr.msra.gmra.mxu0 %vm533_vm2, %v4077_v60  ;;  %v4462_v21 = vsel %vm1105_vm3, %v4455_v48, 0  ;;  %v8189_v60 = vld [vmem:[#allocation14_spill] sm:$0xff] }
 0x872   :  { %5984 = vmatpush3.bf16.xpose.msra.mxu0 %v4214_v10  ;;  %v5901_v42 = vpop.f32.mrf.mxu0  ;;  %5989 = vmatprep.mubr.msk.bf16.mxu0 %vm6329_vm1, %v8164_v5 }
 0x873   :  { %v3744_v50 = vpack.c.bf16 %v3740_v41, %v3739_v37  ;;  %5985 = vmatprep.subr.bf16.mxu0 %v8164_v5 }
 0x874   :  { %v3668_v6 = vpop.f32.mrf.mxu0  ;;  %v4453_v16 = vpop.permute.xlu1 %4452 }
 0x875   :  { %5920 = vmatmul.mubr.msk.bf16.gmra.mxu1 %vm533_vm2, %v3744_v50 }
 0x876   :  { %v5902_v17 = vpop.f32.mrf.mxu0  ;;  %5939 = vmatprep.mubr.msk.bf16.mxu1 %vm6329_vm1, %v8164_v5 }
 0x877   :  { %v8190_v17 = vld [vmem:[#allocation12_spill] sm:$0xff] }
 0x878   :  { %v4397_v63 = vpop.permute.xlu1 %4396 }
 0x87a   :  { %5986 = vmatpush3.bf16.xpose.msra.mxu0 %v4211_v45  ;;  %v8191_v45 = vld [vmem:[#allocation10_spill] sm:$0xff] }
 0x87b   :  { %5987 = vmatprep.subr.bf16.mxu0 %v8164_v5  ;;  %v2727_v30 = vadd.f32 %v8191_v45, %v8190_v17 }
 0x87d   :  { %5940 = vmatmul.mubr.msk.bf16.vlgmr.msra.gmra.mxu1 %vm533_vm2, %v7818_v58  ;;  %v4408_v58 = vsel %vm1105_vm3, %v4401_v46, 0 }
 0x87e   :  { %5954 = vmatpush3.bf16.xpose.msra.mxu1 %v4034_v4  ;;  %5959 = vmatprep.mubr.msk.bf16.mxu1 %vm6329_vm1, %v8164_v5 }
 0x87f   :  { %5955 = vmatprep.subr.bf16.mxu1 %v8164_v5 }
 0x882   :  { %5988 = vmatpush3.bf16.xpose.msra.mxu0 %v4208_v49 }
 0x883   :  { %6003 = vmatprep.subr.bf16.mxu0 %v8164_v5 }
 0x886   :  { %5956 = vmatpush3.bf16.xpose.msra.mxu1 %v4031_v1 }
 0x887   :  { %5957 = vmatprep.subr.bf16.mxu1 %v8164_v5 }
 0x889   :  { %5990 = vmatmul.mubr.msk.bf16.vlgmr.msra.gmra.mxu0 %vm533_vm2, %v4197_v13  ;;  %v8192_v13 = vld [vmem:[#allocation13_spill] sm:$0xff] }
 0x88a   :  { %6004 = vmatpush3.bf16.msra.mxu0 %v4408_v58  ;;  %6009 = vmatprep.mubr.msk.bf16.mxu0 %vm6329_vm1, %v8164_v5  ;;  %v8194_v58 = vld [vmem:[#allocation18_spill] sm:$0xff] }
 0x88b   :  { %6005 = vmatprep.subr.bf16.mxu0 %v8164_v5 }
 0x88e   :  { %5958 = vmatpush3.bf16.xpose.msra.mxu1 %v4028_v36  ;;  %6006 = vmatpush3.bf16.msra.mxu0 %v4399_v12 }
 0x88f   :  { %6007 = vmatprep.subr.bf16.mxu0 %v8164_v5  ;;  %5973 = vmatprep.subr.bf16.mxu1 %v8164_v5 }
 0x892   :  { %6008 = vmatpush3.bf16.msra.mxu0 %v4397_v63 }
 0x893   :  { %6023 = vmatprep.subr.bf16.mxu0 %v8164_v5 }
 0x895   :  { %5960 = vmatmul.mubr.msk.bf16.vlgmr.msra.gmra.mxu1 %vm533_vm2, %v7844_v3  ;;  %v4451_v3 = vpop.permute.xlu0 %4450 }
 0x896   :  { %5974 = vmatpush3.bf16.xpose.msra.mxu1 %v4154_v25  ;;  %5979 = vmatprep.mubr.msk.bf16.mxu1 %vm6329_vm1, %v8164_v5 }
 0x897   :  { %5975 = vmatprep.subr.bf16.mxu1 %v8164_v5 }
 0x89e   :  { %5976 = vmatpush3.bf16.xpose.msra.mxu1 %v4151_v47 }
 0x89f   :  { %5977 = vmatprep.subr.bf16.mxu1 %v8164_v5 }
 0x8a6   :  { %5978 = vmatpush3.bf16.xpose.msra.mxu1 %v4148_v20  ;;  %v8196_v20 = vld [vmem:[#allocation19_spill] sm:$0xff] }
 0x8a7   :  { %5993 = vmatprep.subr.bf16.mxu1 %v8164_v5 }
 0x8ad   :  { %5980 = vmatmul.mubr.msk.bf16.vlgmr.msra.gmra.mxu1 %vm533_vm2, %v7864_v35  ;;  %v2706_v35 = vadd.f32 %v8189_v60, %v8188_v7 }
 0x8ae   :  { %5994 = vmatpush3.bf16.xpose.msra.mxu1 %v4274_v28  ;;  %5999 = vmatprep.mubr.msk.bf16.mxu1 %vm6329_vm1, %v8164_v5 }
 0x8af   :  { %5995 = vmatprep.subr.bf16.mxu1 %v8164_v5 }
 0x8b6   :  { %5996 = vmatpush3.bf16.xpose.msra.mxu1 %v4271_v34 }
 0x8b7   :  { %5997 = vmatprep.subr.bf16.mxu1 %v8164_v5 }
 0x8be   :  { %5998 = vmatpush3.bf16.xpose.msra.mxu1 %v4268_v31 }
 0x8bf   :  { %6013 = vmatprep.subr.bf16.mxu1 %v8164_v5 }
 0x8c5   :  { %6000 = vmatmul.mubr.msk.bf16.vlgmr.msra.gmra.mxu1 %vm533_vm2, %v4257_v38  ;;  %v8193_v38 = vld [vmem:[#allocation15_spill] sm:$0xff] }
 0x8c6   :  { %6014 = vmatpush3.bf16.msra.mxu1 %v4462_v21  ;;  %6019 = vmatprep.mubr.msk.bf16.mxu1 %vm6329_vm1, %v8164_v5  ;;  %v2719_v49 = vadd.f32 %v8193_v38, %v8192_v13 }
 0x8c7   :  { %6015 = vmatprep.subr.bf16.mxu1 %v8164_v5 }
 0x8ca   :  { %6016 = vmatpush3.bf16.msra.mxu1 %v4453_v16  ;;  %v8195_v16 = vld [vmem:[#allocation11_spill] sm:$0xff] }
 0x8cb   :  { %6017 = vmatprep.subr.bf16.mxu1 %v8164_v5  ;;  %v2730_v36 = vadd.f32 %v8195_v16, %v8194_v58 }
 0x8ce   :  { %6018 = vmatpush3.bf16.msra.mxu1 %v4451_v3 }
 0x8cf   :  { %6033 = vmatprep.subr.bf16.mxu1 %v8164_v5 }
 0x900   :  { %v5917_v39 = vpop.f32.mrf.mxu1 }
 0x901   :  { %v7933_v44 = vadd.f32 %v5917_v39, %v2711_v40  ;;  %v7935_v11 = vpop.f32.mrf.mxu0 }
 0x902   :  { %v3797_v54 = vpop.f32.mrf.mxu1  ;;  %v4316_v32 = vsel %vm1013_vm4, %v7935_v11, -inf }
 0x903   :  { %v7941_v14 = vadd.f32 %v3797_v54, %v2703_v0  ;;  %4317 = vmax.xlane.f32.xlu1 %v4316_v32  ;;  %v5931_v27 = vpop.f32.mrf.mxu0 }
 0x904   :  { %v5918_v15 = vpop.f32.mrf.mxu1 }
 0x905   :  { %v7945_v33 = vadd.f32 %v5918_v15, %v2714_v22  ;;  %v3893_v52 = vpop.f32.mrf.mxu0 }
 0x906   :  { %v3800_v19 = vpop.f32.mrf.mxu1 }
 0x907   :  { %v7947_v59 = vadd.f32 %v3800_v19, %v2706_v35  ;;  %v5932_v51 = vpop.f32.mrf.mxu0 }
 0x919   :  { %v7949_v41 = vpop.f32.mrf.mxu0 }
 0x91a   :  { %v4322_v10 = vsel %vm1013_vm4, %v7949_v41, -inf }
 0x91b   :  { %4323 = vmax.xlane.f32.xlu0 %v4322_v10  ;;  %v5951_v37 = vpop.f32.mrf.mxu0 }
 0x91d   :  { %v4013_v42 = vpop.f32.mrf.mxu0 }
 0x91f   :  { %v5952_v43 = vpop.f32.mrf.mxu0 }
 0x920   :  { %v4563_v43 = vpop.permute.xlu0 %4562 }
 0x931   :  { %v7953_v50 = vpop.f32.mrf.mxu0 }
 0x932   :  { %v4328_v53 = vsel %vm1013_vm4, %v7953_v50, -inf }
 0x933   :  { %4329 = vmax.xlane.f32.xlu1 %v4328_v53  ;;  %v5971_v6 = vpop.f32.mrf.mxu0 }
 0x935   :  { %v4133_v55 = vpop.f32.mrf.mxu0  ;;  %v5921_v4 = vpop.f32.mrf.mxu1 }
 0x936   :  { %v7961_v1 = vadd.f32 %v5921_v4, %v2727_v30 }
 0x937   :  { %v5972_v48 = vpop.f32.mrf.mxu0  ;;  %v3813_v46 = vpop.f32.mrf.mxu1 }
 0x938   :  { %v7965_v12 = vadd.f32 %v3813_v46, %v2719_v49 }
 0x939   :  { %v5922_v63 = vpop.f32.mrf.mxu1 }
 0x93a   :  { %v7967_v25 = vadd.f32 %v5922_v63, %v2730_v36 }
 0x93b   :  { %v3816_v47 = vpop.f32.mrf.mxu1 }
 0x93c   :  { %v7970_v28 = vadd.f32 %v3816_v47, %v8196_v20 }
 0x93d   :  { %v7972_v34 = vpop.f32.mrf.mxu1 }
 0x93e   :  { %v4319_v31 = vsel %vm1013_vm4, %v7972_v34, -inf }
 0x93f   :  { %4320 = vmax.xlane.f32.xlu0 %v4319_v31  ;;  %v5941_v21 = vpop.f32.mrf.mxu1 }
 0x941   :  { %v3953_v3 = vpop.f32.mrf.mxu1 }
 0x943   :  { %v5942_v40 = vpop.f32.mrf.mxu1 }
 0x949   :  { %v7976_v39 = vpop.f32.mrf.mxu0 }
 0x94a   :  { %v4334_v0 = vsel %vm1013_vm4, %v7976_v39, -inf }
 0x94b   :  { %4335 = vmax.xlane.f32.xlu1 %v4334_v0  ;;  %v5991_v54 = vpop.f32.mrf.mxu0  ;;  %v4570_v0 = vsel %vm1105_vm3, %v4563_v43, 0 }
 0x94d   :  { %v4253_v32 = vpop.f32.mrf.mxu0 }
 0x94f   :  { %v5992_v23 = vpop.f32.mrf.mxu0 }
 0x955   :  { %v7980_v61 = vpop.f32.mrf.mxu1  ;;  %4668 = vrot.lane.b32.xlu0 %v6594_v2, %s6339_s17 }
 0x956   :  { %v4325_v22 = vsel %vm1013_vm4, %v7980_v61, -inf }
 0x957   :  { %4326 = vmax.xlane.f32.xlu1 %v4325_v22  ;;  %v5961_v27 = vpop.f32.mrf.mxu1 }
 0x959   :  { %v4073_v15 = vpop.f32.mrf.mxu1  ;;  %4666 = vrot.lane.b32.xlu0 %v6604_v9, %s6339_s17  ;;  %v4509_v9 = vpop.permute.xlu1 %4508 }
 0x95a   :  { %v4516_v4 = vsel %vm1105_vm3, %v4509_v9, 0 }
 0x95b   :  { %v5962_v7 = vpop.f32.mrf.mxu1 }
 0x95d   :  { %4778 = vrot.lane.b32.xlu0 %v6621_v26, %s6339_s17 }
 0x968   :  { %4614 = vrot.lane.b32.xlu1 %v8165_v8, %s6339_s17  ;;  %v8004_v8 = vpop.permute.xlu1 %4560 }
 0x96c   :  { %4612 = vrot.lane.b32.xlu1 %v8167_v24, %s6339_s17  ;;  %v4505_v24 = vpop.permute.xlu1 %4504 }
 0x96d   :  { %v7994_v2 = vpop.f32.mrf.mxu1 }
 0x96e   :  { %v4331_v26 = vsel %vm1013_vm4, %v7994_v2, -inf }
 0x96f   :  { %v5981_v60 = vpop.f32.mrf.mxu1 }
 0x970   :  { %4724 = vrot.lane.b32.xlu1 %v8169_v18, %s6339_s17  ;;  %v4617_v18 = vpop.permute.xlu1 %4616 }
 0x971   :  { %v4193_v35 = vpop.f32.mrf.mxu1  ;;  %v4624_v46 = vsel %vm1105_vm3, %v4617_v18, 0 }
 0x973   :  { %v5982_v52 = vpop.f32.mrf.mxu1 }
 0x974   :  { %4722 = vrot.lane.b32.xlu1 %v8172_v62, %s6339_s17 }
 0x978   :  { %4720 = vrot.lane.b32.xlu1 %v8173_v29, %s6339_s17  ;;  %v4507_v29 = vpop.permute.xlu0 %4506 }
 0x97c   :  { %4332 = vmax.xlane.f32.xlu0 %v4331_v26  ;;  %v4559_v6 = vpop.permute.xlu0 %4558 }
 0x980   :  { %v8012_v55 = vpop.permute.xlu0 %4670 }
 0x985   :  { %v8006_v19 = vpop.f32.mrf.mxu1 }
 0x986   :  { %v4337_v38 = vsel %vm1013_vm4, %v8006_v19, -inf }
 0x987   :  { %v6001_v51 = vpop.f32.mrf.mxu1 }
 0x988   :  { %v4678_v51 = vsel %vm1105_vm3, %v8012_v55, 0 }
 0x989   :  { %v4313_v10 = vpop.f32.mrf.mxu1 }
 0x98b   :  { %v6002_v37 = vpop.f32.mrf.mxu1 }
 0x98c   :  { %v4318_v42 = vpop.xlane.xlu1 %4317 }
 0x98d   :  { %v4340_v62 = vsub.f32 %v7935_v11, %v4318_v42 }
 0x98f   :  { %v4348_v53 = vmul.f32 1.442695, %v4340_v62  ;;  %v6254_v62 = vld [vmem:[#allocation6 + $0xc] sm:$0xf] }
 0x990   :  { %v5066_v43 = vcombine.low %v6254_v62, %v6254_v62 }
 0x991   :  { %6219 = vpow2.f32 %v4348_v53 }
 0x992   :  { %4776 = vrot.lane.b32.xlu0 %v8166_v57, %s6339_s17 }
 0x99e   :  { %v6220_v17 = vpop.eup %6219 }
 0x99f   :  { %v4388_v45 = vpack.c.bf16 %v6220_v17, %v6220_v17  ;;  %v4364_v30 = vsel %vm1013_vm4, %v6220_v17, 0.0 }
 0x9a0   :  { %4365 = vadd.xlane.f32.xlu1 %v4364_v30 }
 0x9a1   :  { %6010 = vmatmul.mubr.msk.bf16.vlgmr.msra.gmra.mxu0 %vm1013_vm4, %v4388_v45 }
 0x9a2   :  { %6024 = vmatpush3.bf16.msra.mxu0 %v4516_v4  ;;  %6029 = vmatprep.mubr.msk.bf16.mxu0 %vm6329_vm1, %v8164_v5 }
 0x9a3   :  { %6025 = vmatprep.subr.bf16.mxu0 %v8164_v5 }
 0x9a4   :  { %v4324_v57 = vpop.xlane.xlu0 %4323 }
 0x9a5   :  { %v4342_v11 = vsub.f32 %v7949_v41, %v4324_v57 }
 0x9a6   :  { %6026 = vmatpush3.bf16.msra.mxu0 %v4507_v29 }
 0x9a7   :  { %v4352_v13 = vmul.f32 1.442695, %v4342_v11  ;;  %6027 = vmatprep.subr.bf16.mxu0 %v8164_v5 }
 0x9a9   :  { %6221 = vpow2.f32 %v4352_v13 }
 0x9aa   :  { %6028 = vmatpush3.bf16.msra.mxu0 %v4505_v24 }
 0x9ab   :  { %6043 = vmatprep.subr.bf16.mxu0 %v8164_v5 }
 0x9b1   :  { %4338 = vmax.xlane.f32.xlu0 %v4337_v38 }
 0x9b6   :  { %v6222_v49 = vpop.eup %6221 }
 0x9b7   :  { %v4390_v48 = vpack.c.bf16 %v6222_v49, %v6222_v49  ;;  %v4370_v54 = vsel %vm1013_vm4, %v6222_v49, 0.0 }
 0x9b9   :  { %6030 = vmatmul.mubr.msk.bf16.vlgmr.msra.gmra.mxu0 %vm1013_vm4, %v4390_v48 }
 0x9ba   :  { %6044 = vmatpush3.bf16.msra.mxu0 %v4624_v46  ;;  %6049 = vmatprep.mubr.msk.bf16.mxu0 %vm6329_vm1, %v8164_v5  ;;  %v6255_v46 = vld [vmem:[%s8130_s3] ss:$0 sm:$0xff] }
 0x9bb   :  { %6045 = vmatprep.subr.bf16.mxu0 %v8164_v5 }
 0x9bc   :  { %v4330_v36 = vpop.xlane.xlu1 %4329 }
 0x9bd   :  { %v4344_v63 = vsub.f32 %v7953_v50, %v4330_v36 }
 0x9bf   :  { %v4356_v20 = vmul.f32 1.442695, %v4344_v63 }
 0x9c7   :  { %4774 = vrot.lane.b32.xlu0 %v8168_v56, %s6339_s17 }
 0x9c8   :  { %v4321_v41 = vpop.xlane.xlu0 %4320 }
 0x9c9   :  { %v4341_v58 = vsub.f32 %v7972_v34, %v4321_v41 }
 0x9cb   :  { %v4350_v16 = vmul.f32 1.442695, %v4341_v58 }
 0x9cc   :  { %v4669_v18 = vpop.permute.xlu0 %4668 }
 0x9cd   :  { %6223 = vpow2.f32 %v4350_v16 }
 0x9ce   :  { %6225 = vpow2.f32 %v4356_v20 }
 0x9d0   :  { %v4667_v37 = vpop.permute.xlu0 %4666 }
 0x9d4   :  { %v4336_v47 = vpop.xlane.xlu1 %4335  ;;  %v4779_v42 = vpop.permute.xlu0 %4778 }
 0x9d5   :  { %v4346_v31 = vsub.f32 %v7976_v39, %v4336_v47  ;;  %v4786_v55 = vsel %vm1105_vm3, %v4779_v42, 0 }
 0x9d7   :  { %v4360_v21 = vmul.f32 1.442695, %v4346_v31 }
 0x9d9   :  { %6227 = vpow2.f32 %v4360_v21 }
 0x9da   :  { %v6224_v3 = vpop.eup %6223 }
 0x9db   :  { %v4389_v40 = vpack.c.bf16 %v6224_v3, %v6224_v3  ;;  %v6226_v32 = vpop.eup %6225  ;;  %v4367_v52 = vsel %vm1013_vm4, %v6224_v3, 0.0 }
 0x9dc   :  { %v4392_v27 = vpack.c.bf16 %v6226_v32, %v6226_v32 }
 0x9dd   :  { %6020 = vmatmul.mubr.msk.bf16.vlgmr.msra.gmra.mxu1 %vm1013_vm4, %v4389_v40 }
 0x9de   :  { %6034 = vmatpush3.bf16.msra.mxu1 %v4570_v0  ;;  %6039 = vmatprep.mubr.msk.bf16.mxu1 %vm6329_vm1, %v8164_v5 }
 0x9df   :  { %6035 = vmatprep.subr.bf16.mxu1 %v8164_v5 }
 0x9e0   :  { %v4327_v56 = vpop.xlane.xlu1 %4326 }
 0x9e1   :  { %v4343_v50 = vsub.f32 %v7980_v61, %v4327_v56  ;;  %v4376_v61 = vsel %vm1013_vm4, %v6226_v32, 0.0 }
 0x9e2   :  { %6036 = vmatpush3.bf16.msra.mxu1 %v8004_v8 }
 0x9e3   :  { %v4354_v34 = vmul.f32 1.442695, %v4343_v50  ;;  %6037 = vmatprep.subr.bf16.mxu1 %v8164_v5 }
 0x9e4   :  { %v4615_v39 = vpop.permute.xlu1 %4614 }
 0x9e5   :  { %6229 = vpow2.f32 %v4354_v34  ;;  %6046 = vmatpush3.bf16.msra.mxu0 %v4615_v39 }
 0x9e6   :  { %6038 = vmatpush3.bf16.msra.mxu1 %v4559_v6  ;;  %4371 = vadd.xlane.f32.xlu0 %v4370_v54  ;;  %v6228_v22 = vpop.eup %6227 }
 0x9e7   :  { %6047 = vmatprep.subr.bf16.mxu0 %v8164_v5  ;;  %6053 = vmatprep.subr.bf16.mxu1 %v8164_v5  ;;  %v4382_v60 = vsel %vm1013_vm4, %v6228_v22, 0.0  ;;  %v4394_v10 = vpack.c.bf16 %v6228_v22, %v6228_v22 }
 0x9e8   :  { %v4613_v23 = vpop.permute.xlu1 %4612 }
 0x9e9   :  { %6048 = vmatpush3.bf16.msra.mxu0 %v4613_v23 }
 0x9ea   :  { %4377 = vadd.xlane.f32.xlu0 %v4376_v61  ;;  %6063 = vmatprep.subr.bf16.mxu0 %v8164_v5 }
 0x9ec   :  { %6050 = vmatmul.mubr.msk.bf16.vlgmr.msra.gmra.mxu0 %vm1013_vm4, %v4392_v27  ;;  %v4725_v15 = vpop.permute.xlu1 %4724 }
 0x9ed   :  { %v4732_v7 = vsel %vm1105_vm3, %v4725_v15, 0  ;;  %6069 = vmatprep.mubr.msk.bf16.mxu0 %vm6329_vm1, %v8164_v5 }
 0x9ee   :  { %6064 = vmatpush3.bf16.msra.mxu0 %v4732_v7  ;;  %4383 = vadd.xlane.f32.xlu0 %v4382_v60 }
 0x9ef   :  { %6065 = vmatprep.subr.bf16.mxu0 %v8164_v5 }
 0x9f0   :  { %v4723_v35 = vpop.permute.xlu1 %4722 }
 0x9f2   :  { %v6230_v9 = vpop.eup %6229  ;;  %6066 = vmatpush3.bf16.msra.mxu0 %v4723_v35  ;;  %4368 = vadd.xlane.f32.xlu0 %v4367_v52 }
 0x9f3   :  { %v4391_v26 = vpack.c.bf16 %v6230_v9, %v6230_v9  ;;  %v4373_v8 = vsel %vm1013_vm4, %v6230_v9, 0.0  ;;  %6067 = vmatprep.subr.bf16.mxu0 %v8164_v5 }
 0x9f4   :  { %4374 = vadd.xlane.f32.xlu1 %v4373_v8  ;;  %v4721_v24 = vpop.permute.xlu1 %4720 }
 0x9f5   :  { %6040 = vmatmul.mubr.msk.bf16.vlgmr.msra.gmra.mxu1 %vm1013_vm4, %v4391_v26 }
 0x9f6   :  { %6054 = vmatpush3.bf16.msra.mxu1 %v4678_v51  ;;  %6068 = vmatpush3.bf16.msra.mxu0 %v4721_v24 }
 0x9f7   :  { %6055 = vmatprep.subr.bf16.mxu1 %v8164_v5  ;;  %6059 = vmatprep.mubr.msk.bf16.mxu1 %vm6329_vm1, %v8164_v5 }
 0x9f9   :  { %6070 = vmatmul.mubr.msk.bf16.vlgmr.msra.gmra.mxu0 %vm1013_vm4, %v4394_v10 }
 0x9fa   :  { %6056 = vmatpush3.bf16.msra.mxu1 %v4669_v18 }
 0x9fb   :  { %6057 = vmatprep.subr.bf16.mxu1 %v8164_v5 }
 0x9fe   :  { %6058 = vmatpush3.bf16.msra.mxu1 %v4667_v37 }
 0x9ff   :  { %6073 = vmatprep.subr.bf16.mxu1 %v8164_v5 }
 0xa05   :  { %v4333_v53 = vpop.xlane.xlu0 %4332 }
 0xa06   :  { %v4345_v29 = vsub.f32 %v7994_v2, %v4333_v53 }
 0xa08   :  { %v4358_v6 = vmul.f32 1.442695, %v4345_v29  ;;  %4849 = vrot.lane.b32.xlu0 %v5066_v43, %s6333_s11 }
 0xa09   :  { %v4777_v2 = vpop.permute.xlu0 %4776 }
 0xa0a   :  { %6231 = vpow2.f32 %v4358_v6 }
 0xa17   :  { %v6232_v17 = vpop.eup %6231 }
 0xa18   :  { %v4393_v45 = vpack.c.bf16 %v6232_v17, %v6232_v17  ;;  %v4379_v30 = vsel %vm1013_vm4, %v6232_v17, 0.0 }
 0xa19   :  { %4380 = vadd.xlane.f32.xlu1 %v4379_v30 }
 0xa1a   :  { %6060 = vmatmul.mubr.msk.bf16.vlgmr.msra.gmra.mxu1 %vm1013_vm4, %v4393_v45 }
 0xa1b   :  { %6074 = vmatpush3.bf16.msra.mxu1 %v4786_v55  ;;  %6079 = vmatprep.mubr.msk.bf16.mxu1 %vm6329_vm1, %v8164_v5 }
 0xa1c   :  { %6075 = vmatprep.subr.bf16.mxu1 %v8164_v5 }
 0xa1f   :  { %6076 = vmatpush3.bf16.msra.mxu1 %v4777_v2 }
 0xa20   :  { %6077 = vmatprep.subr.bf16.mxu1 %v8164_v5 }
 0xa29   :  { %v4366_v56 = vpop.xlane.xlu1 %4365 }
 0xa3a   :  { %v4339_v4 = vpop.xlane.xlu0 %4338 }
 0xa3b   :  { %v4347_v57 = vsub.f32 %v8006_v19, %v4339_v4 }
 0xa3d   :  { %v4362_v11 = vmul.f32 1.442695, %v4347_v57 }
 0xa3e   :  { %v4775_v13 = vpop.permute.xlu0 %4774 }
 0xa3f   :  { %6233 = vpow2.f32 %v4362_v11  ;;  %6078 = vmatpush3.bf16.msra.mxu1 %v4775_v13 }
 0xa40   :  { %6235 = vrcp.f32 %v4366_v56 }
 0xa4c   :  { %v6234_v38 = vpop.eup %6233 }
 0xa4d   :  { %v4395_v49 = vpack.c.bf16 %v6234_v38, %v6234_v38  ;;  %v4385_v48 = vsel %vm1013_vm4, %v6234_v38, 0.0  ;;  %v6236_v50 = vpop.eup %6235 }
 0xa4e   :  { %4386 = vadd.xlane.f32.xlu1 %v4385_v48 }
 0xa4f   :  { %6080 = vmatmul.mubr.msk.bf16.vlgmr.msra.gmra.mxu1 %vm1013_vm4, %v4395_v49 }
 0xa5f   :  { %4939 = vrot.lane.b32.xlu1 %v6255_v46, %s6333_s11 }
 0xa61   :  { %v4444_v5 = vpop.f32.mrf.mxu0 }
 0xa62   :  { %v4836_v54 = vmul.f32 %v6236_v50, %v4444_v5 }
 0xa63   :  { %v6011_v41 = vpop.f32.mrf.mxu0 }
 0xa65   :  { %v4447_v19 = vpop.f32.mrf.mxu0 }
 0xa67   :  { %v6012_v58 = vpop.f32.mrf.mxu0 }
 0xa6f   :  { %v4372_v16 = vpop.xlane.xlu0 %4371 }
 0xa73   :  { %v4378_v36 = vpop.xlane.xlu0 %4377 }
 0xa77   :  { %v4384_v63 = vpop.xlane.xlu0 %4383 }
 0xa79   :  { %v4552_v47 = vpop.f32.mrf.mxu0 }
 0xa7b   :  { %v6031_v20 = vpop.f32.mrf.mxu0  ;;  %v4369_v31 = vpop.xlane.xlu0 %4368 }
 0xa7c   :  { %6237 = vrcp.f32 %v4369_v31 }
 0xa7d   :  { %v4555_v21 = vpop.f32.mrf.mxu0  ;;  %v4375_v15 = vpop.xlane.xlu1 %4374  ;;  %6239 = vrcp.f32 %v4372_v16 }
 0xa7e   :  { %6241 = vrcp.f32 %v4375_v15 }
 0xa7f   :  { %v6032_v3 = vpop.f32.mrf.mxu0  ;;  %v4850_v40 = vpop.permute.xlu0 %4849  ;;  %6243 = vrcp.f32 %v4384_v63 }
 0xa80   :  { %v4864_v0 = vsel %vm1105_vm3, %v4850_v40, 0  ;;  %6096 = vmatprep.subr.msk.bf16.mxu0 %vm1105_vm3, %v4850_v40  ;;  %6245 = vrcp.f32 %v4378_v36 }
 0xa81   :  { %6084 = vmatpush3.bf16.msra.mxu0 %v4864_v0 }
 0xa89   :  { %v6238_v34 = vpop.eup %6237 }
 0xa8a   :  { %v6240_v9 = vpop.eup %6239 }
 0xa8b   :  { %v6242_v26 = vpop.eup %6241  ;;  %v4838_v24 = vmul.f32 %v6240_v9, %v4552_v47 }
 0xa8c   :  { %v6244_v37 = vpop.eup %6243 }
 0xa8d   :  { %v6246_v30 = vpop.eup %6245 }
 0xa9d   :  { %v4498_v39 = vpop.f32.mrf.mxu1 }
 0xa9e   :  { %v4837_v32 = vmul.f32 %v6238_v34, %v4498_v39 }
 0xa9f   :  { %v6021_v23 = vpop.f32.mrf.mxu1 }
 0xaa0   :  { %v4844_v61 = vpack.c.bf16 %v4837_v32, %v4836_v54 }
 0xaa1   :  { %v4501_v22 = vpop.f32.mrf.mxu1 }
 0xaa2   :  { %6085 = vmatprep.mubr.msk.bf16.mxu0 %vm533_vm2, %v4844_v61  ;;  %v4381_v45 = vpop.xlane.xlu1 %4380 }
 0xaa3   :  { %v6022_v27 = vpop.f32.mrf.mxu1  ;;  %6247 = vrcp.f32 %v4381_v45 }
 0xaac   :  { %v4660_v7 = vpop.f32.mrf.mxu0 }
 0xaad   :  { %v4840_v4 = vmul.f32 %v6246_v30, %v4660_v7 }
 0xaae   :  { %v6051_v60 = vpop.f32.mrf.mxu0 }
 0xab0   :  { %v4663_v35 = vpop.f32.mrf.mxu0  ;;  %v6248_v55 = vpop.eup %6247 }
 0xab2   :  { %v6052_v52 = vpop.f32.mrf.mxu0 }
 0xab5   :  { %v4606_v8 = vpop.f32.mrf.mxu1 }
 0xab6   :  { %v4839_v51 = vmul.f32 %v6242_v26, %v4606_v8 }
 0xab7   :  { %v6041_v18 = vpop.f32.mrf.mxu1 }
 0xab8   :  { %v4845_v10 = vpack.c.bf16 %v4839_v51, %v4838_v24 }
 0xab9   :  { %v4609_v42 = vpop.f32.mrf.mxu1  ;;  %v4768_v62 = vpop.f32.mrf.mxu0 }
 0xaba   :  { %v4842_v43 = vmul.f32 %v6244_v37, %v4768_v62  ;;  %6086 = vmatmul.mubr.msk.bf16.vlgmr.msra.gmra.mxu0 %vm533_vm2, %v4845_v10 }
 0xabb   :  { %v6042_v53 = vpop.f32.mrf.mxu1  ;;  %v6071_v29 = vpop.f32.mrf.mxu0 }
 0xabd   :  { %v4771_v6 = vpop.f32.mrf.mxu0 }
 0xabf   :  { %v6072_v17 = vpop.f32.mrf.mxu0 }
 0xad7   :  { %v4387_v48 = vpop.xlane.xlu1 %4386 }
 0xad8   :  { %6249 = vrcp.f32 %v4387_v48 }
 0xada   :  { %v4714_v2 = vpop.f32.mrf.mxu1 }
 0xadb   :  { %v4841_v57 = vmul.f32 %v6248_v55, %v4714_v2  ;;  %v4940_v47 = vpop.permute.xlu1 %4939 }
 0xadc   :  { %v6061_v11 = vpop.f32.mrf.mxu1 }
 0xadd   :  { %v4846_v13 = vpack.c.bf16 %v4841_v57, %v4840_v4 }
 0xade   :  { %v4717_v38 = vpop.f32.mrf.mxu1 }
 0xadf   :  { %6089 = vmatprep.mubr.msk.bf16.mxu0 %vm533_vm2, %v4846_v13 }
 0xae0   :  { %v6062_v49 = vpop.f32.mrf.mxu1 }
 0xae5   :  { %v6250_v46 = vpop.eup %6249 }
 0xb0f   :  { %v4822_v5 = vpop.f32.mrf.mxu1 }
 0xb10   :  { %v4843_v41 = vmul.f32 %v6250_v46, %v4822_v5 }
 0xb11   :  { %v6081_v19 = vpop.f32.mrf.mxu1 }
 0xb12   :  { %v4847_v58 = vpack.c.bf16 %v4843_v41, %v4842_v43 }
 0xb13   :  { %v4825_v16 = vpop.f32.mrf.mxu1 }
 0xb14   :  { %6090 = vmatmul.mubr.msk.bf16.gmra.mxu0 %vm533_vm2, %v4847_v58 }
 0xb15   :  { %v6082_v36 = vpop.f32.mrf.mxu1 }
 0xb7a   :  { %v6087_v63 = vpop.f32.mrf.mxu0 }
 0xb7b   :  { %v4933_v20 = vadd.f32 %v6087_v63, %v7933_v44 }
 0xb7c   :  { %v4900_v31 = vpop.f32.mrf.mxu0 }
 0xb7d   :  { %v4944_v21 = vadd.f32 %v4940_v47, %v4933_v20  ;;  %v4931_v3 = vadd.f32 %v4900_v31, %v7941_v14 }
 0xb7e   :  { %v6088_v40 = vpop.f32.mrf.mxu0 }
 0xb7f   :  { %4952 = vst.msk [vmem:[%s8131_s4 + $0x10] sm:$0xff] %vm90_vm0, %v4944_v21  ;;  %v4942_v0 = vadd.f32 %v4940_v47, %v4931_v3  ;;  %v4934_v56 = vadd.f32 %v6088_v40, %v7945_v33 }
 0xb80   :  { %v4903_v50 = vpop.f32.mrf.mxu0 }
 0xb81   :  { %4950 = vst.msk [vmem:[%s8131_s4] sm:$0xff] %vm90_vm0, %v4942_v0  ;;  %v4945_v44 = vadd.f32 %v4940_v47, %v4934_v56  ;;  %v4932_v34 = vadd.f32 %v4903_v50, %v7947_v59 }
 0xb83   :  { %4953 = vst.msk [vmem:[%s8131_s4 + $0x18] sm:$0xff] %vm90_vm0, %v4945_v44  ;;  %v4943_v14 = vadd.f32 %v4940_v47, %v4932_v34 }
 0xb85   :  { %4951 = vst.msk [vmem:[%s8131_s4 + $0x8] sm:$0xff] %vm90_vm0, %v4943_v14 }
 0xbd4   :  { %v6091_v33 = vpop.f32.mrf.mxu0 }
 0xbd5   :  { %v4937_v39 = vadd.f32 %v6091_v33, %v7961_v1 }
 0xbd6   :  { %v4916_v54 = vpop.f32.mrf.mxu0 }
 0xbd7   :  { %v4948_v32 = vadd.f32 %v4940_v47, %v4937_v39  ;;  %v4935_v23 = vadd.f32 %v4916_v54, %v7965_v12 }
 0xbd8   :  { %v6092_v61 = vpop.f32.mrf.mxu0 }
 0xbd9   :  { %4956 = vst.msk [vmem:[%s8131_s4 + $0x30] sm:$0xff] %vm90_vm0, %v4948_v32  ;;  %v4946_v59 = vadd.f32 %v4940_v47, %v4935_v23  ;;  %v4938_v22 = vadd.f32 %v6092_v61, %v7967_v25 }
 0xbda   :  { %v4919_v27 = vpop.f32.mrf.mxu0 }
 0xbdb   :  { %4954 = vst.msk [vmem:[%s8131_s4 + $0x20] sm:$0xff] %vm90_vm0, %v4946_v59  ;;  %v4949_v1 = vadd.f32 %v4940_v47, %v4938_v22  ;;  %v4936_v15 = vadd.f32 %v4919_v27, %v7970_v28 }
 0xbdd   :  { %4957 = vst.msk [vmem:[%s8131_s4 + $0x38] sm:$0xff] %vm90_vm0, %v4949_v1  ;;  %v4947_v12 = vadd.f32 %v4940_v47, %v4936_v15 }
 0xbdf   :  { %4955 = vst.msk [vmem:[%s8131_s4 + $0x28] sm:$0xff] %vm90_vm0, %v4947_v12 }
 0xbe0   :  { %4962 = vsyncpa [#allocation3], 1 }
 0xbe1   :  { %4963 = vsyncpa [#allocation5], 1 }

</bundles_post_ra>
